<compile_context>
chip_gen: v7x
topology: tpu7x:2x2x1
jax: 0.10.0
libtpu: 0.0.40
codegen_flags: <defaults>
</compile_context>

<pallas_src>
import jax
import jax.numpy as jnp
import numpy as np
from jax.experimental import pallas as pl
from jax.experimental.pallas import tpu as pltpu

jax.config.update("jax_default_matmul_precision", "highest")


def gru_attention_kernel(ids_ref, emb_ref,
                         wih_f_ref, whh_f_ref, bih_f_ref, bhh_f_ref,
                         wih_b_ref, whh_b_ref, bih_b_ref, bhh_b_ref,
                         wattn_ref, battn_ref, wfc_ref, bfc_ref,
                         out_ref, gru_ref):
    S = ids_ref.shape[1]
    V, E = emb_ref.shape
    H = whh_f_ref.shape[0]

    # --- Embedding lookup: 2-D one-hot (S, V) @ (V, E) on the MXU. ---
    ids = ids_ref[0]                                               # (S, 1) int32
    onehot = (ids == jax.lax.broadcasted_iota(jnp.int32, (S, V), 1)
              ).astype(jnp.float32)                                # (S, V)
    x = jnp.dot(onehot, emb_ref[...],
                preferred_element_type=jnp.float32)                # (S, E)

    # --- Input-side gate projections for every timestep at once. ---
    gx_f = jnp.dot(x, wih_f_ref[...],
                   preferred_element_type=jnp.float32) + bih_f_ref[...]   # (S, 3H)
    gx_b = jnp.dot(x, wih_b_ref[...],
                   preferred_element_type=jnp.float32) + bih_b_ref[...]   # (S, 3H)

    whh_f = whh_f_ref[...]
    bhh_f = bhh_f_ref[...]
    whh_b = whh_b_ref[...]
    bhh_b = bhh_b_ref[...]

    def sigmoid(v):
        return 1.0 / (1.0 + jnp.exp(-v))

    def cell(gx_t, h, whh, bhh):
        # PyTorch GRU cell, gate order [r, z, n]; reset gate multiplies the
        # hidden-side n-term including its bias.
        gh = jnp.dot(h, whh, preferred_element_type=jnp.float32) + bhh     # (1, 3H)
        r = sigmoid(gx_t[:, 0:H] + gh[:, 0:H])
        z = sigmoid(gx_t[:, H:2 * H] + gh[:, H:2 * H])
        n = jnp.tanh(gx_t[:, 2 * H:3 * H] + r * gh[:, 2 * H:3 * H])
        return (1.0 - z) * n + z * h

    # Forward direction -> lanes [0, H) of the scratch gru_out buffer.
    h = jnp.zeros((1, H), jnp.float32)
    for t in range(S):
        h = cell(gx_f[t:t + 1, :], h, whh_f, bhh_f)
        gru_ref[t:t + 1, 0:H] = h

    # Backward direction -> lanes [H, 2H).
    h = jnp.zeros((1, H), jnp.float32)
    for t in range(S - 1, -1, -1):
        h = cell(gx_b[t:t + 1, :], h, whh_b, bhh_b)
        gru_ref[t:t + 1, H:2 * H] = h

    gru_out = gru_ref[...]                                         # (S, 2H)

    # --- Attention over the sequence axis (softmax along sublanes). ---
    scores = jnp.dot(gru_out, wattn_ref[...],
                     preferred_element_type=jnp.float32) + battn_ref[...]  # (S, 1)
    m = jnp.max(scores, axis=0, keepdims=True)
    e = jnp.exp(scores - m)
    attn = e / jnp.sum(e, axis=0, keepdims=True)                   # (S, 1)
    context = jnp.sum(gru_out * attn, axis=0, keepdims=True)       # (1, 2H)

    # Dropout(0.5) is identity at inference time.
    out_ref[0] = jnp.dot(context, wfc_ref[...],
                         preferred_element_type=jnp.float32) + bfc_ref[...]  # (1, Cp)


def gru_attention_forward(input_ids, p):
    """input_ids: (B, S) int32; p: dict of PyTorch-layout weights (see init)."""
    B, S = input_ids.shape
    V, E = p["emb"].shape
    H = p["w_hh_f"].shape[1]
    C = p["w_fc"].shape[0]
    LANE = 128
    Cp = ((C + LANE - 1) // LANE) * LANE   # lane-dense output width

    ids3 = input_ids.astype(jnp.int32).reshape(B, S, 1)

    # Pre-transpose weights so the kernel only does row-major matmuls.
    wih_f = p["w_ih_f"].T                      # (E, 3H)
    whh_f = p["w_hh_f"].T                      # (H, 3H)
    bih_f = p["b_ih_f"].reshape(1, 3 * H)
    bhh_f = p["b_hh_f"].reshape(1, 3 * H)
    wih_b = p["w_ih_b"].T
    whh_b = p["w_hh_b"].T
    bih_b = p["b_ih_b"].reshape(1, 3 * H)
    bhh_b = p["b_hh_b"].reshape(1, 3 * H)
    w_attn = p["w_attn"].T                     # (2H, 1)
    b_attn = p["b_attn"].reshape(1, 1)
    # Lane-dense classifier: pad C up to a multiple of 128, slice after call.
    w_fc = jnp.zeros((2 * H, Cp), jnp.float32).at[:, :C].set(p["w_fc"].T)
    b_fc = jnp.zeros((1, Cp), jnp.float32).at[:, :C].set(p["b_fc"].reshape(1, C))

    def full(arr):   # whole-array block, fetched once (constant index_map)
        return pl.BlockSpec(arr.shape, lambda b, _nd=arr.ndim: (0,) * _nd)

    out = pl.pallas_call(
        gru_attention_kernel,
        out_shape=jax.ShapeDtypeStruct((B, 1, Cp), jnp.float32),
        grid=(B,),
        in_specs=[
            pl.BlockSpec((1, S, 1), lambda b: (b, 0, 0)),   # token ids
            full(p["emb"]),
            full(wih_f), full(whh_f), full(bih_f), full(bhh_f),
            full(wih_b), full(whh_b), full(bih_b), full(bhh_b),
            full(w_attn), full(b_attn), full(w_fc), full(b_fc),
        ],
        out_specs=pl.BlockSpec((1, 1, Cp), lambda b: (b, 0, 0)),
        scratch_shapes=[pltpu.VMEM((S, 2 * H), jnp.float32)],   # gru_out buffer
        compiler_params=pltpu.CompilerParams(
            dimension_semantics=("parallel",)),
    )(ids3, p["emb"], wih_f, whh_f, bih_f, bhh_f,
      wih_b, whh_b, bih_b, bhh_b, w_attn, b_attn, w_fc, b_fc)

    return out[:, 0, :C]


def init_params(key, vocab_size, embed_dim, hidden_dim, num_classes):
    ks = jax.random.split(key, 13)
    s = 0.1

    def rnd(k, shape):
        return jax.random.normal(k, shape, dtype=jnp.float32) * s

    H = hidden_dim
    return dict(
        emb=rnd(ks[0], (vocab_size, embed_dim)),
        w_ih_f=rnd(ks[1], (3 * H, embed_dim)),
        w_hh_f=rnd(ks[2], (3 * H, H)),
        b_ih_f=rnd(ks[3], (3 * H,)),
        b_hh_f=rnd(ks[4], (3 * H,)),
        w_ih_b=rnd(ks[5], (3 * H, embed_dim)),
        w_hh_b=rnd(ks[6], (3 * H, H)),
        b_ih_b=rnd(ks[7], (3 * H,)),
        b_hh_b=rnd(ks[8], (3 * H,)),
        w_attn=rnd(ks[9], (1, 2 * H)),
        b_attn=rnd(ks[10], (1,)),
        w_fc=rnd(ks[11], (num_classes, 2 * H)),
        b_fc=rnd(ks[12], (num_classes,)),
    )


def gru_attention_reference(input_ids, p):
    """Pure-JAX reference matching PyTorch GRUAttention (default path)."""
    HIGH = jax.lax.Precision.HIGHEST
    x = p["emb"][input_ids]                        # (B, S, E)
    B, S, _ = x.shape
    H = p["w_hh_f"].shape[1]

    def sigmoid(v):
        return 1.0 / (1.0 + jnp.exp(-v))

    def run_dir(w_ih, w_hh, b_ih, b_hh, reverse):
        h = jnp.zeros((B, H), jnp.float32)
        outs = [None] * S
        order = range(S - 1, -1, -1) if reverse else range(S)
        for t in order:
            gi = jnp.dot(x[:, t, :], w_ih.T, precision=HIGH) + b_ih
            gh = jnp.dot(h, w_hh.T, precision=HIGH) + b_hh
            r = sigmoid(gi[:, :H] + gh[:, :H])
            z = sigmoid(gi[:, H:2 * H] + gh[:, H:2 * H])
            n = jnp.tanh(gi[:, 2 * H:] + r * gh[:, 2 * H:])
            h = (1.0 - z) * n + z * h
            outs[t] = h
        return jnp.stack(outs, axis=1)             # (B, S, H)

    out_f = run_dir(p["w_ih_f"], p["w_hh_f"], p["b_ih_f"], p["b_hh_f"], False)
    out_b = run_dir(p["w_ih_b"], p["w_hh_b"], p["b_ih_b"], p["b_hh_b"], True)
    gru_out = jnp.concatenate([out_f, out_b], axis=-1)          # (B, S, 2H)

    scores = jnp.einsum("bsd,kd->bsk", gru_out, p["w_attn"],
                        precision=HIGH)[..., 0] + p["b_attn"][0]  # (B, S)
    attn = jax.nn.softmax(scores, axis=1)[..., None]
    context = jnp.sum(gru_out * attn, axis=1)                   # (B, 2H)
    return jnp.dot(context, p["w_fc"].T, precision=HIGH) + p["b_fc"]


if __name__ == "__main__":
    vocab_size, embed_dim, hidden_dim, num_classes = 128, 32, 32, 8
    batch, seq = 2, 8

    key = jax.random.PRNGKey(0)
    k_ids, k_params = jax.random.split(key)
    input_ids = jax.random.randint(k_ids, (batch, seq), 0, vocab_size,
                                   dtype=jnp.int32)
    params = init_params(k_params, vocab_size, embed_dim, hidden_dim,
                         num_classes)

    out = gru_attention_forward(input_ids, params)
    out = jax.block_until_ready(out)

    ref = gru_attention_reference(input_ids, params)
    np.testing.assert_allclose(np.asarray(out), np.asarray(ref),
                               rtol=1e-3, atol=1e-4)
    print("KERNEL_OK")
</pallas_src>

<mosaic_0001>
module attributes {stable_mosaic.version = 11 : i64} {
  func.func @gru_attention_kernel(%arg0: i32, %arg1: memref<1x8x1xi32, #tpu.memory_space<vmem>>, %arg2: memref<128x32xf32, #tpu.memory_space<vmem>>, %arg3: memref<32x96xf32, #tpu.memory_space<vmem>>, %arg4: memref<32x96xf32, #tpu.memory_space<vmem>>, %arg5: memref<1x96xf32, #tpu.memory_space<vmem>>, %arg6: memref<1x96xf32, #tpu.memory_space<vmem>>, %arg7: memref<32x96xf32, #tpu.memory_space<vmem>>, %arg8: memref<32x96xf32, #tpu.memory_space<vmem>>, %arg9: memref<1x96xf32, #tpu.memory_space<vmem>>, %arg10: memref<1x96xf32, #tpu.memory_space<vmem>>, %arg11: memref<64x1xf32, #tpu.memory_space<vmem>>, %arg12: memref<1x1xf32, #tpu.memory_space<vmem>>, %arg13: memref<64x128xf32, #tpu.memory_space<vmem>>, %arg14: memref<1x128xf32, #tpu.memory_space<vmem>>, %arg15: memref<1x1x128xf32, #tpu.memory_space<vmem>>, %arg16: memref<8x64xf32, #tpu.memory_space<vmem>>) attributes {dimension_semantics = [#tpu.dimension_semantics<parallel>], iteration_bounds = array<i64: 2>, scalar_prefetch = 0 : i64, scratch_operands = 1 : i64, tpu.core_type = #tpu.core_type<tc>, window_params = [{transform_indices = @transform_0, window_bounds = array<i64: 1, 8, 1>}, {pipeline_mode = #tpu.pipeline_mode<synchronous>, transform_indices = @transform_1, window_bounds = array<i64: 128, 32>}, {pipeline_mode = #tpu.pipeline_mode<synchronous>, transform_indices = @transform_2, window_bounds = array<i64: 32, 96>}, {pipeline_mode = #tpu.pipeline_mode<synchronous>, transform_indices = @transform_3, window_bounds = array<i64: 32, 96>}, {pipeline_mode = #tpu.pipeline_mode<synchronous>, transform_indices = @transform_4, window_bounds = array<i64: 1, 96>}, {pipeline_mode = #tpu.pipeline_mode<synchronous>, transform_indices = @transform_5, window_bounds = array<i64: 1, 96>}, {pipeline_mode = #tpu.pipeline_mode<synchronous>, transform_indices = @transform_6, window_bounds = array<i64: 32, 96>}, {pipeline_mode = #tpu.pipeline_mode<synchronous>, transform_indices = @transform_7, window_bounds = array<i64: 32, 96>}, {pipeline_mode = #tpu.pipeline_mode<synchronous>, transform_indices = @transform_8, window_bounds = array<i64: 1, 96>}, {pipeline_mode = #tpu.pipeline_mode<synchronous>, transform_indices = @transform_9, window_bounds = array<i64: 1, 96>}, {pipeline_mode = #tpu.pipeline_mode<synchronous>, transform_indices = @transform_10, window_bounds = array<i64: 64, 1>}, {pipeline_mode = #tpu.pipeline_mode<synchronous>, transform_indices = @transform_11, window_bounds = array<i64: 1, 1>}, {pipeline_mode = #tpu.pipeline_mode<synchronous>, transform_indices = @transform_12, window_bounds = array<i64: 64, 128>}, {pipeline_mode = #tpu.pipeline_mode<synchronous>, transform_indices = @transform_13, window_bounds = array<i64: 1, 128>}, {transform_indices = @transform_14, window_bounds = array<i64: 1, 1, 128>}]} {
    %c0 = arith.constant 0 : index
    %c0_0 = arith.constant 0 : index
    %c0_1 = arith.constant 0 : index
    %0 = vector.load %arg1[%c0, %c0_0, %c0_1] : memref<1x8x1xi32, #tpu.memory_space<vmem>>, vector<1x8x1xi32>
    %1 = vector.shape_cast %0 : vector<1x8x1xi32> to vector<8x1xi32>
    %2 = tpu.iota {dimensions = array<i32: 1>} : vector<8x128xi32>
    %3 = vector.broadcast %1 : vector<8x1xi32> to vector<8x128xi32>
    %4 = arith.cmpi eq, %3, %2 : vector<8x128xi32>
    %5 = arith.extui %4 : vector<8x128xi1> to vector<8x128xi32>
    %6 = arith.sitofp %5 : vector<8x128xi32> to vector<8x128xf32>
    %c0_2 = arith.constant 0 : index
    %c0_3 = arith.constant 0 : index
    %7 = vector.load %arg2[%c0_2, %c0_3] : memref<128x32xf32, #tpu.memory_space<vmem>>, vector<128x32xf32>
    %cst = arith.constant dense<0.000000e+00> : vector<8x32xf32>
    %8 = tpu.matmul %6, %7, %cst {dimension_numbers = #tpu.dot_dimension_numbers<[1], [0], [0], [1], [0, 0, 1, 1], [], []>, precision = #tpu.contract_precision<fp32>} : vector<8x128xf32>, vector<128x32xf32>, vector<8x32xf32> -> vector<8x32xf32>
    %c0_4 = arith.constant 0 : index
    %c0_5 = arith.constant 0 : index
    %9 = vector.load %arg3[%c0_4, %c0_5] : memref<32x96xf32, #tpu.memory_space<vmem>>, vector<32x96xf32>
    %cst_6 = arith.constant dense<0.000000e+00> : vector<8x96xf32>
    %10 = tpu.matmul %8, %9, %cst_6 {dimension_numbers = #tpu.dot_dimension_numbers<[1], [0], [0], [1], [0, 0, 1, 1], [], []>, precision = #tpu.contract_precision<fp32>} : vector<8x32xf32>, vector<32x96xf32>, vector<8x96xf32> -> vector<8x96xf32>
    %c0_7 = arith.constant 0 : index
    %c0_8 = arith.constant 0 : index
    %11 = vector.load %arg5[%c0_7, %c0_8] : memref<1x96xf32, #tpu.memory_space<vmem>>, vector<1x96xf32>
    %12 = vector.broadcast %11 : vector<1x96xf32> to vector<8x96xf32>
    %13 = arith.addf %10, %12 : vector<8x96xf32>
    %c0_9 = arith.constant 0 : index
    %c0_10 = arith.constant 0 : index
    %14 = vector.load %arg7[%c0_9, %c0_10] : memref<32x96xf32, #tpu.memory_space<vmem>>, vector<32x96xf32>
    %cst_11 = arith.constant dense<0.000000e+00> : vector<8x96xf32>
    %15 = tpu.matmul %8, %14, %cst_11 {dimension_numbers = #tpu.dot_dimension_numbers<[1], [0], [0], [1], [0, 0, 1, 1], [], []>, precision = #tpu.contract_precision<fp32>} : vector<8x32xf32>, vector<32x96xf32>, vector<8x96xf32> -> vector<8x96xf32>
    %c0_12 = arith.constant 0 : index
    %c0_13 = arith.constant 0 : index
    %16 = vector.load %arg9[%c0_12, %c0_13] : memref<1x96xf32, #tpu.memory_space<vmem>>, vector<1x96xf32>
    %17 = vector.broadcast %16 : vector<1x96xf32> to vector<8x96xf32>
    %18 = arith.addf %15, %17 : vector<8x96xf32>
    %c0_14 = arith.constant 0 : index
    %c0_15 = arith.constant 0 : index
    %19 = vector.load %arg4[%c0_14, %c0_15] : memref<32x96xf32, #tpu.memory_space<vmem>>, vector<32x96xf32>
    %c0_16 = arith.constant 0 : index
    %c0_17 = arith.constant 0 : index
    %20 = vector.load %arg6[%c0_16, %c0_17] : memref<1x96xf32, #tpu.memory_space<vmem>>, vector<1x96xf32>
    %c0_18 = arith.constant 0 : index
    %c0_19 = arith.constant 0 : index
    %21 = vector.load %arg8[%c0_18, %c0_19] : memref<32x96xf32, #tpu.memory_space<vmem>>, vector<32x96xf32>
    %c0_20 = arith.constant 0 : index
    %c0_21 = arith.constant 0 : index
    %22 = vector.load %arg10[%c0_20, %c0_21] : memref<1x96xf32, #tpu.memory_space<vmem>>, vector<1x96xf32>
    %cst_22 = arith.constant 0.000000e+00 : f32
    %23 = vector.broadcast %cst_22 : f32 to vector<1x32xf32>
    %24 = vector.extract_strided_slice %13 {offsets = [0, 0], sizes = [1, 96], strides = [1, 1]} : vector<8x96xf32> to vector<1x96xf32>
    %cst_23 = arith.constant dense<0.000000e+00> : vector<1x96xf32>
    %25 = tpu.matmul %23, %19, %cst_23 {dimension_numbers = #tpu.dot_dimension_numbers<[1], [0], [0], [1], [0, 0, 1, 1], [], []>, precision = #tpu.contract_precision<fp32>} : vector<1x32xf32>, vector<32x96xf32>, vector<1x96xf32> -> vector<1x96xf32>
    %26 = arith.addf %25, %20 : vector<1x96xf32>
    %27 = vector.extract_strided_slice %24 {offsets = [0, 0], sizes = [1, 32], strides = [1, 1]} : vector<1x96xf32> to vector<1x32xf32>
    %28 = vector.extract_strided_slice %26 {offsets = [0, 0], sizes = [1, 32], strides = [1, 1]} : vector<1x96xf32> to vector<1x32xf32>
    %29 = arith.addf %27, %28 : vector<1x32xf32>
    %cst_24 = arith.constant 0.000000e+00 : f32
    %30 = vector.broadcast %cst_24 : f32 to vector<1x32xf32>
    %31 = arith.subf %30, %29 : vector<1x32xf32>
    %32 = math.exp %31 : vector<1x32xf32>
    %cst_25 = arith.constant 1.000000e+00 : f32
    %33 = vector.broadcast %cst_25 : f32 to vector<1x32xf32>
    %34 = arith.addf %33, %32 : vector<1x32xf32>
    %cst_26 = arith.constant 1.000000e+00 : f32
    %35 = vector.broadcast %cst_26 : f32 to vector<1x32xf32>
    %36 = arith.divf %35, %34 : vector<1x32xf32>
    %37 = vector.extract_strided_slice %24 {offsets = [0, 32], sizes = [1, 32], strides = [1, 1]} : vector<1x96xf32> to vector<1x32xf32>
    %38 = vector.extract_strided_slice %26 {offsets = [0, 32], sizes = [1, 32], strides = [1, 1]} : vector<1x96xf32> to vector<1x32xf32>
    %39 = arith.addf %37, %38 : vector<1x32xf32>
    %cst_27 = arith.constant 0.000000e+00 : f32
    %40 = vector.broadcast %cst_27 : f32 to vector<1x32xf32>
    %41 = arith.subf %40, %39 : vector<1x32xf32>
    %42 = math.exp %41 : vector<1x32xf32>
    %cst_28 = arith.constant 1.000000e+00 : f32
    %43 = vector.broadcast %cst_28 : f32 to vector<1x32xf32>
    %44 = arith.addf %43, %42 : vector<1x32xf32>
    %cst_29 = arith.constant 1.000000e+00 : f32
    %45 = vector.broadcast %cst_29 : f32 to vector<1x32xf32>
    %46 = arith.divf %45, %44 : vector<1x32xf32>
    %47 = vector.extract_strided_slice %24 {offsets = [0, 64], sizes = [1, 32], strides = [1, 1]} : vector<1x96xf32> to vector<1x32xf32>
    %48 = vector.extract_strided_slice %26 {offsets = [0, 64], sizes = [1, 32], strides = [1, 1]} : vector<1x96xf32> to vector<1x32xf32>
    %49 = arith.mulf %36, %48 : vector<1x32xf32>
    %50 = arith.addf %47, %49 : vector<1x32xf32>
    %51 = math.tanh %50 : vector<1x32xf32>
    %cst_30 = arith.constant 1.000000e+00 : f32
    %52 = vector.broadcast %cst_30 : f32 to vector<1x32xf32>
    %53 = arith.subf %52, %46 : vector<1x32xf32>
    %54 = arith.mulf %53, %51 : vector<1x32xf32>
    %55 = arith.mulf %46, %23 : vector<1x32xf32>
    %56 = arith.addf %54, %55 : vector<1x32xf32>
    %c0_31 = arith.constant 0 : index
    %c0_32 = arith.constant 0 : index
    %57 = vector.load %arg16[%c0_31, %c0_32] : memref<8x64xf32, #tpu.memory_space<vmem>>, vector<1x32xf32>
    tpu.vector_store %arg16[%c0_31, %c0_32], %56 {strides = array<i32>} : memref<8x64xf32, #tpu.memory_space<vmem>>, vector<1x32xf32>,
    %58 = vector.extract_strided_slice %13 {offsets = [1, 0], sizes = [1, 96], strides = [1, 1]} : vector<8x96xf32> to vector<1x96xf32>
    %cst_33 = arith.constant dense<0.000000e+00> : vector<1x96xf32>
    %59 = tpu.matmul %56, %19, %cst_33 {dimension_numbers = #tpu.dot_dimension_numbers<[1], [0], [0], [1], [0, 0, 1, 1], [], []>, precision = #tpu.contract_precision<fp32>} : vector<1x32xf32>, vector<32x96xf32>, vector<1x96xf32> -> vector<1x96xf32>
    %60 = arith.addf %59, %20 : vector<1x96xf32>
    %61 = vector.extract_strided_slice %58 {offsets = [0, 0], sizes = [1, 32], strides = [1, 1]} : vector<1x96xf32> to vector<1x32xf32>
    %62 = vector.extract_strided_slice %60 {offsets = [0, 0], sizes = [1, 32], strides = [1, 1]} : vector<1x96xf32> to vector<1x32xf32>
    %63 = arith.addf %61, %62 : vector<1x32xf32>
    %cst_34 = arith.constant 0.000000e+00 : f32
    %64 = vector.broadcast %cst_34 : f32 to vector<1x32xf32>
    %65 = arith.subf %64, %63 : vector<1x32xf32>
    %66 = math.exp %65 : vector<1x32xf32>
    %cst_35 = arith.constant 1.000000e+00 : f32
    %67 = vector.broadcast %cst_35 : f32 to vector<1x32xf32>
    %68 = arith.addf %67, %66 : vector<1x32xf32>
    %cst_36 = arith.constant 1.000000e+00 : f32
    %69 = vector.broadcast %cst_36 : f32 to vector<1x32xf32>
    %70 = arith.divf %69, %68 : vector<1x32xf32>
    %71 = vector.extract_strided_slice %58 {offsets = [0, 32], sizes = [1, 32], strides = [1, 1]} : vector<1x96xf32> to vector<1x32xf32>
    %72 = vector.extract_strided_slice %60 {offsets = [0, 32], sizes = [1, 32], strides = [1, 1]} : vector<1x96xf32> to vector<1x32xf32>
    %73 = arith.addf %71, %72 : vector<1x32xf32>
    %cst_37 = arith.constant 0.000000e+00 : f32
    %74 = vector.broadcast %cst_37 : f32 to vector<1x32xf32>
    %75 = arith.subf %74, %73 : vector<1x32xf32>
    %76 = math.exp %75 : vector<1x32xf32>
    %cst_38 = arith.constant 1.000000e+00 : f32
    %77 = vector.broadcast %cst_38 : f32 to vector<1x32xf32>
    %78 = arith.addf %77, %76 : vector<1x32xf32>
    %cst_39 = arith.constant 1.000000e+00 : f32
    %79 = vector.broadcast %cst_39 : f32 to vector<1x32xf32>
    %80 = arith.divf %79, %78 : vector<1x32xf32>
    %81 = vector.extract_strided_slice %58 {offsets = [0, 64], sizes = [1, 32], strides = [1, 1]} : vector<1x96xf32> to vector<1x32xf32>
    %82 = vector.extract_strided_slice %60 {offsets = [0, 64], sizes = [1, 32], strides = [1, 1]} : vector<1x96xf32> to vector<1x32xf32>
    %83 = arith.mulf %70, %82 : vector<1x32xf32>
    %84 = arith.addf %81, %83 : vector<1x32xf32>
    %85 = math.tanh %84 : vector<1x32xf32>
    %cst_40 = arith.constant 1.000000e+00 : f32
    %86 = vector.broadcast %cst_40 : f32 to vector<1x32xf32>
    %87 = arith.subf %86, %80 : vector<1x32xf32>
    %88 = arith.mulf %87, %85 : vector<1x32xf32>
    %89 = arith.mulf %80, %56 : vector<1x32xf32>
    %90 = arith.addf %88, %89 : vector<1x32xf32>
    %c1 = arith.constant 1 : index
    %c0_41 = arith.constant 0 : index
    %91 = vector.load %arg16[%c1, %c0_41] : memref<8x64xf32, #tpu.memory_space<vmem>>, vector<1x32xf32>
    tpu.vector_store %arg16[%c1, %c0_41], %90 {strides = array<i32>} : memref<8x64xf32, #tpu.memory_space<vmem>>, vector<1x32xf32>,
    %92 = vector.extract_strided_slice %13 {offsets = [2, 0], sizes = [1, 96], strides = [1, 1]} : vector<8x96xf32> to vector<1x96xf32>
    %cst_42 = arith.constant dense<0.000000e+00> : vector<1x96xf32>
    %93 = tpu.matmul %90, %19, %cst_42 {dimension_numbers = #tpu.dot_dimension_numbers<[1], [0], [0], [1], [0, 0, 1, 1], [], []>, precision = #tpu.contract_precision<fp32>} : vector<1x32xf32>, vector<32x96xf32>, vector<1x96xf32> -> vector<1x96xf32>
    %94 = arith.addf %93, %20 : vector<1x96xf32>
    %95 = vector.extract_strided_slice %92 {offsets = [0, 0], sizes = [1, 32], strides = [1, 1]} : vector<1x96xf32> to vector<1x32xf32>
    %96 = vector.extract_strided_slice %94 {offsets = [0, 0], sizes = [1, 32], strides = [1, 1]} : vector<1x96xf32> to vector<1x32xf32>
    %97 = arith.addf %95, %96 : vector<1x32xf32>
    %cst_43 = arith.constant 0.000000e+00 : f32
    %98 = vector.broadcast %cst_43 : f32 to vector<1x32xf32>
    %99 = arith.subf %98, %97 : vector<1x32xf32>
    %100 = math.exp %99 : vector<1x32xf32>
    %cst_44 = arith.constant 1.000000e+00 : f32
    %101 = vector.broadcast %cst_44 : f32 to vector<1x32xf32>
    %102 = arith.addf %101, %100 : vector<1x32xf32>
    %cst_45 = arith.constant 1.000000e+00 : f32
    %103 = vector.broadcast %cst_45 : f32 to vector<1x32xf32>
    %104 = arith.divf %103, %102 : vector<1x32xf32>
    %105 = vector.extract_strided_slice %92 {offsets = [0, 32], sizes = [1, 32], strides = [1, 1]} : vector<1x96xf32> to vector<1x32xf32>
    %106 = vector.extract_strided_slice %94 {offsets = [0, 32], sizes = [1, 32], strides = [1, 1]} : vector<1x96xf32> to vector<1x32xf32>
    %107 = arith.addf %105, %106 : vector<1x32xf32>
    %cst_46 = arith.constant 0.000000e+00 : f32
    %108 = vector.broadcast %cst_46 : f32 to vector<1x32xf32>
    %109 = arith.subf %108, %107 : vector<1x32xf32>
    %110 = math.exp %109 : vector<1x32xf32>
    %cst_47 = arith.constant 1.000000e+00 : f32
    %111 = vector.broadcast %cst_47 : f32 to vector<1x32xf32>
    %112 = arith.addf %111, %110 : vector<1x32xf32>
    %cst_48 = arith.constant 1.000000e+00 : f32
    %113 = vector.broadcast %cst_48 : f32 to vector<1x32xf32>
    %114 = arith.divf %113, %112 : vector<1x32xf32>
    %115 = vector.extract_strided_slice %92 {offsets = [0, 64], sizes = [1, 32], strides = [1, 1]} : vector<1x96xf32> to vector<1x32xf32>
    %116 = vector.extract_strided_slice %94 {offsets = [0, 64], sizes = [1, 32], strides = [1, 1]} : vector<1x96xf32> to vector<1x32xf32>
    %117 = arith.mulf %104, %116 : vector<1x32xf32>
    %118 = arith.addf %115, %117 : vector<1x32xf32>
    %119 = math.tanh %118 : vector<1x32xf32>
    %cst_49 = arith.constant 1.000000e+00 : f32
    %120 = vector.broadcast %cst_49 : f32 to vector<1x32xf32>
    %121 = arith.subf %120, %114 : vector<1x32xf32>
    %122 = arith.mulf %121, %119 : vector<1x32xf32>
    %123 = arith.mulf %114, %90 : vector<1x32xf32>
    %124 = arith.addf %122, %123 : vector<1x32xf32>
    %c2 = arith.constant 2 : index
    %c0_50 = arith.constant 0 : index
    %125 = vector.load %arg16[%c2, %c0_50] : memref<8x64xf32, #tpu.memory_space<vmem>>, vector<1x32xf32>
    tpu.vector_store %arg16[%c2, %c0_50], %124 {strides = array<i32>} : memref<8x64xf32, #tpu.memory_space<vmem>>, vector<1x32xf32>,
    %126 = vector.extract_strided_slice %13 {offsets = [3, 0], sizes = [1, 96], strides = [1, 1]} : vector<8x96xf32> to vector<1x96xf32>
    %cst_51 = arith.constant dense<0.000000e+00> : vector<1x96xf32>
    %127 = tpu.matmul %124, %19, %cst_51 {dimension_numbers = #tpu.dot_dimension_numbers<[1], [0], [0], [1], [0, 0, 1, 1], [], []>, precision = #tpu.contract_precision<fp32>} : vector<1x32xf32>, vector<32x96xf32>, vector<1x96xf32> -> vector<1x96xf32>
    %128 = arith.addf %127, %20 : vector<1x96xf32>
    %129 = vector.extract_strided_slice %126 {offsets = [0, 0], sizes = [1, 32], strides = [1, 1]} : vector<1x96xf32> to vector<1x32xf32>
    %130 = vector.extract_strided_slice %128 {offsets = [0, 0], sizes = [1, 32], strides = [1, 1]} : vector<1x96xf32> to vector<1x32xf32>
    %131 = arith.addf %129, %130 : vector<1x32xf32>
    %cst_52 = arith.constant 0.000000e+00 : f32
    %132 = vector.broadcast %cst_52 : f32 to vector<1x32xf32>
    %133 = arith.subf %132, %131 : vector<1x32xf32>
    %134 = math.exp %133 : vector<1x32xf32>
    %cst_53 = arith.constant 1.000000e+00 : f32
    %135 = vector.broadcast %cst_53 : f32 to vector<1x32xf32>
    %136 = arith.addf %135, %134 : vector<1x32xf32>
    %cst_54 = arith.constant 1.000000e+00 : f32
    %137 = vector.broadcast %cst_54 : f32 to vector<1x32xf32>
    %138 = arith.divf %137, %136 : vector<1x32xf32>
    %139 = vector.extract_strided_slice %126 {offsets = [0, 32], sizes = [1, 32], strides = [1, 1]} : vector<1x96xf32> to vector<1x32xf32>
    %140 = vector.extract_strided_slice %128 {offsets = [0, 32], sizes = [1, 32], strides = [1, 1]} : vector<1x96xf32> to vector<1x32xf32>
    %141 = arith.addf %139, %140 : vector<1x32xf32>
    %cst_55 = arith.constant 0.000000e+00 : f32
    %142 = vector.broadcast %cst_55 : f32 to vector<1x32xf32>
    %143 = arith.subf %142, %141 : vector<1x32xf32>
    %144 = math.exp %143 : vector<1x32xf32>
    %cst_56 = arith.constant 1.000000e+00 : f32
    %145 = vector.broadcast %cst_56 : f32 to vector<1x32xf32>
    %146 = arith.addf %145, %144 : vector<1x32xf32>
    %cst_57 = arith.constant 1.000000e+00 : f32
    %147 = vector.broadcast %cst_57 : f32 to vector<1x32xf32>
    %148 = arith.divf %147, %146 : vector<1x32xf32>
    %149 = vector.extract_strided_slice %126 {offsets = [0, 64], sizes = [1, 32], strides = [1, 1]} : vector<1x96xf32> to vector<1x32xf32>
    %150 = vector.extract_strided_slice %128 {offsets = [0, 64], sizes = [1, 32], strides = [1, 1]} : vector<1x96xf32> to vector<1x32xf32>
    %151 = arith.mulf %138, %150 : vector<1x32xf32>
    %152 = arith.addf %149, %151 : vector<1x32xf32>
    %153 = math.tanh %152 : vector<1x32xf32>
    %cst_58 = arith.constant 1.000000e+00 : f32
    %154 = vector.broadcast %cst_58 : f32 to vector<1x32xf32>
    %155 = arith.subf %154, %148 : vector<1x32xf32>
    %156 = arith.mulf %155, %153 : vector<1x32xf32>
    %157 = arith.mulf %148, %124 : vector<1x32xf32>
    %158 = arith.addf %156, %157 : vector<1x32xf32>
    %c3 = arith.constant 3 : index
    %c0_59 = arith.constant 0 : index
    %159 = vector.load %arg16[%c3, %c0_59] : memref<8x64xf32, #tpu.memory_space<vmem>>, vector<1x32xf32>
    tpu.vector_store %arg16[%c3, %c0_59], %158 {strides = array<i32>} : memref<8x64xf32, #tpu.memory_space<vmem>>, vector<1x32xf32>,
    %160 = vector.extract_strided_slice %13 {offsets = [4, 0], sizes = [1, 96], strides = [1, 1]} : vector<8x96xf32> to vector<1x96xf32>
    %cst_60 = arith.constant dense<0.000000e+00> : vector<1x96xf32>
    %161 = tpu.matmul %158, %19, %cst_60 {dimension_numbers = #tpu.dot_dimension_numbers<[1], [0], [0], [1], [0, 0, 1, 1], [], []>, precision = #tpu.contract_precision<fp32>} : vector<1x32xf32>, vector<32x96xf32>, vector<1x96xf32> -> vector<1x96xf32>
    %162 = arith.addf %161, %20 : vector<1x96xf32>
    %163 = vector.extract_strided_slice %160 {offsets = [0, 0], sizes = [1, 32], strides = [1, 1]} : vector<1x96xf32> to vector<1x32xf32>
    %164 = vector.extract_strided_slice %162 {offsets = [0, 0], sizes = [1, 32], strides = [1, 1]} : vector<1x96xf32> to vector<1x32xf32>
    %165 = arith.addf %163, %164 : vector<1x32xf32>
    %cst_61 = arith.constant 0.000000e+00 : f32
    %166 = vector.broadcast %cst_61 : f32 to vector<1x32xf32>
    %167 = arith.subf %166, %165 : vector<1x32xf32>
    %168 = math.exp %167 : vector<1x32xf32>
    %cst_62 = arith.constant 1.000000e+00 : f32
    %169 = vector.broadcast %cst_62 : f32 to vector<1x32xf32>
    %170 = arith.addf %169, %168 : vector<1x32xf32>
    %cst_63 = arith.constant 1.000000e+00 : f32
    %171 = vector.broadcast %cst_63 : f32 to vector<1x32xf32>
    %172 = arith.divf %171, %170 : vector<1x32xf32>
    %173 = vector.extract_strided_slice %160 {offsets = [0, 32], sizes = [1, 32], strides = [1, 1]} : vector<1x96xf32> to vector<1x32xf32>
    %174 = vector.extract_strided_slice %162 {offsets = [0, 32], sizes = [1, 32], strides = [1, 1]} : vector<1x96xf32> to vector<1x32xf32>
    %175 = arith.addf %173, %174 : vector<1x32xf32>
    %cst_64 = arith.constant 0.000000e+00 : f32
    %176 = vector.broadcast %cst_64 : f32 to vector<1x32xf32>
    %177 = arith.subf %176, %175 : vector<1x32xf32>
    %178 = math.exp %177 : vector<1x32xf32>
    %cst_65 = arith.constant 1.000000e+00 : f32
    %179 = vector.broadcast %cst_65 : f32 to vector<1x32xf32>
    %180 = arith.addf %179, %178 : vector<1x32xf32>
    %cst_66 = arith.constant 1.000000e+00 : f32
    %181 = vector.broadcast %cst_66 : f32 to vector<1x32xf32>
    %182 = arith.divf %181, %180 : vector<1x32xf32>
    %183 = vector.extract_strided_slice %160 {offsets = [0, 64], sizes = [1, 32], strides = [1, 1]} : vector<1x96xf32> to vector<1x32xf32>
    %184 = vector.extract_strided_slice %162 {offsets = [0, 64], sizes = [1, 32], strides = [1, 1]} : vector<1x96xf32> to vector<1x32xf32>
    %185 = arith.mulf %172, %184 : vector<1x32xf32>
    %186 = arith.addf %183, %185 : vector<1x32xf32>
    %187 = math.tanh %186 : vector<1x32xf32>
    %cst_67 = arith.constant 1.000000e+00 : f32
    %188 = vector.broadcast %cst_67 : f32 to vector<1x32xf32>
    %189 = arith.subf %188, %182 : vector<1x32xf32>
    %190 = arith.mulf %189, %187 : vector<1x32xf32>
    %191 = arith.mulf %182, %158 : vector<1x32xf32>
    %192 = arith.addf %190, %191 : vector<1x32xf32>
    %c4 = arith.constant 4 : index
    %c0_68 = arith.constant 0 : index
    %193 = vector.load %arg16[%c4, %c0_68] : memref<8x64xf32, #tpu.memory_space<vmem>>, vector<1x32xf32>
    tpu.vector_store %arg16[%c4, %c0_68], %192 {strides = array<i32>} : memref<8x64xf32, #tpu.memory_space<vmem>>, vector<1x32xf32>,
    %194 = vector.extract_strided_slice %13 {offsets = [5, 0], sizes = [1, 96], strides = [1, 1]} : vector<8x96xf32> to vector<1x96xf32>
    %cst_69 = arith.constant dense<0.000000e+00> : vector<1x96xf32>
    %195 = tpu.matmul %192, %19, %cst_69 {dimension_numbers = #tpu.dot_dimension_numbers<[1], [0], [0], [1], [0, 0, 1, 1], [], []>, precision = #tpu.contract_precision<fp32>} : vector<1x32xf32>, vector<32x96xf32>, vector<1x96xf32> -> vector<1x96xf32>
    %196 = arith.addf %195, %20 : vector<1x96xf32>
    %197 = vector.extract_strided_slice %194 {offsets = [0, 0], sizes = [1, 32], strides = [1, 1]} : vector<1x96xf32> to vector<1x32xf32>
    %198 = vector.extract_strided_slice %196 {offsets = [0, 0], sizes = [1, 32], strides = [1, 1]} : vector<1x96xf32> to vector<1x32xf32>
    %199 = arith.addf %197, %198 : vector<1x32xf32>
    %cst_70 = arith.constant 0.000000e+00 : f32
    %200 = vector.broadcast %cst_70 : f32 to vector<1x32xf32>
    %201 = arith.subf %200, %199 : vector<1x32xf32>
    %202 = math.exp %201 : vector<1x32xf32>
    %cst_71 = arith.constant 1.000000e+00 : f32
    %203 = vector.broadcast %cst_71 : f32 to vector<1x32xf32>
    %204 = arith.addf %203, %202 : vector<1x32xf32>
    %cst_72 = arith.constant 1.000000e+00 : f32
    %205 = vector.broadcast %cst_72 : f32 to vector<1x32xf32>
    %206 = arith.divf %205, %204 : vector<1x32xf32>
    %207 = vector.extract_strided_slice %194 {offsets = [0, 32], sizes = [1, 32], strides = [1, 1]} : vector<1x96xf32> to vector<1x32xf32>
    %208 = vector.extract_strided_slice %196 {offsets = [0, 32], sizes = [1, 32], strides = [1, 1]} : vector<1x96xf32> to vector<1x32xf32>
    %209 = arith.addf %207, %208 : vector<1x32xf32>
    %cst_73 = arith.constant 0.000000e+00 : f32
    %210 = vector.broadcast %cst_73 : f32 to vector<1x32xf32>
    %211 = arith.subf %210, %209 : vector<1x32xf32>
    %212 = math.exp %211 : vector<1x32xf32>
    %cst_74 = arith.constant 1.000000e+00 : f32
    %213 = vector.broadcast %cst_74 : f32 to vector<1x32xf32>
    %214 = arith.addf %213, %212 : vector<1x32xf32>
    %cst_75 = arith.constant 1.000000e+00 : f32
    %215 = vector.broadcast %cst_75 : f32 to vector<1x32xf32>
    %216 = arith.divf %215, %214 : vector<1x32xf32>
    %217 = vector.extract_strided_slice %194 {offsets = [0, 64], sizes = [1, 32], strides = [1, 1]} : vector<1x96xf32> to vector<1x32xf32>
    %218 = vector.extract_strided_slice %196 {offsets = [0, 64], sizes = [1, 32], strides = [1, 1]} : vector<1x96xf32> to vector<1x32xf32>
    %219 = arith.mulf %206, %218 : vector<1x32xf32>
    %220 = arith.addf %217, %219 : vector<1x32xf32>
    %221 = math.tanh %220 : vector<1x32xf32>
    %cst_76 = arith.constant 1.000000e+00 : f32
    %222 = vector.broadcast %cst_76 : f32 to vector<1x32xf32>
    %223 = arith.subf %222, %216 : vector<1x32xf32>
    %224 = arith.mulf %223, %221 : vector<1x32xf32>
    %225 = arith.mulf %216, %192 : vector<1x32xf32>
    %226 = arith.addf %224, %225 : vector<1x32xf32>
    %c5 = arith.constant 5 : index
    %c0_77 = arith.constant 0 : index
    %227 = vector.load %arg16[%c5, %c0_77] : memref<8x64xf32, #tpu.memory_space<vmem>>, vector<1x32xf32>
    tpu.vector_store %arg16[%c5, %c0_77], %226 {strides = array<i32>} : memref<8x64xf32, #tpu.memory_space<vmem>>, vector<1x32xf32>,
    %228 = vector.extract_strided_slice %13 {offsets = [6, 0], sizes = [1, 96], strides = [1, 1]} : vector<8x96xf32> to vector<1x96xf32>
    %cst_78 = arith.constant dense<0.000000e+00> : vector<1x96xf32>
    %229 = tpu.matmul %226, %19, %cst_78 {dimension_numbers = #tpu.dot_dimension_numbers<[1], [0], [0], [1], [0, 0, 1, 1], [], []>, precision = #tpu.contract_precision<fp32>} : vector<1x32xf32>, vector<32x96xf32>, vector<1x96xf32> -> vector<1x96xf32>
    %230 = arith.addf %229, %20 : vector<1x96xf32>
    %231 = vector.extract_strided_slice %228 {offsets = [0, 0], sizes = [1, 32], strides = [1, 1]} : vector<1x96xf32> to vector<1x32xf32>
    %232 = vector.extract_strided_slice %230 {offsets = [0, 0], sizes = [1, 32], strides = [1, 1]} : vector<1x96xf32> to vector<1x32xf32>
    %233 = arith.addf %231, %232 : vector<1x32xf32>
    %cst_79 = arith.constant 0.000000e+00 : f32
    %234 = vector.broadcast %cst_79 : f32 to vector<1x32xf32>
    %235 = arith.subf %234, %233 : vector<1x32xf32>
    %236 = math.exp %235 : vector<1x32xf32>
    %cst_80 = arith.constant 1.000000e+00 : f32
    %237 = vector.broadcast %cst_80 : f32 to vector<1x32xf32>
    %238 = arith.addf %237, %236 : vector<1x32xf32>
    %cst_81 = arith.constant 1.000000e+00 : f32
    %239 = vector.broadcast %cst_81 : f32 to vector<1x32xf32>
    %240 = arith.divf %239, %238 : vector<1x32xf32>
    %241 = vector.extract_strided_slice %228 {offsets = [0, 32], sizes = [1, 32], strides = [1, 1]} : vector<1x96xf32> to vector<1x32xf32>
    %242 = vector.extract_strided_slice %230 {offsets = [0, 32], sizes = [1, 32], strides = [1, 1]} : vector<1x96xf32> to vector<1x32xf32>
    %243 = arith.addf %241, %242 : vector<1x32xf32>
    %cst_82 = arith.constant 0.000000e+00 : f32
    %244 = vector.broadcast %cst_82 : f32 to vector<1x32xf32>
    %245 = arith.subf %244, %243 : vector<1x32xf32>
    %246 = math.exp %245 : vector<1x32xf32>
    %cst_83 = arith.constant 1.000000e+00 : f32
    %247 = vector.broadcast %cst_83 : f32 to vector<1x32xf32>
    %248 = arith.addf %247, %246 : vector<1x32xf32>
    %cst_84 = arith.constant 1.000000e+00 : f32
    %249 = vector.broadcast %cst_84 : f32 to vector<1x32xf32>
    %250 = arith.divf %249, %248 : vector<1x32xf32>
    %251 = vector.extract_strided_slice %228 {offsets = [0, 64], sizes = [1, 32], strides = [1, 1]} : vector<1x96xf32> to vector<1x32xf32>
    %252 = vector.extract_strided_slice %230 {offsets = [0, 64], sizes = [1, 32], strides = [1, 1]} : vector<1x96xf32> to vector<1x32xf32>
    %253 = arith.mulf %240, %252 : vector<1x32xf32>
    %254 = arith.addf %251, %253 : vector<1x32xf32>
    %255 = math.tanh %254 : vector<1x32xf32>
    %cst_85 = arith.constant 1.000000e+00 : f32
    %256 = vector.broadcast %cst_85 : f32 to vector<1x32xf32>
    %257 = arith.subf %256, %250 : vector<1x32xf32>
    %258 = arith.mulf %257, %255 : vector<1x32xf32>
    %259 = arith.mulf %250, %226 : vector<1x32xf32>
    %260 = arith.addf %258, %259 : vector<1x32xf32>
    %c6 = arith.constant 6 : index
    %c0_86 = arith.constant 0 : index
    %261 = vector.load %arg16[%c6, %c0_86] : memref<8x64xf32, #tpu.memory_space<vmem>>, vector<1x32xf32>
    tpu.vector_store %arg16[%c6, %c0_86], %260 {strides = array<i32>} : memref<8x64xf32, #tpu.memory_space<vmem>>, vector<1x32xf32>,
    %262 = vector.extract_strided_slice %13 {offsets = [7, 0], sizes = [1, 96], strides = [1, 1]} : vector<8x96xf32> to vector<1x96xf32>
    %cst_87 = arith.constant dense<0.000000e+00> : vector<1x96xf32>
    %263 = tpu.matmul %260, %19, %cst_87 {dimension_numbers = #tpu.dot_dimension_numbers<[1], [0], [0], [1], [0, 0, 1, 1], [], []>, precision = #tpu.contract_precision<fp32>} : vector<1x32xf32>, vector<32x96xf32>, vector<1x96xf32> -> vector<1x96xf32>
    %264 = arith.addf %263, %20 : vector<1x96xf32>
    %265 = vector.extract_strided_slice %262 {offsets = [0, 0], sizes = [1, 32], strides = [1, 1]} : vector<1x96xf32> to vector<1x32xf32>
    %266 = vector.extract_strided_slice %264 {offsets = [0, 0], sizes = [1, 32], strides = [1, 1]} : vector<1x96xf32> to vector<1x32xf32>
    %267 = arith.addf %265, %266 : vector<1x32xf32>
    %cst_88 = arith.constant 0.000000e+00 : f32
    %268 = vector.broadcast %cst_88 : f32 to vector<1x32xf32>
    %269 = arith.subf %268, %267 : vector<1x32xf32>
    %270 = math.exp %269 : vector<1x32xf32>
    %cst_89 = arith.constant 1.000000e+00 : f32
    %271 = vector.broadcast %cst_89 : f32 to vector<1x32xf32>
    %272 = arith.addf %271, %270 : vector<1x32xf32>
    %cst_90 = arith.constant 1.000000e+00 : f32
    %273 = vector.broadcast %cst_90 : f32 to vector<1x32xf32>
    %274 = arith.divf %273, %272 : vector<1x32xf32>
    %275 = vector.extract_strided_slice %262 {offsets = [0, 32], sizes = [1, 32], strides = [1, 1]} : vector<1x96xf32> to vector<1x32xf32>
    %276 = vector.extract_strided_slice %264 {offsets = [0, 32], sizes = [1, 32], strides = [1, 1]} : vector<1x96xf32> to vector<1x32xf32>
    %277 = arith.addf %275, %276 : vector<1x32xf32>
    %cst_91 = arith.constant 0.000000e+00 : f32
    %278 = vector.broadcast %cst_91 : f32 to vector<1x32xf32>
    %279 = arith.subf %278, %277 : vector<1x32xf32>
    %280 = math.exp %279 : vector<1x32xf32>
    %cst_92 = arith.constant 1.000000e+00 : f32
    %281 = vector.broadcast %cst_92 : f32 to vector<1x32xf32>
    %282 = arith.addf %281, %280 : vector<1x32xf32>
    %cst_93 = arith.constant 1.000000e+00 : f32
    %283 = vector.broadcast %cst_93 : f32 to vector<1x32xf32>
    %284 = arith.divf %283, %282 : vector<1x32xf32>
    %285 = vector.extract_strided_slice %262 {offsets = [0, 64], sizes = [1, 32], strides = [1, 1]} : vector<1x96xf32> to vector<1x32xf32>
    %286 = vector.extract_strided_slice %264 {offsets = [0, 64], sizes = [1, 32], strides = [1, 1]} : vector<1x96xf32> to vector<1x32xf32>
    %287 = arith.mulf %274, %286 : vector<1x32xf32>
    %288 = arith.addf %285, %287 : vector<1x32xf32>
    %289 = math.tanh %288 : vector<1x32xf32>
    %cst_94 = arith.constant 1.000000e+00 : f32
    %290 = vector.broadcast %cst_94 : f32 to vector<1x32xf32>
    %291 = arith.subf %290, %284 : vector<1x32xf32>
    %292 = arith.mulf %291, %289 : vector<1x32xf32>
    %293 = arith.mulf %284, %260 : vector<1x32xf32>
    %294 = arith.addf %292, %293 : vector<1x32xf32>
    %c7 = arith.constant 7 : index
    %c0_95 = arith.constant 0 : index
    %295 = vector.load %arg16[%c7, %c0_95] : memref<8x64xf32, #tpu.memory_space<vmem>>, vector<1x32xf32>
    tpu.vector_store %arg16[%c7, %c0_95], %294 {strides = array<i32>} : memref<8x64xf32, #tpu.memory_space<vmem>>, vector<1x32xf32>,
    %cst_96 = arith.constant 0.000000e+00 : f32
    %296 = vector.broadcast %cst_96 : f32 to vector<1x32xf32>
    %297 = vector.extract_strided_slice %18 {offsets = [7, 0], sizes = [1, 96], strides = [1, 1]} : vector<8x96xf32> to vector<1x96xf32>
    %cst_97 = arith.constant dense<0.000000e+00> : vector<1x96xf32>
    %298 = tpu.matmul %296, %21, %cst_97 {dimension_numbers = #tpu.dot_dimension_numbers<[1], [0], [0], [1], [0, 0, 1, 1], [], []>, precision = #tpu.contract_precision<fp32>} : vector<1x32xf32>, vector<32x96xf32>, vector<1x96xf32> -> vector<1x96xf32>
    %299 = arith.addf %298, %22 : vector<1x96xf32>
    %300 = vector.extract_strided_slice %297 {offsets = [0, 0], sizes = [1, 32], strides = [1, 1]} : vector<1x96xf32> to vector<1x32xf32>
    %301 = vector.extract_strided_slice %299 {offsets = [0, 0], sizes = [1, 32], strides = [1, 1]} : vector<1x96xf32> to vector<1x32xf32>
    %302 = arith.addf %300, %301 : vector<1x32xf32>
    %cst_98 = arith.constant 0.000000e+00 : f32
    %303 = vector.broadcast %cst_98 : f32 to vector<1x32xf32>
    %304 = arith.subf %303, %302 : vector<1x32xf32>
    %305 = math.exp %304 : vector<1x32xf32>
    %cst_99 = arith.constant 1.000000e+00 : f32
    %306 = vector.broadcast %cst_99 : f32 to vector<1x32xf32>
    %307 = arith.addf %306, %305 : vector<1x32xf32>
    %cst_100 = arith.constant 1.000000e+00 : f32
    %308 = vector.broadcast %cst_100 : f32 to vector<1x32xf32>
    %309 = arith.divf %308, %307 : vector<1x32xf32>
    %310 = vector.extract_strided_slice %297 {offsets = [0, 32], sizes = [1, 32], strides = [1, 1]} : vector<1x96xf32> to vector<1x32xf32>
    %311 = vector.extract_strided_slice %299 {offsets = [0, 32], sizes = [1, 32], strides = [1, 1]} : vector<1x96xf32> to vector<1x32xf32>
    %312 = arith.addf %310, %311 : vector<1x32xf32>
    %cst_101 = arith.constant 0.000000e+00 : f32
    %313 = vector.broadcast %cst_101 : f32 to vector<1x32xf32>
    %314 = arith.subf %313, %312 : vector<1x32xf32>
    %315 = math.exp %314 : vector<1x32xf32>
    %cst_102 = arith.constant 1.000000e+00 : f32
    %316 = vector.broadcast %cst_102 : f32 to vector<1x32xf32>
    %317 = arith.addf %316, %315 : vector<1x32xf32>
    %cst_103 = arith.constant 1.000000e+00 : f32
    %318 = vector.broadcast %cst_103 : f32 to vector<1x32xf32>
    %319 = arith.divf %318, %317 : vector<1x32xf32>
    %320 = vector.extract_strided_slice %297 {offsets = [0, 64], sizes = [1, 32], strides = [1, 1]} : vector<1x96xf32> to vector<1x32xf32>
    %321 = vector.extract_strided_slice %299 {offsets = [0, 64], sizes = [1, 32], strides = [1, 1]} : vector<1x96xf32> to vector<1x32xf32>
    %322 = arith.mulf %309, %321 : vector<1x32xf32>
    %323 = arith.addf %320, %322 : vector<1x32xf32>
    %324 = math.tanh %323 : vector<1x32xf32>
    %cst_104 = arith.constant 1.000000e+00 : f32
    %325 = vector.broadcast %cst_104 : f32 to vector<1x32xf32>
    %326 = arith.subf %325, %319 : vector<1x32xf32>
    %327 = arith.mulf %326, %324 : vector<1x32xf32>
    %328 = arith.mulf %319, %296 : vector<1x32xf32>
    %329 = arith.addf %327, %328 : vector<1x32xf32>
    %c7_105 = arith.constant 7 : index
    %c32 = arith.constant 32 : index
    %330 = vector.load %arg16[%c7_105, %c32] : memref<8x64xf32, #tpu.memory_space<vmem>>, vector<1x32xf32>
    tpu.vector_store %arg16[%c7_105, %c32], %329 {strides = array<i32>} : memref<8x64xf32, #tpu.memory_space<vmem>>, vector<1x32xf32>,
    %331 = vector.extract_strided_slice %18 {offsets = [6, 0], sizes = [1, 96], strides = [1, 1]} : vector<8x96xf32> to vector<1x96xf32>
    %cst_106 = arith.constant dense<0.000000e+00> : vector<1x96xf32>
    %332 = tpu.matmul %329, %21, %cst_106 {dimension_numbers = #tpu.dot_dimension_numbers<[1], [0], [0], [1], [0, 0, 1, 1], [], []>, precision = #tpu.contract_precision<fp32>} : vector<1x32xf32>, vector<32x96xf32>, vector<1x96xf32> -> vector<1x96xf32>
    %333 = arith.addf %332, %22 : vector<1x96xf32>
    %334 = vector.extract_strided_slice %331 {offsets = [0, 0], sizes = [1, 32], strides = [1, 1]} : vector<1x96xf32> to vector<1x32xf32>
    %335 = vector.extract_strided_slice %333 {offsets = [0, 0], sizes = [1, 32], strides = [1, 1]} : vector<1x96xf32> to vector<1x32xf32>
    %336 = arith.addf %334, %335 : vector<1x32xf32>
    %cst_107 = arith.constant 0.000000e+00 : f32
    %337 = vector.broadcast %cst_107 : f32 to vector<1x32xf32>
    %338 = arith.subf %337, %336 : vector<1x32xf32>
    %339 = math.exp %338 : vector<1x32xf32>
    %cst_108 = arith.constant 1.000000e+00 : f32
    %340 = vector.broadcast %cst_108 : f32 to vector<1x32xf32>
    %341 = arith.addf %340, %339 : vector<1x32xf32>
    %cst_109 = arith.constant 1.000000e+00 : f32
    %342 = vector.broadcast %cst_109 : f32 to vector<1x32xf32>
    %343 = arith.divf %342, %341 : vector<1x32xf32>
    %344 = vector.extract_strided_slice %331 {offsets = [0, 32], sizes = [1, 32], strides = [1, 1]} : vector<1x96xf32> to vector<1x32xf32>
    %345 = vector.extract_strided_slice %333 {offsets = [0, 32], sizes = [1, 32], strides = [1, 1]} : vector<1x96xf32> to vector<1x32xf32>
    %346 = arith.addf %344, %345 : vector<1x32xf32>
    %cst_110 = arith.constant 0.000000e+00 : f32
    %347 = vector.broadcast %cst_110 : f32 to vector<1x32xf32>
    %348 = arith.subf %347, %346 : vector<1x32xf32>
    %349 = math.exp %348 : vector<1x32xf32>
    %cst_111 = arith.constant 1.000000e+00 : f32
    %350 = vector.broadcast %cst_111 : f32 to vector<1x32xf32>
    %351 = arith.addf %350, %349 : vector<1x32xf32>
    %cst_112 = arith.constant 1.000000e+00 : f32
    %352 = vector.broadcast %cst_112 : f32 to vector<1x32xf32>
    %353 = arith.divf %352, %351 : vector<1x32xf32>
    %354 = vector.extract_strided_slice %331 {offsets = [0, 64], sizes = [1, 32], strides = [1, 1]} : vector<1x96xf32> to vector<1x32xf32>
    %355 = vector.extract_strided_slice %333 {offsets = [0, 64], sizes = [1, 32], strides = [1, 1]} : vector<1x96xf32> to vector<1x32xf32>
    %356 = arith.mulf %343, %355 : vector<1x32xf32>
    %357 = arith.addf %354, %356 : vector<1x32xf32>
    %358 = math.tanh %357 : vector<1x32xf32>
    %cst_113 = arith.constant 1.000000e+00 : f32
    %359 = vector.broadcast %cst_113 : f32 to vector<1x32xf32>
    %360 = arith.subf %359, %353 : vector<1x32xf32>
    %361 = arith.mulf %360, %358 : vector<1x32xf32>
    %362 = arith.mulf %353, %329 : vector<1x32xf32>
    %363 = arith.addf %361, %362 : vector<1x32xf32>
    %c6_114 = arith.constant 6 : index
    %c32_115 = arith.constant 32 : index
    %364 = vector.load %arg16[%c6_114, %c32_115] : memref<8x64xf32, #tpu.memory_space<vmem>>, vector<1x32xf32>
    tpu.vector_store %arg16[%c6_114, %c32_115], %363 {strides = array<i32>} : memref<8x64xf32, #tpu.memory_space<vmem>>, vector<1x32xf32>,
    %365 = vector.extract_strided_slice %18 {offsets = [5, 0], sizes = [1, 96], strides = [1, 1]} : vector<8x96xf32> to vector<1x96xf32>
    %cst_116 = arith.constant dense<0.000000e+00> : vector<1x96xf32>
    %366 = tpu.matmul %363, %21, %cst_116 {dimension_numbers = #tpu.dot_dimension_numbers<[1], [0], [0], [1], [0, 0, 1, 1], [], []>, precision = #tpu.contract_precision<fp32>} : vector<1x32xf32>, vector<32x96xf32>, vector<1x96xf32> -> vector<1x96xf32>
    %367 = arith.addf %366, %22 : vector<1x96xf32>
    %368 = vector.extract_strided_slice %365 {offsets = [0, 0], sizes = [1, 32], strides = [1, 1]} : vector<1x96xf32> to vector<1x32xf32>
    %369 = vector.extract_strided_slice %367 {offsets = [0, 0], sizes = [1, 32], strides = [1, 1]} : vector<1x96xf32> to vector<1x32xf32>
    %370 = arith.addf %368, %369 : vector<1x32xf32>
    %cst_117 = arith.constant 0.000000e+00 : f32
    %371 = vector.broadcast %cst_117 : f32 to vector<1x32xf32>
    %372 = arith.subf %371, %370 : vector<1x32xf32>
    %373 = math.exp %372 : vector<1x32xf32>
    %cst_118 = arith.constant 1.000000e+00 : f32
    %374 = vector.broadcast %cst_118 : f32 to vector<1x32xf32>
    %375 = arith.addf %374, %373 : vector<1x32xf32>
    %cst_119 = arith.constant 1.000000e+00 : f32
    %376 = vector.broadcast %cst_119 : f32 to vector<1x32xf32>
    %377 = arith.divf %376, %375 : vector<1x32xf32>
    %378 = vector.extract_strided_slice %365 {offsets = [0, 32], sizes = [1, 32], strides = [1, 1]} : vector<1x96xf32> to vector<1x32xf32>
    %379 = vector.extract_strided_slice %367 {offsets = [0, 32], sizes = [1, 32], strides = [1, 1]} : vector<1x96xf32> to vector<1x32xf32>
    %380 = arith.addf %378, %379 : vector<1x32xf32>
    %cst_120 = arith.constant 0.000000e+00 : f32
    %381 = vector.broadcast %cst_120 : f32 to vector<1x32xf32>
    %382 = arith.subf %381, %380 : vector<1x32xf32>
    %383 = math.exp %382 : vector<1x32xf32>
    %cst_121 = arith.constant 1.000000e+00 : f32
    %384 = vector.broadcast %cst_121 : f32 to vector<1x32xf32>
    %385 = arith.addf %384, %383 : vector<1x32xf32>
    %cst_122 = arith.constant 1.000000e+00 : f32
    %386 = vector.broadcast %cst_122 : f32 to vector<1x32xf32>
    %387 = arith.divf %386, %385 : vector<1x32xf32>
    %388 = vector.extract_strided_slice %365 {offsets = [0, 64], sizes = [1, 32], strides = [1, 1]} : vector<1x96xf32> to vector<1x32xf32>
    %389 = vector.extract_strided_slice %367 {offsets = [0, 64], sizes = [1, 32], strides = [1, 1]} : vector<1x96xf32> to vector<1x32xf32>
    %390 = arith.mulf %377, %389 : vector<1x32xf32>
    %391 = arith.addf %388, %390 : vector<1x32xf32>
    %392 = math.tanh %391 : vector<1x32xf32>
    %cst_123 = arith.constant 1.000000e+00 : f32
    %393 = vector.broadcast %cst_123 : f32 to vector<1x32xf32>
    %394 = arith.subf %393, %387 : vector<1x32xf32>
    %395 = arith.mulf %394, %392 : vector<1x32xf32>
    %396 = arith.mulf %387, %363 : vector<1x32xf32>
    %397 = arith.addf %395, %396 : vector<1x32xf32>
    %c5_124 = arith.constant 5 : index
    %c32_125 = arith.constant 32 : index
    %398 = vector.load %arg16[%c5_124, %c32_125] : memref<8x64xf32, #tpu.memory_space<vmem>>, vector<1x32xf32>
    tpu.vector_store %arg16[%c5_124, %c32_125], %397 {strides = array<i32>} : memref<8x64xf32, #tpu.memory_space<vmem>>, vector<1x32xf32>,
    %399 = vector.extract_strided_slice %18 {offsets = [4, 0], sizes = [1, 96], strides = [1, 1]} : vector<8x96xf32> to vector<1x96xf32>
    %cst_126 = arith.constant dense<0.000000e+00> : vector<1x96xf32>
    %400 = tpu.matmul %397, %21, %cst_126 {dimension_numbers = #tpu.dot_dimension_numbers<[1], [0], [0], [1], [0, 0, 1, 1], [], []>, precision = #tpu.contract_precision<fp32>} : vector<1x32xf32>, vector<32x96xf32>, vector<1x96xf32> -> vector<1x96xf32>
    %401 = arith.addf %400, %22 : vector<1x96xf32>
    %402 = vector.extract_strided_slice %399 {offsets = [0, 0], sizes = [1, 32], strides = [1, 1]} : vector<1x96xf32> to vector<1x32xf32>
    %403 = vector.extract_strided_slice %401 {offsets = [0, 0], sizes = [1, 32], strides = [1, 1]} : vector<1x96xf32> to vector<1x32xf32>
    %404 = arith.addf %402, %403 : vector<1x32xf32>
    %cst_127 = arith.constant 0.000000e+00 : f32
    %405 = vector.broadcast %cst_127 : f32 to vector<1x32xf32>
    %406 = arith.subf %405, %404 : vector<1x32xf32>
    %407 = math.exp %406 : vector<1x32xf32>
    %cst_128 = arith.constant 1.000000e+00 : f32
    %408 = vector.broadcast %cst_128 : f32 to vector<1x32xf32>
    %409 = arith.addf %408, %407 : vector<1x32xf32>
    %cst_129 = arith.constant 1.000000e+00 : f32
    %410 = vector.broadcast %cst_129 : f32 to vector<1x32xf32>
    %411 = arith.divf %410, %409 : vector<1x32xf32>
    %412 = vector.extract_strided_slice %399 {offsets = [0, 32], sizes = [1, 32], strides = [1, 1]} : vector<1x96xf32> to vector<1x32xf32>
    %413 = vector.extract_strided_slice %401 {offsets = [0, 32], sizes = [1, 32], strides = [1, 1]} : vector<1x96xf32> to vector<1x32xf32>
    %414 = arith.addf %412, %413 : vector<1x32xf32>
    %cst_130 = arith.constant 0.000000e+00 : f32
    %415 = vector.broadcast %cst_130 : f32 to vector<1x32xf32>
    %416 = arith.subf %415, %414 : vector<1x32xf32>
    %417 = math.exp %416 : vector<1x32xf32>
    %cst_131 = arith.constant 1.000000e+00 : f32
    %418 = vector.broadcast %cst_131 : f32 to vector<1x32xf32>
    %419 = arith.addf %418, %417 : vector<1x32xf32>
    %cst_132 = arith.constant 1.000000e+00 : f32
    %420 = vector.broadcast %cst_132 : f32 to vector<1x32xf32>
    %421 = arith.divf %420, %419 : vector<1x32xf32>
    %422 = vector.extract_strided_slice %399 {offsets = [0, 64], sizes = [1, 32], strides = [1, 1]} : vector<1x96xf32> to vector<1x32xf32>
    %423 = vector.extract_strided_slice %401 {offsets = [0, 64], sizes = [1, 32], strides = [1, 1]} : vector<1x96xf32> to vector<1x32xf32>
    %424 = arith.mulf %411, %423 : vector<1x32xf32>
    %425 = arith.addf %422, %424 : vector<1x32xf32>
    %426 = math.tanh %425 : vector<1x32xf32>
    %cst_133 = arith.constant 1.000000e+00 : f32
    %427 = vector.broadcast %cst_133 : f32 to vector<1x32xf32>
    %428 = arith.subf %427, %421 : vector<1x32xf32>
    %429 = arith.mulf %428, %426 : vector<1x32xf32>
    %430 = arith.mulf %421, %397 : vector<1x32xf32>
    %431 = arith.addf %429, %430 : vector<1x32xf32>
    %c4_134 = arith.constant 4 : index
    %c32_135 = arith.constant 32 : index
    %432 = vector.load %arg16[%c4_134, %c32_135] : memref<8x64xf32, #tpu.memory_space<vmem>>, vector<1x32xf32>
    tpu.vector_store %arg16[%c4_134, %c32_135], %431 {strides = array<i32>} : memref<8x64xf32, #tpu.memory_space<vmem>>, vector<1x32xf32>,
    %433 = vector.extract_strided_slice %18 {offsets = [3, 0], sizes = [1, 96], strides = [1, 1]} : vector<8x96xf32> to vector<1x96xf32>
    %cst_136 = arith.constant dense<0.000000e+00> : vector<1x96xf32>
    %434 = tpu.matmul %431, %21, %cst_136 {dimension_numbers = #tpu.dot_dimension_numbers<[1], [0], [0], [1], [0, 0, 1, 1], [], []>, precision = #tpu.contract_precision<fp32>} : vector<1x32xf32>, vector<32x96xf32>, vector<1x96xf32> -> vector<1x96xf32>
    %435 = arith.addf %434, %22 : vector<1x96xf32>
    %436 = vector.extract_strided_slice %433 {offsets = [0, 0], sizes = [1, 32], strides = [1, 1]} : vector<1x96xf32> to vector<1x32xf32>
    %437 = vector.extract_strided_slice %435 {offsets = [0, 0], sizes = [1, 32], strides = [1, 1]} : vector<1x96xf32> to vector<1x32xf32>
    %438 = arith.addf %436, %437 : vector<1x32xf32>
    %cst_137 = arith.constant 0.000000e+00 : f32
    %439 = vector.broadcast %cst_137 : f32 to vector<1x32xf32>
    %440 = arith.subf %439, %438 : vector<1x32xf32>
    %441 = math.exp %440 : vector<1x32xf32>
    %cst_138 = arith.constant 1.000000e+00 : f32
    %442 = vector.broadcast %cst_138 : f32 to vector<1x32xf32>
    %443 = arith.addf %442, %441 : vector<1x32xf32>
    %cst_139 = arith.constant 1.000000e+00 : f32
    %444 = vector.broadcast %cst_139 : f32 to vector<1x32xf32>
    %445 = arith.divf %444, %443 : vector<1x32xf32>
    %446 = vector.extract_strided_slice %433 {offsets = [0, 32], sizes = [1, 32], strides = [1, 1]} : vector<1x96xf32> to vector<1x32xf32>
    %447 = vector.extract_strided_slice %435 {offsets = [0, 32], sizes = [1, 32], strides = [1, 1]} : vector<1x96xf32> to vector<1x32xf32>
    %448 = arith.addf %446, %447 : vector<1x32xf32>
    %cst_140 = arith.constant 0.000000e+00 : f32
    %449 = vector.broadcast %cst_140 : f32 to vector<1x32xf32>
    %450 = arith.subf %449, %448 : vector<1x32xf32>
    %451 = math.exp %450 : vector<1x32xf32>
    %cst_141 = arith.constant 1.000000e+00 : f32
    %452 = vector.broadcast %cst_141 : f32 to vector<1x32xf32>
    %453 = arith.addf %452, %451 : vector<1x32xf32>
    %cst_142 = arith.constant 1.000000e+00 : f32
    %454 = vector.broadcast %cst_142 : f32 to vector<1x32xf32>
    %455 = arith.divf %454, %453 : vector<1x32xf32>
    %456 = vector.extract_strided_slice %433 {offsets = [0, 64], sizes = [1, 32], strides = [1, 1]} : vector<1x96xf32> to vector<1x32xf32>
    %457 = vector.extract_strided_slice %435 {offsets = [0, 64], sizes = [1, 32], strides = [1, 1]} : vector<1x96xf32> to vector<1x32xf32>
    %458 = arith.mulf %445, %457 : vector<1x32xf32>
    %459 = arith.addf %456, %458 : vector<1x32xf32>
    %460 = math.tanh %459 : vector<1x32xf32>
    %cst_143 = arith.constant 1.000000e+00 : f32
    %461 = vector.broadcast %cst_143 : f32 to vector<1x32xf32>
    %462 = arith.subf %461, %455 : vector<1x32xf32>
    %463 = arith.mulf %462, %460 : vector<1x32xf32>
    %464 = arith.mulf %455, %431 : vector<1x32xf32>
    %465 = arith.addf %463, %464 : vector<1x32xf32>
    %c3_144 = arith.constant 3 : index
    %c32_145 = arith.constant 32 : index
    %466 = vector.load %arg16[%c3_144, %c32_145] : memref<8x64xf32, #tpu.memory_space<vmem>>, vector<1x32xf32>
    tpu.vector_store %arg16[%c3_144, %c32_145], %465 {strides = array<i32>} : memref<8x64xf32, #tpu.memory_space<vmem>>, vector<1x32xf32>,
    %467 = vector.extract_strided_slice %18 {offsets = [2, 0], sizes = [1, 96], strides = [1, 1]} : vector<8x96xf32> to vector<1x96xf32>
    %cst_146 = arith.constant dense<0.000000e+00> : vector<1x96xf32>
    %468 = tpu.matmul %465, %21, %cst_146 {dimension_numbers = #tpu.dot_dimension_numbers<[1], [0], [0], [1], [0, 0, 1, 1], [], []>, precision = #tpu.contract_precision<fp32>} : vector<1x32xf32>, vector<32x96xf32>, vector<1x96xf32> -> vector<1x96xf32>
    %469 = arith.addf %468, %22 : vector<1x96xf32>
    %470 = vector.extract_strided_slice %467 {offsets = [0, 0], sizes = [1, 32], strides = [1, 1]} : vector<1x96xf32> to vector<1x32xf32>
    %471 = vector.extract_strided_slice %469 {offsets = [0, 0], sizes = [1, 32], strides = [1, 1]} : vector<1x96xf32> to vector<1x32xf32>
    %472 = arith.addf %470, %471 : vector<1x32xf32>
    %cst_147 = arith.constant 0.000000e+00 : f32
    %473 = vector.broadcast %cst_147 : f32 to vector<1x32xf32>
    %474 = arith.subf %473, %472 : vector<1x32xf32>
    %475 = math.exp %474 : vector<1x32xf32>
    %cst_148 = arith.constant 1.000000e+00 : f32
    %476 = vector.broadcast %cst_148 : f32 to vector<1x32xf32>
    %477 = arith.addf %476, %475 : vector<1x32xf32>
    %cst_149 = arith.constant 1.000000e+00 : f32
    %478 = vector.broadcast %cst_149 : f32 to vector<1x32xf32>
    %479 = arith.divf %478, %477 : vector<1x32xf32>
    %480 = vector.extract_strided_slice %467 {offsets = [0, 32], sizes = [1, 32], strides = [1, 1]} : vector<1x96xf32> to vector<1x32xf32>
    %481 = vector.extract_strided_slice %469 {offsets = [0, 32], sizes = [1, 32], strides = [1, 1]} : vector<1x96xf32> to vector<1x32xf32>
    %482 = arith.addf %480, %481 : vector<1x32xf32>
    %cst_150 = arith.constant 0.000000e+00 : f32
    %483 = vector.broadcast %cst_150 : f32 to vector<1x32xf32>
    %484 = arith.subf %483, %482 : vector<1x32xf32>
    %485 = math.exp %484 : vector<1x32xf32>
    %cst_151 = arith.constant 1.000000e+00 : f32
    %486 = vector.broadcast %cst_151 : f32 to vector<1x32xf32>
    %487 = arith.addf %486, %485 : vector<1x32xf32>
    %cst_152 = arith.constant 1.000000e+00 : f32
    %488 = vector.broadcast %cst_152 : f32 to vector<1x32xf32>
    %489 = arith.divf %488, %487 : vector<1x32xf32>
    %490 = vector.extract_strided_slice %467 {offsets = [0, 64], sizes = [1, 32], strides = [1, 1]} : vector<1x96xf32> to vector<1x32xf32>
    %491 = vector.extract_strided_slice %469 {offsets = [0, 64], sizes = [1, 32], strides = [1, 1]} : vector<1x96xf32> to vector<1x32xf32>
    %492 = arith.mulf %479, %491 : vector<1x32xf32>
    %493 = arith.addf %490, %492 : vector<1x32xf32>
    %494 = math.tanh %493 : vector<1x32xf32>
    %cst_153 = arith.constant 1.000000e+00 : f32
    %495 = vector.broadcast %cst_153 : f32 to vector<1x32xf32>
    %496 = arith.subf %495, %489 : vector<1x32xf32>
    %497 = arith.mulf %496, %494 : vector<1x32xf32>
    %498 = arith.mulf %489, %465 : vector<1x32xf32>
    %499 = arith.addf %497, %498 : vector<1x32xf32>
    %c2_154 = arith.constant 2 : index
    %c32_155 = arith.constant 32 : index
    %500 = vector.load %arg16[%c2_154, %c32_155] : memref<8x64xf32, #tpu.memory_space<vmem>>, vector<1x32xf32>
    tpu.vector_store %arg16[%c2_154, %c32_155], %499 {strides = array<i32>} : memref<8x64xf32, #tpu.memory_space<vmem>>, vector<1x32xf32>,
    %501 = vector.extract_strided_slice %18 {offsets = [1, 0], sizes = [1, 96], strides = [1, 1]} : vector<8x96xf32> to vector<1x96xf32>
    %cst_156 = arith.constant dense<0.000000e+00> : vector<1x96xf32>
    %502 = tpu.matmul %499, %21, %cst_156 {dimension_numbers = #tpu.dot_dimension_numbers<[1], [0], [0], [1], [0, 0, 1, 1], [], []>, precision = #tpu.contract_precision<fp32>} : vector<1x32xf32>, vector<32x96xf32>, vector<1x96xf32> -> vector<1x96xf32>
    %503 = arith.addf %502, %22 : vector<1x96xf32>
    %504 = vector.extract_strided_slice %501 {offsets = [0, 0], sizes = [1, 32], strides = [1, 1]} : vector<1x96xf32> to vector<1x32xf32>
    %505 = vector.extract_strided_slice %503 {offsets = [0, 0], sizes = [1, 32], strides = [1, 1]} : vector<1x96xf32> to vector<1x32xf32>
    %506 = arith.addf %504, %505 : vector<1x32xf32>
    %cst_157 = arith.constant 0.000000e+00 : f32
    %507 = vector.broadcast %cst_157 : f32 to vector<1x32xf32>
    %508 = arith.subf %507, %506 : vector<1x32xf32>
    %509 = math.exp %508 : vector<1x32xf32>
    %cst_158 = arith.constant 1.000000e+00 : f32
    %510 = vector.broadcast %cst_158 : f32 to vector<1x32xf32>
    %511 = arith.addf %510, %509 : vector<1x32xf32>
    %cst_159 = arith.constant 1.000000e+00 : f32
    %512 = vector.broadcast %cst_159 : f32 to vector<1x32xf32>
    %513 = arith.divf %512, %511 : vector<1x32xf32>
    %514 = vector.extract_strided_slice %501 {offsets = [0, 32], sizes = [1, 32], strides = [1, 1]} : vector<1x96xf32> to vector<1x32xf32>
    %515 = vector.extract_strided_slice %503 {offsets = [0, 32], sizes = [1, 32], strides = [1, 1]} : vector<1x96xf32> to vector<1x32xf32>
    %516 = arith.addf %514, %515 : vector<1x32xf32>
    %cst_160 = arith.constant 0.000000e+00 : f32
    %517 = vector.broadcast %cst_160 : f32 to vector<1x32xf32>
    %518 = arith.subf %517, %516 : vector<1x32xf32>
    %519 = math.exp %518 : vector<1x32xf32>
    %cst_161 = arith.constant 1.000000e+00 : f32
    %520 = vector.broadcast %cst_161 : f32 to vector<1x32xf32>
    %521 = arith.addf %520, %519 : vector<1x32xf32>
    %cst_162 = arith.constant 1.000000e+00 : f32
    %522 = vector.broadcast %cst_162 : f32 to vector<1x32xf32>
    %523 = arith.divf %522, %521 : vector<1x32xf32>
    %524 = vector.extract_strided_slice %501 {offsets = [0, 64], sizes = [1, 32], strides = [1, 1]} : vector<1x96xf32> to vector<1x32xf32>
    %525 = vector.extract_strided_slice %503 {offsets = [0, 64], sizes = [1, 32], strides = [1, 1]} : vector<1x96xf32> to vector<1x32xf32>
    %526 = arith.mulf %513, %525 : vector<1x32xf32>
    %527 = arith.addf %524, %526 : vector<1x32xf32>
    %528 = math.tanh %527 : vector<1x32xf32>
    %cst_163 = arith.constant 1.000000e+00 : f32
    %529 = vector.broadcast %cst_163 : f32 to vector<1x32xf32>
    %530 = arith.subf %529, %523 : vector<1x32xf32>
    %531 = arith.mulf %530, %528 : vector<1x32xf32>
    %532 = arith.mulf %523, %499 : vector<1x32xf32>
    %533 = arith.addf %531, %532 : vector<1x32xf32>
    %c1_164 = arith.constant 1 : index
    %c32_165 = arith.constant 32 : index
    %534 = vector.load %arg16[%c1_164, %c32_165] : memref<8x64xf32, #tpu.memory_space<vmem>>, vector<1x32xf32>
    tpu.vector_store %arg16[%c1_164, %c32_165], %533 {strides = array<i32>} : memref<8x64xf32, #tpu.memory_space<vmem>>, vector<1x32xf32>,
    %535 = vector.extract_strided_slice %18 {offsets = [0, 0], sizes = [1, 96], strides = [1, 1]} : vector<8x96xf32> to vector<1x96xf32>
    %cst_166 = arith.constant dense<0.000000e+00> : vector<1x96xf32>
    %536 = tpu.matmul %533, %21, %cst_166 {dimension_numbers = #tpu.dot_dimension_numbers<[1], [0], [0], [1], [0, 0, 1, 1], [], []>, precision = #tpu.contract_precision<fp32>} : vector<1x32xf32>, vector<32x96xf32>, vector<1x96xf32> -> vector<1x96xf32>
    %537 = arith.addf %536, %22 : vector<1x96xf32>
    %538 = vector.extract_strided_slice %535 {offsets = [0, 0], sizes = [1, 32], strides = [1, 1]} : vector<1x96xf32> to vector<1x32xf32>
    %539 = vector.extract_strided_slice %537 {offsets = [0, 0], sizes = [1, 32], strides = [1, 1]} : vector<1x96xf32> to vector<1x32xf32>
    %540 = arith.addf %538, %539 : vector<1x32xf32>
    %cst_167 = arith.constant 0.000000e+00 : f32
    %541 = vector.broadcast %cst_167 : f32 to vector<1x32xf32>
    %542 = arith.subf %541, %540 : vector<1x32xf32>
    %543 = math.exp %542 : vector<1x32xf32>
    %cst_168 = arith.constant 1.000000e+00 : f32
    %544 = vector.broadcast %cst_168 : f32 to vector<1x32xf32>
    %545 = arith.addf %544, %543 : vector<1x32xf32>
    %cst_169 = arith.constant 1.000000e+00 : f32
    %546 = vector.broadcast %cst_169 : f32 to vector<1x32xf32>
    %547 = arith.divf %546, %545 : vector<1x32xf32>
    %548 = vector.extract_strided_slice %535 {offsets = [0, 32], sizes = [1, 32], strides = [1, 1]} : vector<1x96xf32> to vector<1x32xf32>
    %549 = vector.extract_strided_slice %537 {offsets = [0, 32], sizes = [1, 32], strides = [1, 1]} : vector<1x96xf32> to vector<1x32xf32>
    %550 = arith.addf %548, %549 : vector<1x32xf32>
    %cst_170 = arith.constant 0.000000e+00 : f32
    %551 = vector.broadcast %cst_170 : f32 to vector<1x32xf32>
    %552 = arith.subf %551, %550 : vector<1x32xf32>
    %553 = math.exp %552 : vector<1x32xf32>
    %cst_171 = arith.constant 1.000000e+00 : f32
    %554 = vector.broadcast %cst_171 : f32 to vector<1x32xf32>
    %555 = arith.addf %554, %553 : vector<1x32xf32>
    %cst_172 = arith.constant 1.000000e+00 : f32
    %556 = vector.broadcast %cst_172 : f32 to vector<1x32xf32>
    %557 = arith.divf %556, %555 : vector<1x32xf32>
    %558 = vector.extract_strided_slice %535 {offsets = [0, 64], sizes = [1, 32], strides = [1, 1]} : vector<1x96xf32> to vector<1x32xf32>
    %559 = vector.extract_strided_slice %537 {offsets = [0, 64], sizes = [1, 32], strides = [1, 1]} : vector<1x96xf32> to vector<1x32xf32>
    %560 = arith.mulf %547, %559 : vector<1x32xf32>
    %561 = arith.addf %558, %560 : vector<1x32xf32>
    %562 = math.tanh %561 : vector<1x32xf32>
    %cst_173 = arith.constant 1.000000e+00 : f32
    %563 = vector.broadcast %cst_173 : f32 to vector<1x32xf32>
    %564 = arith.subf %563, %557 : vector<1x32xf32>
    %565 = arith.mulf %564, %562 : vector<1x32xf32>
    %566 = arith.mulf %557, %533 : vector<1x32xf32>
    %567 = arith.addf %565, %566 : vector<1x32xf32>
    %c0_174 = arith.constant 0 : index
    %c32_175 = arith.constant 32 : index
    %568 = vector.load %arg16[%c0_174, %c32_175] : memref<8x64xf32, #tpu.memory_space<vmem>>, vector<1x32xf32>
    tpu.vector_store %arg16[%c0_174, %c32_175], %567 {strides = array<i32>} : memref<8x64xf32, #tpu.memory_space<vmem>>, vector<1x32xf32>,
    %c0_176 = arith.constant 0 : index
    %c0_177 = arith.constant 0 : index
    %569 = vector.load %arg16[%c0_176, %c0_177] : memref<8x64xf32, #tpu.memory_space<vmem>>, vector<8x64xf32>
    %c0_178 = arith.constant 0 : index
    %c0_179 = arith.constant 0 : index
    %570 = vector.load %arg11[%c0_178, %c0_179] : memref<64x1xf32, #tpu.memory_space<vmem>>, vector<64x1xf32>
    %cst_180 = arith.constant dense<0.000000e+00> : vector<8x1xf32>
    %571 = tpu.matmul %569, %570, %cst_180 {dimension_numbers = #tpu.dot_dimension_numbers<[1], [0], [0], [1], [0, 0, 1, 1], [], []>, precision = #tpu.contract_precision<fp32>} : vector<8x64xf32>, vector<64x1xf32>, vector<8x1xf32> -> vector<8x1xf32>
    %c0_181 = arith.constant 0 : index
    %c0_182 = arith.constant 0 : index
    %572 = vector.load %arg12[%c0_181, %c0_182] : memref<1x1xf32, #tpu.memory_space<vmem>>, vector<1x1xf32>
    %573 = vector.broadcast %572 : vector<1x1xf32> to vector<8x1xf32>
    %574 = arith.addf %571, %573 : vector<8x1xf32>
    %cst_183 = arith.constant dense<0xFF800000> : vector<1xf32>
    %575 = vector.multi_reduction <maximumf>, %574, %cst_183 [0] : vector<8x1xf32> to vector<1xf32>
    %576 = vector.shape_cast %575 : vector<1xf32> to vector<1x1xf32>
    %577 = vector.broadcast %576 : vector<1x1xf32> to vector<8x1xf32>
    %578 = arith.subf %574, %577 : vector<8x1xf32>
    %579 = math.exp %578 : vector<8x1xf32>
    %cst_184 = arith.constant dense<0.000000e+00> : vector<1xf32>
    %580 = vector.multi_reduction <add>, %579, %cst_184 [0] : vector<8x1xf32> to vector<1xf32>
    %581 = vector.shape_cast %580 : vector<1xf32> to vector<1x1xf32>
    %582 = vector.broadcast %581 : vector<1x1xf32> to vector<8x1xf32>
    %583 = arith.divf %579, %582 : vector<8x1xf32>
    %584 = vector.broadcast %583 : vector<8x1xf32> to vector<8x64xf32>
    %585 = arith.mulf %569, %584 : vector<8x64xf32>
    %cst_185 = arith.constant dense<0.000000e+00> : vector<64xf32>
    %586 = vector.multi_reduction <add>, %585, %cst_185 [0] : vector<8x64xf32> to vector<64xf32>
    %587 = vector.shape_cast %586 : vector<64xf32> to vector<1x64xf32>
    %c0_186 = arith.constant 0 : index
    %c0_187 = arith.constant 0 : index
    %588 = vector.load %arg13[%c0_186, %c0_187] : memref<64x128xf32, #tpu.memory_space<vmem>>, vector<64x128xf32>
    %cst_188 = arith.constant dense<0.000000e+00> : vector<1x128xf32>
    %589 = tpu.matmul %587, %588, %cst_188 {dimension_numbers = #tpu.dot_dimension_numbers<[1], [0], [0], [1], [0, 0, 1, 1], [], []>, precision = #tpu.contract_precision<fp32>} : vector<1x64xf32>, vector<64x128xf32>, vector<1x128xf32> -> vector<1x128xf32>
    %c0_189 = arith.constant 0 : index
    %c0_190 = arith.constant 0 : index
    %590 = vector.load %arg14[%c0_189, %c0_190] : memref<1x128xf32, #tpu.memory_space<vmem>>, vector<1x128xf32>
    %591 = arith.addf %589, %590 : vector<1x128xf32>
    %c0_191 = arith.constant 0 : index
    %c0_192 = arith.constant 0 : index
    %c0_193 = arith.constant 0 : index
    %592 = vector.load %arg15[%c0_191, %c0_192, %c0_193] : memref<1x1x128xf32, #tpu.memory_space<vmem>>, vector<1x1x128xf32>
    %593 = vector.shape_cast %592 : vector<1x1x128xf32> to vector<1x128xf32>
    %594 = vector.shape_cast %591 : vector<1x128xf32> to vector<1x1x128xf32>
    tpu.vector_store %arg15[%c0_191, %c0_192, %c0_193], %594 {strides = array<i32>} : memref<1x1x128xf32, #tpu.memory_space<vmem>>, vector<1x1x128xf32>,
    return
  }
  func.func @transform_0(%arg0: i32) -> (i32, i32, i32) {
    %c0_i32 = arith.constant 0 : i32
    %c0_i32_0 = arith.constant 0 : i32
    %c0_i32_1 = arith.constant 0 : i32
    return %arg0, %c0_i32, %c0_i32_0 : i32, i32, i32
  }
  func.func @transform_1(%arg0: i32) -> (i32, i32) {
    %c0_i32 = arith.constant 0 : i32
    %c0_i32_0 = arith.constant 0 : i32
    %c0_i32_1 = arith.constant 0 : i32
    return %c0_i32, %c0_i32_0 : i32, i32
  }
  func.func @transform_2(%arg0: i32) -> (i32, i32) {
    %c0_i32 = arith.constant 0 : i32
    %c0_i32_0 = arith.constant 0 : i32
    %c0_i32_1 = arith.constant 0 : i32
    return %c0_i32, %c0_i32_0 : i32, i32
  }
  func.func @transform_3(%arg0: i32) -> (i32, i32) {
    %c0_i32 = arith.constant 0 : i32
    %c0_i32_0 = arith.constant 0 : i32
    %c0_i32_1 = arith.constant 0 : i32
    return %c0_i32, %c0_i32_0 : i32, i32
  }
  func.func @transform_4(%arg0: i32) -> (i32, i32) {
    %c0_i32 = arith.constant 0 : i32
    %c0_i32_0 = arith.constant 0 : i32
    %c0_i32_1 = arith.constant 0 : i32
    return %c0_i32, %c0_i32_0 : i32, i32
  }
  func.func @transform_5(%arg0: i32) -> (i32, i32) {
    %c0_i32 = arith.constant 0 : i32
    %c0_i32_0 = arith.constant 0 : i32
    %c0_i32_1 = arith.constant 0 : i32
    return %c0_i32, %c0_i32_0 : i32, i32
  }
  func.func @transform_6(%arg0: i32) -> (i32, i32) {
    %c0_i32 = arith.constant 0 : i32
    %c0_i32_0 = arith.constant 0 : i32
    %c0_i32_1 = arith.constant 0 : i32
    return %c0_i32, %c0_i32_0 : i32, i32
  }
  func.func @transform_7(%arg0: i32) -> (i32, i32) {
    %c0_i32 = arith.constant 0 : i32
    %c0_i32_0 = arith.constant 0 : i32
    %c0_i32_1 = arith.constant 0 : i32
    return %c0_i32, %c0_i32_0 : i32, i32
  }
  func.func @transform_8(%arg0: i32) -> (i32, i32) {
    %c0_i32 = arith.constant 0 : i32
    %c0_i32_0 = arith.constant 0 : i32
    %c0_i32_1 = arith.constant 0 : i32
    return %c0_i32, %c0_i32_0 : i32, i32
  }
  func.func @transform_9(%arg0: i32) -> (i32, i32) {
    %c0_i32 = arith.constant 0 : i32
    %c0_i32_0 = arith.constant 0 : i32
    %c0_i32_1 = arith.constant 0 : i32
    return %c0_i32, %c0_i32_0 : i32, i32
  }
  func.func @transform_10(%arg0: i32) -> (i32, i32) {
    %c0_i32 = arith.constant 0 : i32
    %c0_i32_0 = arith.constant 0 : i32
    %c0_i32_1 = arith.constant 0 : i32
    return %c0_i32, %c0_i32_0 : i32, i32
  }
  func.func @transform_11(%arg0: i32) -> (i32, i32) {
    %c0_i32 = arith.constant 0 : i32
    %c0_i32_0 = arith.constant 0 : i32
    %c0_i32_1 = arith.constant 0 : i32
    return %c0_i32, %c0_i32_0 : i32, i32
  }
  func.func @transform_12(%arg0: i32) -> (i32, i32) {
    %c0_i32 = arith.constant 0 : i32
    %c0_i32_0 = arith.constant 0 : i32
    %c0_i32_1 = arith.constant 0 : i32
    return %c0_i32, %c0_i32_0 : i32, i32
  }
  func.func @transform_13(%arg0: i32) -> (i32, i32) {
    %c0_i32 = arith.constant 0 : i32
    %c0_i32_0 = arith.constant 0 : i32
    %c0_i32_1 = arith.constant 0 : i32
    return %c0_i32, %c0_i32_0 : i32, i32
  }
  func.func @transform_14(%arg0: i32) -> (i32, i32, i32) {
    %c0_i32 = arith.constant 0 : i32
    %c0_i32_0 = arith.constant 0 : i32
    %c0_i32_1 = arith.constant 0 : i32
    return %arg0, %c0_i32, %c0_i32_0 : i32, i32, i32
  }
}

</mosaic_0001>

<bundles_post_ra>
// kernel: tpu_custom_call.1
= control target key start
LH: loop header
LB: loop body
LE: loop exit
PB: predicated region body
PF: predicated region fallthrough
CT: control target
= control target key end

     0   :  { %s17279_s0 = inlined_call_operand.vmem [shape: s32[2,8,1], index: 0, kind: input, shape index: {}]   ;;  %s17280_s1 = inlined_call_operand.vmem [shape: f32[128,32], index: 1, kind: input, shape index: {}]   ;;  %s17281_s2 = inlined_call_operand.vmem [shape: f32[32,96], index: 2, kind: input, shape index: {}]   ;;  %s17282_s3 = inlined_call_operand.vmem [shape: f32[32,96], index: 3, kind: input, shape index: {}]   ;;  %s17283_s4 = inlined_call_operand.vmem [shape: f32[1,96], index: 4, kind: input, shape index: {}]   ;;  %s17284_s5 = inlined_call_operand.vmem [shape: f32[1,96], index: 5, kind: input, shape index: {}]   ;;  %s17285_s6 = inlined_call_operand.vmem [shape: f32[32,96], index: 6, kind: input, shape index: {}]   ;;  %s17286_s7 = inlined_call_operand.vmem [shape: f32[32,96], index: 7, kind: input, shape index: {}]   ;;  %s17287_s8 = inlined_call_operand.vmem [shape: f32[1,96], index: 8, kind: input, shape index: {}]   ;;  %s17288_s9 = inlined_call_operand.vmem [shape: f32[1,96], index: 9, kind: input, shape index: {}]   ;;  %s17289_s10 = inlined_call_operand.vmem [shape: f32[64,1], index: 10, kind: input, shape index: {}]   ;;  %s17290_s11 = inlined_call_operand.<no memory space> [shape: f32[1,1], index: 11, kind: input, shape index: {}]   ;;  %s17291_s12 = inlined_call_operand.vmem [shape: f32[64,128], index: 12, kind: input, shape index: {}]   ;;  %s17292_s13 = inlined_call_operand.vmem [shape: f32[1,128], index: 13, kind: input, shape index: {}]   ;;  %s17293_s14 = inlined_call_operand.hbm [shape: f32[2,1,128], index: 14, kind: output, shape index: {}]  }
   0x1   :  { %17297 = sst [smem:[#allocation9_spill]] %s17279_s0  ;;  %v19_v0 = vstv %s17290_s11 }
   0x2   :  { %20 = vst [vmem:[#allocation3] sm:$0x1] %v19_v0 }
   0x3   :  { %21 = vsyncpa [#allocation5], 0 }
   0x4   :  { %23 = vsyncpa [#allocation5 + $0x1], 0  ;;  %s15572_s15 = smov 0   ;;  %s15574_s16 = smov 0  }
   0x5   :  { %s15576_s17 = smov 0   ;;  %s15578_s18 = smov 0  }
   0x6 LB: > { %17298 = sst [smem:[#allocation7_spill]] %s15480_s17  ;;  %s15593_s11 = sadd.s32 4294967295, %s15484_s18   ;;  %s15484_s18 = sphi %s15578_s18, %s17309_s18   ;;  %s15480_s17 = sphi %s15576_s17, %s17306_s17   ;;  %s15476_s16 = sphi %s15574_s16, %s17308_s16   ;;  %s15472_s15 = sphi %s15572_s15, %s17307_s15  }
   0x7   : > { %s11716_s19 = sadd.s32 4294967294, %s15484_s18   ;;  %s15597_s20 = sadd.s32 1, %s15484_s18  }
   0x8   : > { %s335_s21 = sadd.s32 1, %s15480_s17  ;;  %s332_s22 = ssub.s32 %s15484_s18, %s15597_s20 }
   0x9   : > { %p345_p0 = scmp.ne.s32.totalorder %s15480_s17, %s15476_s16  ;;  %p333_p1 = scmp.eq.s32.totalorder %s332_s22, 0 }
   0xa   : > { %p346_p2 = scmp.eq.s32.totalorder %s15593_s11, 1  ;;  %p351_p3 = scmp.ne.s32.totalorder %s15476_s16, %s15472_s15 }
   0xb   : > { %p352_p4 = scmp.eq.s32.totalorder %s11716_s19, 1  ;;  %p11719_p7 = scmp.ge.s32.totalorder %s15484_s18, 1 }
   0xc   : > { %s15608_s23 = scalar_select %p333_p1, %s15480_s17, %s335_s21  }
   0xd   : > { %p15610_p5 = por %p346_p2, %p345_p0  ;;  %p15614_p6 = por %p352_p4, %p351_p3 }
   0xe   : > { %17299 = sst [smem:[#allocation8_spill]] %s15608_s23  ;;  %p416_p8 = scmp.lt.s32.totalorder %s15484_s18, 3 }
  0x10   : > { %p417_p9 = pnand %p11719_p7, %p416_p8 }
  0x11   : > { %p460_p10 = scmp.lt.s32.totalorder (!%p417_p9), %s15593_s11, 1  ;;  %v473_v1 = vld [vmem:[%s17280_s1] sm:$0xff] (!%p417_p9)  ;;  %v474_v2 = vld [vmem:[%s17280_s1 + $0x8] sm:$0xff] (!%p417_p9)  ;;  %v475_v3 = vld [vmem:[%s17280_s1 + $0x10] sm:$0xff] (!%p417_p9)  ;;  %v15486_v4 = vmov (!%p417_p9), 0   ;;  %v15487_v5 = vmov (!%p417_p9), 0.0|0.0  }
  0x12   : > { %420 = sbr.rel (%p417_p9) target bundleno = 11864 (0x2e58), region = 76  ;;  %15319 = vset.pattern.permute.xlu0 (!%p417_p9), %v15486_v4  ;;  %14107 = vmatprep.subr.bf16.mxu0 (!%p417_p9), %v15487_v5  ;;  %v490_v6 = vand.u32 (!%p417_p9), 4294901760, %v473_v1  ;;  %v493_v7 = vand.u32 (!%p417_p9), 4294901760, %v474_v2  ;;  %v476_v8 = vld [vmem:[%s17280_s1 + $0x18] sm:$0xff] (!%p417_p9)  ;;  %v496_v9 = vand.u32 (!%p417_p9), 4294901760, %v475_v3  ;;  %v477_v10 = vld [vmem:[%s17280_s1 + $0x20] sm:$0xff] (!%p417_p9) }
  0x13   : > { %v478_v11 = vld [vmem:[%s17280_s1 + $0x28] sm:$0xff] (!%p417_p9)  ;;  %v499_v12 = vand.u32 (!%p417_p9), 4294901760, %v476_v8  ;;  %v502_v13 = vand.u32 (!%p417_p9), 4294901760, %v477_v10  ;;  %v479_v15 = vld [vmem:[%s17280_s1 + $0x30] sm:$0xff] (!%p417_p9)  ;;  %v480_v16 = vld [vmem:[%s17280_s1 + $0x38] sm:$0xff] (!%p417_p9)  ;;  %14251 = vmatprep.subr.bf16.mxu1 (!%p417_p9), %v15487_v5  ;;  %s17302_s0 = sld [smem:[#allocation9_spill]] (!%p417_p9) }
  0x14   : > { %v505_v14 = vand.u32 (!%p417_p9), 4294901760, %v478_v11  ;;  %v15650_v17 = vpack.c.bf16 (!%p417_p9), %v493_v7, %v490_v6  ;;  %v15652_v18 = vsub.f32 (!%p417_p9), %v473_v1, %v490_v6  ;;  %v15654_v19 = vsub.f32 (!%p417_p9), %v474_v2, %v493_v7  ;;  %v481_v21 = vld [vmem:[%s17280_s1 + $0x40] sm:$0xff] (!%p417_p9)  ;;  %v482_v22 = vld [vmem:[%s17280_s1 + $0x48] sm:$0xff] (!%p417_p9)  ;;  %v15667_v23 = vld [vmem:[%s17280_s1 + $0x50] sm:$0xff] (!%p417_p9)  ;;  %s15491_s19 = smov (!%p417_p9), 64   ;;  %s15492_s26 = smov (!%p417_p9), 96  }
  0x15   : > { %v15656_v20 = vsub.f32 (!%p417_p9), %v475_v3, %v496_v9  ;;  %v15669_v24 = vpack.c.bf16 (!%p417_p9), %v499_v12, %v496_v9  ;;  %v15671_v25 = vsub.f32 (!%p417_p9), %v476_v8, %v499_v12  ;;  %v15673_v26 = vsub.f32 (!%p417_p9), %v477_v10, %v502_v13  ;;  %v15678_v27 = vld [vmem:[%s17280_s1 + $0x58] sm:$0xff] (!%p417_p9)  ;;  %v15691_v35 = vld [vmem:[%s17280_s1 + $0x60] sm:$0xff] (!%p417_p9)  ;;  %v486_v36 = vld [vmem:[%s17280_s1 + $0x68] sm:$0xff] (!%p417_p9)  ;;  %s11728_s29 = sshll.u32 (!%p417_p9), %s15593_s11, 4 }
  0x16   : > { %14109 = vmatpush3.bf16.msra.mxu0 (!%p417_p9), %v15650_v17  ;;  %v15684_v28 = vsub.f32 (!%p417_p9), %v478_v11, %v505_v14  ;;  %v508_v29 = vand.u32 (!%p417_p9), 4294901760, %v479_v15  ;;  %v511_v30 = vand.u32 (!%p417_p9), 4294901760, %v480_v16  ;;  %v514_v31 = vand.u32 (!%p417_p9), 4294901760, %v481_v21  ;;  %v15713_v44 = vld [vmem:[%s17280_s1 + $0x70] sm:$0xff] (!%p417_p9)  ;;  %v488_v45 = vld [vmem:[%s17280_s1 + $0x78] sm:$0xff] (!%p417_p9) }
  0x17   : > { %14110 = vmatprep.subr.bf16.mxu0 (!%p417_p9), %v15487_v5  ;;  %v517_v33 = vand.u32 (!%p417_p9), 4294901760, %v482_v22  ;;  %v520_v34 = vand.u32 (!%p417_p9), 4294901760, %v15667_v23  ;;  %v523_v40 = vand.u32 (!%p417_p9), 4294901760, %v15678_v27  ;;  %v15703_v41 = vpack.c.bf16 (!%p417_p9), %v505_v14, %v502_v13 }
  0x18   : > { %v15696_v37 = vsub.f32 (!%p417_p9), %v479_v15, %v508_v29  ;;  %v15698_v38 = vsub.f32 (!%p417_p9), %v480_v16, %v511_v30  ;;  %v15700_v39 = vsub.f32 (!%p417_p9), %v481_v21, %v514_v31  ;;  %v526_v47 = vand.u32 (!%p417_p9), 4294901760, %v15691_v35 }
  0x19   : > { %s461_s30 = scalar_select %p460_p10, %s15593_s11, 1  ;;  %v15705_v42 = vsub.f32 %v482_v22, %v517_v33  ;;  %v15708_v43 = vsub.f32 %v15667_v23, %v520_v34  ;;  %v15720_v46 = vsub.f32 %v15678_v27, %v523_v40  ;;  %v529_v48 = vand.u32 4294901760, %v486_v36 }
  0x1a   : > { %14112 = vmatpush3.bf16.msra.mxu0 %v15669_v24  ;;  %v532_v49 = vand.u32 4294901760, %v15713_v44  ;;  %v535_v50 = vand.u32 4294901760, %v488_v45  ;;  %v583_v51 = vand.u32 4294901760, %v15652_v18  ;;  %v15727_v52 = vsub.f32 %v15691_v35, %v526_v47  ;;  %s15493_s11 = smov [#allocation4]  }
  0x1b   : > { %s11720_s21 = sshll.u32 %s461_s30, 3  ;;  %14113 = vmatprep.subr.bf16.mxu0 %v15487_v5  ;;  %v15729_v53 = vsub.f32 %v486_v36, %v529_v48  ;;  %vm15488_vm0 = vmmov 0   ;;  %v15489_v54 = vmov 0.0   ;;  %v590_v55 = vand.u32 4294901760, %v15654_v19  ;;  %s458_s30 = sand.u32 1, %s15476_s16  }
  0x1c   : > { %s463_s23 = scalar_lea.vmem %s17302_s0, %s11720_s21  ;;  %12513 = vmatprep.mubr.msk.f32.mxu0 %vm15488_vm0, %v15489_v54  ;;  %12699 = vmatprep.mubr.msk.f32.mxu1 %vm15488_vm0, %v15489_v54  ;;  %v15737_v56 = vsub.f32 %v15713_v44, %v532_v49  ;;  %v15739_v57 = vsub.f32 %v488_v45, %v535_v50  ;;  %v584_v58 = vsub.f32 %v15652_v18, %v583_v51  ;;  %v597_v62 = vand.u32 4294901760, %v15656_v20  ;;  %s11649_s17 = scalar_lea.sflag [#allocation5], %s458_s30 }
  0x1d   : > { %v464_v32 = vld [vmem:[%s463_s23] sm:$0xff]  ;;  %v15745_v59 = vpack.c.bf16 %v511_v30, %v508_v29  ;;  %v591_v60 = vsub.f32 %v15654_v19, %v590_v55  ;;  %v604_v63 = vand.u32 4294901760, %v15671_v25  ;;  %v15760_v3 = vpack.c.bf16 %v517_v33, %v514_v31  ;;  %s17237_s23 = scalar_lea.hbm %s17293_s14, %s11728_s29  ;;  %s15426_s28 = sshll.u32 %s15493_s11, 4  ;;  %s15427_s28 = int_to_ptr.vmem [resolvable:$false] %s15426_s28 }
  0x1e   : > { %468 = vperm.xlu0 %15319, %v464_v32   ;;  %14115 = vmatpush3.bf16.msra.mxu0 %v15703_v41  ;;  %v585_v61 = vand.u32 4294901760, %v584_v58  ;;  %v598_v1 = vsub.f32 %v15656_v20, %v597_v62  ;;  %v611_v8 = vand.u32 4294901760, %v15673_v26  ;;  %v618_v9 = vand.u32 4294901760, %v15684_v28  ;;  %s15428_s0 = scalar_lea.vmem %s15427_s28, 32 }
  0x1f   : > { %14116 = vmatprep.subr.bf16.mxu0 %v15487_v5  ;;  %v592_v0 = vand.u32 4294901760, %v591_v60  ;;  %v605_v2 = vsub.f32 %v15671_v25, %v604_v63  ;;  %v15776_v13 = vpack.c.bf16 %v523_v40, %v520_v34  ;;  %v625_v16 = vand.u32 4294901760, %v15696_v37 }
  0x20   : > { %v599_v6 = vand.u32 4294901760, %v598_v1  ;;  %v612_v11 = vsub.f32 %v15673_v26, %v611_v8  ;;  %v619_v12 = vsub.f32 %v15684_v28, %v618_v9  ;;  %v632_v21 = vand.u32 4294901760, %v15698_v38 }
  0x21   : > { %v15762_v4 = vpack.c.bf16 %v592_v0, %v585_v61  ;;  %v606_v7 = vand.u32 4294901760, %v605_v2  ;;  %v626_v23 = vsub.f32 %v15696_v37, %v625_v16  ;;  %v15790_v29 = vpack.c.bf16 %v529_v48, %v526_v47 }
  0x22   : > { %14118 = vmatpush3.bf16.msra.mxu0 %v15745_v59  ;;  %v613_v14 = vand.u32 4294901760, %v612_v11  ;;  %v620_v15 = vand.u32 4294901760, %v619_v12  ;;  %v633_v27 = vsub.f32 %v15698_v38, %v632_v21  ;;  %v639_v32 = vand.u32 4294901760, %v15700_v39 }
  0x23   : > { %14119 = vmatprep.subr.bf16.mxu0 %v15487_v5  ;;  %v15767_v10 = vpack.c.bf16 %v606_v7, %v599_v6  ;;  %v627_v30 = vand.u32 4294901760, %v626_v23  ;;  %v646_v33 = vand.u32 4294901760, %v15705_v42  ;;  %v15802_v40 = vpack.c.bf16 %v535_v50, %v532_v49 }
  0x24   : > { %v15781_v22 = vpack.c.bf16 %v620_v15, %v613_v14  ;;  %v634_v31 = vand.u32 4294901760, %v633_v27  ;;  %v640_v35 = vsub.f32 %v15700_v39, %v639_v32  ;;  %v653_v47 = vand.u32 4294901760, %v15708_v43 }
  0x25   : > { %v647_v36 = vsub.f32 %v15705_v42, %v646_v33  ;;  %v660_v48 = vand.u32 4294901760, %v15720_v46  ;;  %v667_v0 = vand.u32 4294901760, %v15727_v52  ;;  %v674_v1 = vand.u32 4294901760, %v15729_v53 }
  0x26   : > { %14121 = vmatpush3.bf16.msra.mxu0 %v15760_v3  ;;  %v14141_v34 = vpack.c.bf16 %v634_v31, %v627_v30  ;;  %v641_v44 = vand.u32 4294901760, %v640_v35  ;;  %v654_v60 = vsub.f32 %v15708_v43, %v653_v47  ;;  %v17296_v14 = vand.u32 4294901760, %v15737_v56 }
  0x27   : > { %14122 = vmatprep.subr.bf16.mxu0 %v15487_v5  ;;  %v648_v45 = vand.u32 4294901760, %v647_v36  ;;  %v661_v61 = vsub.f32 %v15720_v46, %v660_v48  ;;  %v668_v6 = vsub.f32 %v15727_v52, %v667_v0  ;;  %v675_v7 = vsub.f32 %v15729_v53, %v674_v1 }
  0x28   : > { %v655_v49 = vand.u32 4294901760, %v654_v60  ;;  %v17295_v15 = vand.u32 4294901760, %v15739_v57  ;;  %v682_v27 = vsub.f32 %v15737_v56, %v17296_v14  ;;  %v14162_v60 = vpack.c.bf16 %v15684_v28, %v15673_v26 }
  0x29   : > { %v14144_v58 = vpack.c.bf16 %v648_v45, %v641_v44  ;;  %v662_v50 = vand.u32 4294901760, %v661_v61  ;;  %v669_v11 = vand.u32 4294901760, %v668_v6  ;;  %v676_v12 = vand.u32 4294901760, %v675_v7 }
  0x2a   : > { %14124 = vmatpush3.bf16.msra.mxu0 %v15776_v13  ;;  %v689_v30 = vsub.f32 %v15739_v57, %v17295_v15  ;;  %v683_v31 = vand.u32 4294901760, %v682_v27  ;;  %v14156_v44 = vpack.c.bf16 %v15654_v19, %v15652_v18  ;;  %v14159_v45 = vpack.c.bf16 %v15671_v25, %v15656_v20 }
  0x2b   : > { %14125 = vmatprep.subr.bf16.mxu0 %v15487_v5  ;;  %v14147_v2 = vpack.c.bf16 %v662_v50, %v655_v49  ;;  %v14150_v23 = vpack.c.bf16 %v676_v12, %v669_v11  ;;  %v14165_v61 = vpack.c.bf16 %v15698_v38, %v15696_v37  ;;  %v14168_v49 = vpack.c.bf16 %v15705_v42, %v15700_v39 }
  0x2c   : > { %v690_v35 = vand.u32 4294901760, %v689_v30  ;;  %v14171_v50 = vpack.c.bf16 %v15720_v46, %v15708_v43  ;;  %v14174_v6 = vpack.c.bf16 %v15729_v53, %v15727_v52  ;;  %v14177_v7 = vpack.c.bf16 %v15739_v57, %v15737_v56  ;;  %v1133_v52 = vld [vmem:[%s17281_s2 + $0x18] sm:$0xff] }
  0x2d   : > { %v465_v11 = vlaneseq  ;;  %v14210_v18 = vpack.c.bf16 %v618_v9, %v611_v8  ;;  %v14213_v19 = vpack.c.bf16 %v632_v21, %v625_v16  ;;  %v14216_v20 = vpack.c.bf16 %v646_v33, %v639_v32 }
  0x2e   : > { %14127 = vmatpush3.bf16.msra.mxu0 %v15790_v29  ;;  %v14153_v36 = vpack.c.bf16 %v690_v35, %v683_v31  ;;  %v14219_v25 = vpack.c.bf16 %v660_v48, %v653_v47  ;;  %v14222_v26 = vpack.c.bf16 %v674_v1, %v667_v0  ;;  %v17303_v28 = vand.u32 4294901760, %v15737_v56 }
  0x2f   : > { %14128 = vmatprep.subr.bf16.mxu0 %v15487_v5  ;;  %v15847_v12 = vand.u32 127, %v465_v11  ;;  %v17304_v37 = vand.u32 4294901760, %v15739_v57  ;;  %vm1141_vm2 = vcmask 261120   ;;  %vm2654_vm3 = vcmask 253952  }
  0x30   : > { %vm3177_vm4 = vcmask 254977   ;;  %vm9986_vm5 = vcmask 517377   ;;  %vm4229_vm6 = vcmask 257027   ;;  %vm8940_vm7 = vcmask 519427  }
  0x31   : > { %v14225_v38 = vpack.c.bf16 %v17304_v37, %v17303_v28  ;;  %vm5281_vm8 = vcmask 259077   ;;  %vm7894_vm9 = vcmask 521477   ;;  %vm6333_vm10 = vcmask 261127  }
  0x32   : > { %14130 = vmatpush3.bf16.msra.mxu0 %v15802_v40  ;;  %vm6848_vm11 = vcmask 523527   ;;  %vm3703_vm12 = vcmask 256002   ;;  %vm9463_vm13 = vcmask 518402   ;;  %vm4755_vm14 = vcmask 258052  }
  0x33   : > { %14131 = vmatprep.subr.bf16.mxu0 %v15487_v5  ;;  %vm8417_vm15 = vcmask 520452  }
  0x9d   : > { %v15849_v27 = vpop.permute.xlu0 %468 }
  0x9e   : > { %vm470_vm1 = vcmp.eq.s32.totalorder %v15849_v27, %v15847_v12 }
  0x9f   : > { %v11721_v30 = vsel %vm470_vm1, 1.0, %v15489_v54 }
  0xa0   : > { %v571_v31 = vsub.f32 %v11721_v30, %v11721_v30 }
  0xa2   : > { %v572_v35 = vand.u32 4294901760, %v571_v31 }
  0xa4   : > { %v573_v15 = vsub.f32 %v571_v31, %v572_v35 }
  0xa6   : > { %v574_v14 = vand.u32 4294901760, %v573_v15 }
  0xa8   : > { %12514 = vmatmul.mubr.f32.vlgmr.msra.gmra.mrb[0].mxu0 %v574_v14  ;;  %v2127_v14 = vld [vmem:[%s17282_s3 + $0x8] sm:$0xff] }
  0xa9   : > { %14133 = vmatpush3.bf16.msra.mxu0 %v15762_v4  ;;  %12548 = vmatprep.mubr.msk.f32.mxu0 %vm15488_vm0, %v15489_v54  ;;  %v15490_v4 = vmov 1.0  }
  0xaa   : > { %14134 = vmatprep.subr.bf16.mxu0 %v15487_v5 }
  0xad   : > { %14136 = vmatpush3.bf16.msra.mxu0 %v15767_v10  ;;  %v14204_v10 = vpack.c.bf16 %v590_v55, %v583_v51  ;;  %v1132_v51 = vld [vmem:[%s17281_s2 + $0x10] sm:$0xff]  ;;  %v1155_v55 = vand.u32 4294901760, %v1133_v52 }
  0xae   : > { %14137 = vmatprep.subr.bf16.mxu0 %v15487_v5  ;;  %v1152_v53 = vand.u32 4294901760, %v1132_v51 }
  0xb1   : > { %14139 = vmatpush3.bf16.msra.mxu0 %v15781_v22  ;;  %v14207_v22 = vpack.c.bf16 %v604_v63, %v597_v62  ;;  %v15996_v62 = vsub.f32 %v1132_v51, %v1152_v53  ;;  %v15998_v63 = vsub.f32 %v1133_v52, %v1155_v55 }
  0xb2   : > { %14140 = vmatprep.subr.bf16.mxu0 %v15487_v5 }
  0xb3   : > { %v1241_v16 = vand.u32 4294901760, %v15996_v62  ;;  %v1248_v21 = vand.u32 4294901760, %v15998_v63 }
  0xb5   : > { %14142 = vmatpush3.bf16.msra.mxu0 %v14141_v34  ;;  %v1242_v32 = vsub.f32 %v15996_v62, %v1241_v16  ;;  %v1249_v33 = vsub.f32 %v15998_v63, %v1248_v21  ;;  %v16014_v1 = vpack.c.bf16 %v1248_v21, %v1241_v16 }
  0xb6   : > { %14143 = vmatprep.subr.bf16.mxu0 %v15487_v5 }
  0xb7   : > { %v1243_v34 = vand.u32 4294901760, %v1242_v32 }
  0xb9   : > { %14145 = vmatpush3.bf16.msra.mxu0 %v14144_v58  ;;  %v14267_v58 = vpack.c.bf16 %v15998_v63, %v15996_v62 }
  0xba   : > { %14146 = vmatprep.subr.bf16.mxu0 %v15487_v5 }
  0xbd   : > { %14148 = vmatpush3.bf16.msra.mxu0 %v14147_v2  ;;  %v2126_v2 = vld [vmem:[%s17282_s3] sm:$0xff] }
  0xbe   : > { %14149 = vmatprep.subr.bf16.mxu0 %v15487_v5  ;;  %v2140_v15 = vand.u32 4294901760, %v2126_v2 }
  0xc1   : > { %14151 = vmatpush3.bf16.msra.mxu0 %v14150_v23  ;;  %v2143_v23 = vand.u32 4294901760, %v2127_v14 }
  0xc2   : > { %14152 = vmatprep.subr.bf16.mxu0 %v15487_v5 }
  0xc5   : > { %14154 = vmatpush3.bf16.msra.mxu0 %v14153_v36  ;;  %v16022_v36 = vpack.c.bf16 %v2143_v23, %v2140_v15 }
  0xc6   : > { %14155 = vmatprep.subr.bf16.mxu0 %v15487_v5 }
  0xc8   : > { %12549 = vmatmul.mubr.msk.f32.vlgmr.msra.gmra.mrb[0].mxu0 %vm470_vm1, %v15490_v4 }
  0xc9   : > { %14157 = vmatpush3.bf16.msra.mxu0 %v14156_v44  ;;  %12583 = vmatprep.mubr.msk.f32.mxu0 %vm15488_vm0, %v15489_v54  ;;  %v2220_v44 = vsub.f32 %v2126_v2, %v2140_v15 }
  0xca   : > { %14158 = vmatprep.subr.bf16.mxu0 %v15487_v5 }
  0xcd   : > { %14160 = vmatpush3.bf16.msra.mxu0 %v14159_v45  ;;  %v2227_v45 = vsub.f32 %v2127_v14, %v2143_v23 }
  0xce   : > { %14161 = vmatprep.subr.bf16.mxu0 %v15487_v5 }
  0xcf   : > { %v16040_v37 = vpack.c.bf16 %v2227_v45, %v2220_v44 }
  0xd1   : > { %14163 = vmatpush3.bf16.msra.mxu0 %v14162_v60  ;;  %v2128_v60 = vld [vmem:[%s17282_s3 + $0x10] sm:$0xff] }
  0xd2   : > { %14164 = vmatprep.subr.bf16.mxu0 %v15487_v5 }
  0xd5   : > { %14166 = vmatpush3.bf16.msra.mxu0 %v14165_v61  ;;  %v2129_v61 = vld [vmem:[%s17282_s3 + $0x18] sm:$0xff] }
  0xd6   : > { %14167 = vmatprep.subr.bf16.mxu0 %v15487_v5 }
  0xd9   : > { %14169 = vmatpush3.bf16.msra.mxu0 %v14168_v49  ;;  %v2146_v49 = vand.u32 4294901760, %v2128_v60 }
  0xda   : > { %14170 = vmatprep.subr.bf16.mxu0 %v15487_v5 }
  0xdb   : > { %v2234_v30 = vsub.f32 %v2128_v60, %v2146_v49 }
  0xdd   : > { %14172 = vmatpush3.bf16.msra.mxu0 %v14171_v50  ;;  %v2149_v50 = vand.u32 4294901760, %v2129_v61 }
  0xde   : > { %14173 = vmatprep.subr.bf16.mxu0 %v15487_v5 }
  0xdf   : > { %v16032_v11 = vpack.c.bf16 %v2149_v50, %v2146_v49 }
  0xe1   : > { %14175 = vmatpush3.bf16.msra.mxu0 %v14174_v6  ;;  %v2221_v6 = vand.u32 4294901760, %v2220_v44 }
  0xe2   : > { %14176 = vmatprep.subr.bf16.mxu0 %v15487_v5 }
  0xe3   : > { %v2222_v12 = vsub.f32 %v2220_v44, %v2221_v6 }
  0xe5   : > { %14178 = vmatpush3.bf16.msra.mxu0 %v14177_v7  ;;  %v2228_v7 = vand.u32 4294901760, %v2227_v45 }
  0xe6   : > { %14179 = vmatprep.subr.bf16.mxu0 %v15487_v5 }
  0xe7   : > { %v2229_v27 = vsub.f32 %v2227_v45, %v2228_v7 }
  0xe8   : > { %12584 = vmatmul.mubr.f32.vlgmr.msra.gmra.mrb[0].mxu0 %v571_v31  ;;  %v2241_v31 = vsub.f32 %v2129_v61, %v2149_v50 }
  0xe9   : > { %14181 = vmatpush3.bf16.msra.mxu0 %v15650_v17  ;;  %12618 = vmatprep.mubr.msk.f32.mxu0 %vm15488_vm0, %v15489_v54 }
  0xea   : > { %14182 = vmatprep.subr.bf16.mxu0 %v15487_v5 }
  0xed   : > { %14184 = vmatpush3.bf16.msra.mxu0 %v15669_v24 }
  0xee   : > { %14185 = vmatprep.subr.bf16.mxu0 %v15487_v5 }
  0xf1   : > { %14187 = vmatpush3.bf16.msra.mxu0 %v15703_v41 }
  0xf2   : > { %14188 = vmatprep.subr.bf16.mxu0 %v15487_v5 }
  0xf5   : > { %14190 = vmatpush3.bf16.msra.mxu0 %v15745_v59 }
  0xf6   : > { %14191 = vmatprep.subr.bf16.mxu0 %v15487_v5 }
  0xf9   : > { %14193 = vmatpush3.bf16.msra.mxu0 %v15760_v3 }
  0xfa   : > { %14194 = vmatprep.subr.bf16.mxu0 %v15487_v5 }
  0xfd   : > { %14196 = vmatpush3.bf16.msra.mxu0 %v15776_v13 }
  0xfe   : > { %14197 = vmatprep.subr.bf16.mxu0 %v15487_v5 }
 0x101   : > { %14199 = vmatpush3.bf16.msra.mxu0 %v15790_v29 }
 0x102   : > { %14200 = vmatprep.subr.bf16.mxu0 %v15487_v5 }
 0x105   : > { %14202 = vmatpush3.bf16.msra.mxu0 %v15802_v40 }
 0x106   : > { %14203 = vmatprep.subr.bf16.mxu0 %v15487_v5 }
 0x108   : > { %12619 = vmatmul.mubr.f32.vlgmr.msra.gmra.mrb[0].mxu0 %v572_v35  ;;  %v2223_v35 = vand.u32 4294901760, %v2222_v12 }
 0x109   : > { %14205 = vmatpush3.bf16.msra.mxu0 %v14204_v10  ;;  %12653 = vmatprep.mubr.msk.f32.mxu0 %vm15488_vm0, %v15489_v54  ;;  %v2235_v10 = vand.u32 4294901760, %v2234_v30 }
 0x10a   : > { %14206 = vmatprep.subr.bf16.mxu0 %v15487_v5 }
 0x10d   : > { %14208 = vmatpush3.bf16.msra.mxu0 %v14207_v22  ;;  %v2242_v22 = vand.u32 4294901760, %v2241_v31 }
 0x10e   : > { %14209 = vmatprep.subr.bf16.mxu0 %v15487_v5 }
 0x10f   : > { %v16055_v52 = vpack.c.bf16 %v2242_v22, %v2235_v10 }
 0x111   : > { %14211 = vmatpush3.bf16.msra.mxu0 %v14210_v18 }
 0x112   : > { %14212 = vmatprep.subr.bf16.mxu0 %v15487_v5 }
 0x115   : > { %14214 = vmatpush3.bf16.msra.mxu0 %v14213_v19  ;;  %v2236_v19 = vsub.f32 %v2234_v30, %v2235_v10  ;;  %v11725_v10 = vld [vmem:[%s17283_s4] ss:$0 sm:$0xff] }
 0x116   : > { %14215 = vmatprep.subr.bf16.mxu0 %v15487_v5 }
 0x119   : > { %14217 = vmatpush3.bf16.msra.mxu0 %v14216_v20  ;;  %v2243_v20 = vsub.f32 %v2241_v31, %v2242_v22 }
 0x11a   : > { %14218 = vmatprep.subr.bf16.mxu0 %v15487_v5 }
 0x11d   : > { %14220 = vmatpush3.bf16.msra.mxu0 %v14219_v25  ;;  %v2237_v25 = vand.u32 4294901760, %v2236_v19 }
 0x11e   : > { %14221 = vmatprep.subr.bf16.mxu0 %v15487_v5 }
 0x121   : > { %14223 = vmatpush3.bf16.msra.mxu0 %v14222_v26  ;;  %v2244_v26 = vand.u32 4294901760, %v2243_v20 }
 0x122   : > { %14224 = vmatprep.subr.bf16.mxu0 %v15487_v5 }
 0x123   : > { %v16038_v28 = vpack.c.bf16 %v2244_v26, %v2237_v25 }
 0x125   : > { %14226 = vmatpush3.bf16.msra.mxu0 %v14225_v38  ;;  %v16042_v38 = vpack.c.bf16 %v2241_v31, %v2234_v30  ;;  %v16188_v30 = vld [vmem:[%s17284_s5] sm:$0x1] }
 0x126   : > { %14227 = vmatprep.subr.bf16.mxu0 %v15487_v5 }
 0x128   : > { %12654 = vmatmul.mubr.msk.f32.vlgmr.msra.gmra.mrb[0].mxu0 %vm470_vm1, %v15490_v4 }
 0x129   : > { %14229 = vmatpush3.bf16.msra.mxu0 %v15650_v17  ;;  %12688 = vmatprep.mubr.msk.f32.mxu0 %vm15488_vm0, %v15489_v54  ;;  %v1130_v17 = vld [vmem:[%s17281_s2] sm:$0xff] }
 0x12a   : > { %14230 = vmatprep.subr.bf16.mxu0 %v15487_v5  ;;  %v1146_v39 = vand.u32 4294901760, %v1130_v17 }
 0x12c   : > { %v15980_v43 = vsub.f32 %v1130_v17, %v1146_v39 }
 0x12d   : > { %14232 = vmatpush3.bf16.msra.mxu0 %v15669_v24  ;;  %v1131_v24 = vld [vmem:[%s17281_s2 + $0x8] sm:$0xff] }
 0x12e   : > { %14233 = vmatprep.subr.bf16.mxu0 %v15487_v5  ;;  %v1227_v56 = vand.u32 4294901760, %v15980_v43 }
 0x131   : > { %14235 = vmatpush3.bf16.msra.mxu0 %v15703_v41  ;;  %v1149_v41 = vand.u32 4294901760, %v1131_v24 }
 0x132   : > { %14236 = vmatprep.subr.bf16.mxu0 %v15487_v5 }
 0x133   : > { %v15978_v42 = vpack.c.bf16 %v1149_v41, %v1146_v39  ;;  %v15982_v46 = vsub.f32 %v1131_v24, %v1149_v41 }
 0x135   : > { %14238 = vmatpush3.bf16.msra.mxu0 %v15745_v59  ;;  %14253 = vmatpush3.bf16.msra.mxu1 %v15978_v42  ;;  %v1234_v57 = vand.u32 4294901760, %v15982_v46  ;;  %v15994_v59 = vpack.c.bf16 %v1155_v55, %v1152_v53  ;;  %v14264_v48 = vpack.c.bf16 %v15982_v46, %v15980_v43 }
 0x136   : > { %14239 = vmatprep.subr.bf16.mxu0 %v15487_v5  ;;  %14254 = vmatprep.subr.bf16.mxu1 %v15487_v5 }
 0x137   : > { %v1235_v8 = vsub.f32 %v15982_v46, %v1234_v57  ;;  %v16012_v0 = vpack.c.bf16 %v1234_v57, %v1227_v56  ;;  %v1631_v57 = vld [vmem:[%s17285_s6 + $0x8] sm:$0xff] }
 0x138   : > { %v1645_v63 = vand.u32 4294901760, %v1631_v57 }
 0x139   : > { %14241 = vmatpush3.bf16.msra.mxu0 %v15760_v3  ;;  %v1228_v3 = vsub.f32 %v15980_v43, %v1227_v56  ;;  %14256 = vmatpush3.bf16.msra.mxu1 %v15994_v59  ;;  %v16047_v43 = vpack.c.bf16 %v2228_v7, %v2221_v6  ;;  %v1630_v56 = vld [vmem:[%s17285_s6] sm:$0xff] }
 0x13a   : > { %14242 = vmatprep.subr.bf16.mxu0 %v15487_v5  ;;  %14257 = vmatprep.subr.bf16.mxu1 %v15487_v5  ;;  %v1642_v62 = vand.u32 4294901760, %v1630_v56 }
 0x13b   : > { %v1229_v9 = vand.u32 4294901760, %v1228_v3  ;;  %v1632_v3 = vld [vmem:[%s17285_s6 + $0x10] sm:$0xff] }
 0x13c   : > { %v1648_v16 = vand.u32 4294901760, %v1632_v3 }
 0x13d   : > { %14244 = vmatpush3.bf16.msra.mxu0 %v15776_v13  ;;  %v1236_v13 = vand.u32 4294901760, %v1235_v8  ;;  %v1633_v8 = vld [vmem:[%s17285_s6 + $0x18] sm:$0xff] }
 0x13e   : > { %14245 = vmatprep.subr.bf16.mxu0 %v15487_v5  ;;  %v1651_v21 = vand.u32 4294901760, %v1633_v8 }
 0x140   : > { %v1743_v32 = vsub.f32 %v1633_v8, %v1651_v21 }
 0x141   : > { %14247 = vmatpush3.bf16.msra.mxu0 %v15790_v29  ;;  %v14258_v29 = vpack.c.bf16 %v1236_v13, %v1229_v9  ;;  %v1722_v9 = vsub.f32 %v1630_v56, %v1642_v62  ;;  %v1729_v13 = vsub.f32 %v1631_v57, %v1645_v63 }
 0x142   : > { %14248 = vmatprep.subr.bf16.mxu0 %v15487_v5 }
 0x143   : > { %v14300_v60 = vpack.c.bf16 %v1729_v13, %v1722_v9 }
 0x145   : > { %14250 = vmatpush3.bf16.msra.mxu0 %v15802_v40  ;;  %v1250_v40 = vand.u32 4294901760, %v1249_v33  ;;  %v1723_v33 = vand.u32 4294901760, %v1722_v9 }
 0x146   : > { %14395 = vmatprep.subr.bf16.mxu0 %v15487_v5 }
 0x147   : > { %v14261_v47 = vpack.c.bf16 %v1250_v40, %v1243_v34  ;;  %v1730_v34 = vand.u32 4294901760, %v1729_v13  ;;  %v14288_v40 = vpack.c.bf16 %v1645_v63, %v1642_v62 }
 0x148   : > { %12689 = vmatmul.mubr.msk.f32.vlgmr.msra.gmra.mrb[0].mxu0 %vm470_vm1, %v15490_v4  ;;  %v2230_v4 = vand.u32 4294901760, %v2229_v27  ;;  %vm10506_vm1 = vcmask 516352  }
 0x149   : > { %12963 = vmatprep.mubr.msk.f32.mxu0 %vm15488_vm0, %v15489_v54  ;;  %14397 = vmatpush3.bf16.msra.mxu0 %v16022_v36  ;;  %v14312_v49 = vpack.c.bf16 %v1730_v34, %v1723_v33 }
 0x14a   : > { %14398 = vmatprep.subr.bf16.mxu0 %v15487_v5  ;;  %v16036_v18 = vpack.c.bf16 %v2230_v4, %v2223_v35 }
 0x14d   : > { %14400 = vmatpush3.bf16.msra.mxu0 %v16032_v11 }
 0x14e   : > { %14401 = vmatprep.subr.bf16.mxu0 %v15487_v5 }
 0x21b   : > { %v1126_v17 = vpop.f32.mrb[0].mxu0 }
 0x21c   : > { %v1143_v24 = vsel %vm1141_vm2, %v1126_v17, 0  ;;  %v12690_v39 = vpop.f32.mrb[1].mxu0 }
 0x21d   : > { %v16045_v41 = vand.u32 4294901760, %v1143_v24 }
 0x21f   : > { %v16050_v46 = vsub.f32 %v1143_v24, %v16045_v41 }
 0x221   : > { %v16053_v51 = vand.u32 4294901760, %v16050_v46 }
 0x223   : > { %v1217_v53 = vsub.f32 %v16050_v46, %v16053_v51 }
 0x225   : > { %v16059_v55 = vand.u32 4294901760, %v1217_v53 }
 0x227   : > { %12700 = vmatmul.mubr.f32.vlgmr.msra.gmra.mrb[0].mxu1 %v16059_v55 }
 0x228   : > { %14259 = vmatpush3.bf16.msra.mxu1 %v14258_v29  ;;  %12710 = vmatprep.mubr.msk.f32.mxu1 %vm15488_vm0, %v15489_v54  ;;  %v1736_v29 = vsub.f32 %v1632_v3, %v1648_v16 }
 0x229   : > { %14260 = vmatprep.subr.bf16.mxu1 %v15487_v5 }
 0x22a   : > { %v14303_v61 = vpack.c.bf16 %v1743_v32, %v1736_v29 }
 0x22c   : > { %14262 = vmatpush3.bf16.msra.mxu1 %v14261_v47  ;;  %v1724_v47 = vsub.f32 %v1722_v9, %v1723_v33 }
 0x22d   : > { %14263 = vmatprep.subr.bf16.mxu1 %v15487_v5 }
 0x22f   : > { %12711 = vmatmul.mubr.f32.vlgmr.msra.gmra.mrb[0].mxu1 %v16045_v41 }
 0x230   : > { %14265 = vmatpush3.bf16.msra.mxu1 %v14264_v48  ;;  %12721 = vmatprep.mubr.msk.f32.mxu1 %vm15488_vm0, %v15489_v54  ;;  %v1731_v48 = vsub.f32 %v1729_v13, %v1730_v34 }
 0x231   : > { %14266 = vmatprep.subr.bf16.mxu1 %v15487_v5 }
 0x232   : > { %v1732_v2 = vand.u32 4294901760, %v1731_v48 }
 0x234   : > { %14268 = vmatpush3.bf16.msra.mxu1 %v14267_v58  ;;  %v1737_v58 = vand.u32 4294901760, %v1736_v29 }
 0x235   : > { %14269 = vmatprep.subr.bf16.mxu1 %v15487_v5 }
 0x236   : > { %v1738_v14 = vsub.f32 %v1736_v29, %v1737_v58 }
 0x237   : > { %12722 = vmatmul.mubr.f32.vlgmr.msra.gmra.mrb[0].mxu1 %v16050_v46 }
 0x238   : > { %14271 = vmatpush3.bf16.msra.mxu1 %v15978_v42  ;;  %12732 = vmatprep.mubr.msk.f32.mxu1 %vm15488_vm0, %v15489_v54  ;;  %v1739_v23 = vand.u32 4294901760, %v1738_v14 }
 0x239   : > { %14272 = vmatprep.subr.bf16.mxu1 %v15487_v5 }
 0x23c   : > { %14274 = vmatpush3.bf16.msra.mxu1 %v15994_v59 }
 0x23d   : > { %14275 = vmatprep.subr.bf16.mxu1 %v15487_v5 }
 0x23f   : > { %12733 = vmatmul.mubr.f32.vlgmr.msra.gmra.mrb[0].mxu1 %v16053_v51 }
 0x240   : > { %14277 = vmatpush3.bf16.msra.mxu1 %v16012_v0  ;;  %12743 = vmatprep.mubr.msk.f32.mxu1 %vm15488_vm0, %v15489_v54  ;;  %v1744_v0 = vand.u32 4294901760, %v1743_v32 }
 0x241   : > { %14278 = vmatprep.subr.bf16.mxu1 %v15487_v5 }
 0x242   : > { %v1745_v15 = vsub.f32 %v1743_v32, %v1744_v0  ;;  %v14315_v50 = vpack.c.bf16 %v1744_v0, %v1737_v58 }
 0x244   : > { %14280 = vmatpush3.bf16.msra.mxu1 %v16014_v1  ;;  %v1725_v1 = vand.u32 4294901760, %v1724_v47  ;;  %v1746_v44 = vand.u32 4294901760, %v1745_v15 }
 0x245   : > { %14281 = vmatprep.subr.bf16.mxu1 %v15487_v5 }
 0x246   : > { %v14297_v45 = vpack.c.bf16 %v1746_v44, %v1739_v23 }
 0x247   : > { %12744 = vmatmul.mubr.f32.vlgmr.msra.gmra.mrb[0].mxu1 %v16045_v41 }
 0x248   : > { %14283 = vmatpush3.bf16.msra.mxu1 %v15978_v42  ;;  %12754 = vmatprep.mubr.msk.f32.mxu1 %vm15488_vm0, %v15489_v54  ;;  %v14291_v42 = vpack.c.bf16 %v1651_v21, %v1648_v16 }
 0x249   : > { %14284 = vmatprep.subr.bf16.mxu1 %v15487_v5 }
 0x24c   : > { %14286 = vmatpush3.bf16.msra.mxu1 %v15994_v59  ;;  %v14294_v59 = vpack.c.bf16 %v1732_v2, %v1725_v1 }
 0x24d   : > { %14287 = vmatprep.subr.bf16.mxu1 %v15487_v5 }
 0x24f   : > { %12755 = vmatmul.mubr.f32.vlgmr.msra.gmra.mrb[0].mxu1 %v16045_v41 }
 0x250   : > { %14289 = vmatpush3.bf16.msra.mxu1 %v14288_v40  ;;  %12765 = vmatprep.mubr.msk.f32.mxu1 %vm15488_vm0, %v15489_v54 }
 0x251   : > { %14290 = vmatprep.subr.bf16.mxu1 %v15487_v5 }
 0x254   : > { %14292 = vmatpush3.bf16.msra.mxu1 %v14291_v42 }
 0x255   : > { %14293 = vmatprep.subr.bf16.mxu1 %v15487_v5 }
 0x257   : > { %12766 = vmatmul.mubr.f32.vlgmr.msra.gmra.mrb[2].mxu1 %v16059_v55 }
 0x258   : > { %14295 = vmatpush3.bf16.msra.mxu1 %v14294_v59  ;;  %12776 = vmatprep.mubr.msk.f32.mxu1 %vm15488_vm0, %v15489_v54 }
 0x259   : > { %14296 = vmatprep.subr.bf16.mxu1 %v15487_v5 }
 0x25c   : > { %14298 = vmatpush3.bf16.msra.mxu1 %v14297_v45 }
 0x25d   : > { %14299 = vmatprep.subr.bf16.mxu1 %v15487_v5 }
 0x25f   : > { %12777 = vmatmul.mubr.f32.vlgmr.msra.gmra.mrb[2].mxu1 %v16045_v41 }
 0x260   : > { %14301 = vmatpush3.bf16.msra.mxu1 %v14300_v60  ;;  %12787 = vmatprep.mubr.msk.f32.mxu1 %vm15488_vm0, %v15489_v54 }
 0x261   : > { %14302 = vmatprep.subr.bf16.mxu1 %v15487_v5 }
 0x264   : > { %14304 = vmatpush3.bf16.msra.mxu1 %v14303_v61 }
 0x265   : > { %14305 = vmatprep.subr.bf16.mxu1 %v15487_v5 }
 0x267   : > { %12788 = vmatmul.mubr.f32.vlgmr.msra.gmra.mrb[2].mxu1 %v16050_v46 }
 0x268   : > { %14307 = vmatpush3.bf16.msra.mxu1 %v14288_v40  ;;  %12798 = vmatprep.mubr.msk.f32.mxu1 %vm15488_vm0, %v15489_v54 }
 0x269   : > { %14308 = vmatprep.subr.bf16.mxu1 %v15487_v5 }
 0x26c   : > { %14310 = vmatpush3.bf16.msra.mxu1 %v14291_v42 }
 0x26d   : > { %14311 = vmatprep.subr.bf16.mxu1 %v15487_v5 }
 0x26f   : > { %12799 = vmatmul.mubr.f32.vlgmr.msra.gmra.mrb[2].mxu1 %v16053_v51 }
 0x270   : > { %14313 = vmatpush3.bf16.msra.mxu1 %v14312_v49  ;;  %12809 = vmatprep.mubr.msk.f32.mxu1 %vm15488_vm0, %v15489_v54 }
 0x271   : > { %14314 = vmatprep.subr.bf16.mxu1 %v15487_v5 }
 0x274   : > { %14316 = vmatpush3.bf16.msra.mxu1 %v14315_v50 }
 0x275   : > { %14317 = vmatprep.subr.bf16.mxu1 %v15487_v5 }
 0x277   : > { %12810 = vmatmul.mubr.f32.vlgmr.msra.gmra.mrb[2].mxu1 %v16045_v41 }
 0x278   : > { %14319 = vmatpush3.bf16.msra.mxu1 %v14288_v40  ;;  %12820 = vmatprep.mubr.msk.f32.mxu1 %vm15488_vm0, %v15489_v54 }
 0x279   : > { %14320 = vmatprep.subr.bf16.mxu1 %v15487_v5 }
 0x27c   : > { %14322 = vmatpush3.bf16.msra.mxu1 %v14291_v42 }
 0x27d   : > { %14323 = vmatprep.subr.bf16.mxu1 %v15487_v5 }
 0x27f   : > { %12821 = vmatmul.mubr.f32.vlgmr.msra.gmra.mrb[2].mxu1 %v16045_v41 }
 0x280   : > { %14325 = vmatpush3.bf16.msra.mxu1 %v16022_v36  ;;  %12831 = vmatprep.mubr.msk.f32.mxu1 %vm15488_vm0, %v15489_v54 }
 0x281   : > { %14326 = vmatprep.subr.bf16.mxu1 %v15487_v5 }
 0x284   : > { %14328 = vmatpush3.bf16.msra.mxu1 %v16032_v11 }
 0x285   : > { %14329 = vmatprep.subr.bf16.mxu1 %v15487_v5 }
 0x287   : > { %12832 = vmatmul.mubr.f32.vlgmr.msra.gmra.mrb[4].mxu1 %v15489_v54 }
 0x288   : > { %14331 = vmatpush3.bf16.msra.mxu1 %v16036_v18  ;;  %12842 = vmatprep.mubr.msk.f32.mxu1 %vm15488_vm0, %v15489_v54 }
 0x289   : > { %14332 = vmatprep.subr.bf16.mxu1 %v15487_v5 }
 0x28c   : > { %14334 = vmatpush3.bf16.msra.mxu1 %v16038_v28 }
 0x28d   : > { %14335 = vmatprep.subr.bf16.mxu1 %v15487_v5 }
 0x28f   : > { %12843 = vmatmul.mubr.f32.vlgmr.msra.gmra.mrb[4].mxu1 %v15489_v54 }
 0x290   : > { %14337 = vmatpush3.bf16.msra.mxu1 %v16040_v37  ;;  %12853 = vmatprep.mubr.msk.f32.mxu1 %vm15488_vm0, %v15489_v54 }
 0x291   : > { %14338 = vmatprep.subr.bf16.mxu1 %v15487_v5 }
 0x294   : > { %14340 = vmatpush3.bf16.msra.mxu1 %v16042_v38 }
 0x295   : > { %14341 = vmatprep.subr.bf16.mxu1 %v15487_v5 }
 0x297   : > { %12854 = vmatmul.mubr.f32.vlgmr.msra.gmra.mrb[4].mxu1 %v15489_v54 }
 0x298   : > { %14343 = vmatpush3.bf16.msra.mxu1 %v16022_v36  ;;  %12864 = vmatprep.mubr.msk.f32.mxu1 %vm15488_vm0, %v15489_v54 }
 0x299   : > { %14344 = vmatprep.subr.bf16.mxu1 %v15487_v5 }
 0x29c   : > { %14346 = vmatpush3.bf16.msra.mxu1 %v16032_v11 }
 0x29d   : > { %14347 = vmatprep.subr.bf16.mxu1 %v15487_v5 }
 0x29f   : > { %12865 = vmatmul.mubr.f32.vlgmr.msra.gmra.mrb[4].mxu1 %v15489_v54 }
 0x2a0   : > { %14349 = vmatpush3.bf16.msra.mxu1 %v16047_v43  ;;  %12875 = vmatprep.mubr.msk.f32.mxu1 %vm15488_vm0, %v15489_v54 }
 0x2a1   : > { %14350 = vmatprep.subr.bf16.mxu1 %v15487_v5 }
 0x2a4   : > { %14352 = vmatpush3.bf16.msra.mxu1 %v16055_v52 }
 0x2a5   : > { %14353 = vmatprep.subr.bf16.mxu1 %v15487_v5 }
 0x2a7   : > { %12876 = vmatmul.mubr.f32.vlgmr.msra.gmra.mrb[4].mxu1 %v15489_v54 }
 0x2a8   : > { %14355 = vmatpush3.bf16.msra.mxu1 %v16022_v36  ;;  %12886 = vmatprep.mubr.msk.f32.mxu1 %vm15488_vm0, %v15489_v54 }
 0x2a9   : > { %14356 = vmatprep.subr.bf16.mxu1 %v15487_v5 }
 0x2ac   : > { %14358 = vmatpush3.bf16.msra.mxu1 %v16032_v11 }
 0x2ad   : > { %14359 = vmatprep.subr.bf16.mxu1 %v15487_v5 }
 0x2af   : > { %12887 = vmatmul.mubr.f32.vlgmr.msra.gmra.mrb[4].mxu1 %v15489_v54 }
 0x2b0   : > { %14361 = vmatpush3.bf16.msra.mxu1 %v16022_v36  ;;  %12897 = vmatprep.mubr.msk.f32.mxu1 %vm15488_vm0, %v15489_v54 }
 0x2b1   : > { %14362 = vmatprep.subr.bf16.mxu1 %v15487_v5 }
 0x2b4   : > { %14364 = vmatpush3.bf16.msra.mxu1 %v16032_v11 }
 0x2b5   : > { %14365 = vmatprep.subr.bf16.mxu1 %v15487_v5 }
 0x322   : > { %v1626_v6 = vpop.f32.mrb[0].mxu1 }
 0x323   : > { %v12756_v7 = vpop.f32.mrb[1].mxu1  ;;  %v16195_v22 = vadd.f32 %v11725_v10, %v1626_v6 }
 0x352   : > { %v16183_v12 = vpop.f32.mrb[2].mxu1 }
 0x353   : > { %v12822_v27 = vpop.f32.mrb[3].mxu1 }
 0x382   : > { %v2620_v31 = vpop.f32.mrb[4].mxu1 }
 0x383   : > { %v15045_v35 = vadd.f32 %v2620_v31, %v16188_v30  ;;  %v12888_v4 = vpop.f32.mrb[5].mxu1 }
 0x385   : > { %2632 = vrot.lane.b32.xlu0 %v15045_v35, %s15491_s19  ;;  %v2624_v19 = vadd.f32 %v15045_v35, %v16195_v22 }
 0x387   : > { %v2625_v20 = vsub.f32 0.0, %v2624_v19 }
 0x389   : > { %v2626_v25 = vmul.f32 1.442695, %v2625_v20 }
 0x38b   : > { %15320 = vpow2.f32 %v2626_v25 }
 0x395   : > { %v15321_v26 = vpop.eup %15320 }
 0x396   : > { %v2628_v17 = vadd.f32 1.0, %v15321_v26 }
 0x398   : > { %15322 = vrcp.f32 %v2628_v17 }
 0x3a2   : > { %v15323_v24 = vpop.eup %15322 }
 0x3a3   : > { %v2642_v55 = vsub.f32 1.0, %v15323_v24  ;;  %v2648_v57 = vmul.f32 0.0, %v15323_v24 }
 0x3f7   : > { %v2633_v39 = vpop.permute.xlu0 %2632 }
 0x3f8   : > { %v2635_v41 = vmul.f32 %v15323_v24, %v2633_v39 }
 0x3fa   : > { %2637 = vrot.lane.b32.xlu1 %v2635_v41, %s15491_s19 }
 0x46c   : > { %v2638_v46 = vpop.permute.xlu1 %2637 }
 0x46d   : > { %v2640_v51 = vadd.f32 %v16195_v22, %v2638_v46 }
 0x46f   : > { %15324 = vtanh.f32 %v2640_v51 }
 0x479   : > { %v15325_v53 = vpop.eup %15324 }
 0x47a   : > { %2644 = vrot.lane.b32.xlu1 %v15325_v53, %s15492_s26 }
 0x4ec   : > { %v2645_v56 = vpop.permute.xlu1 %2644 }
 0x4ed   : > { %v2647_v62 = vmul.f32 %v2645_v56, %v2642_v55 }
 0x4ef   : > { %v16201_v63 = vadd.f32 %v2648_v57, %v2647_v62 }
 0x4f1   : > { %2651 = vrot.lane.b32.xlu0 %v16201_v63, %s15492_s26  ;;  %v3169_v44 = vrot.slane %v16201_v63, 7 }
 0x563   : > { %v2652_v3 = vpop.permute.xlu0 %2651 }
 0x564   : > { %2655 = vst.msk [vmem:[#allocation2] sm:$0x1] %vm2654_vm3, %v2652_v3  ;;  %v2656_v8 = vsel %vm1141_vm2, %v2652_v3, 0  ;;  %vm7371_vm3 = vcmask 522502  }
 0x565   : > { %v2727_v9 = vand.u32 4294901760, %v2656_v8 }
 0x567   : > { %v2728_v13 = vsub.f32 %v2656_v8, %v2727_v9 }
 0x569   : > { %v2729_v16 = vand.u32 4294901760, %v2728_v13 }
 0x56b   : > { %v2730_v21 = vsub.f32 %v2728_v13, %v2729_v16 }
 0x56d   : > { %v2731_v29 = vand.u32 4294901760, %v2730_v21 }
 0x56f   : > { %12898 = vmatmul.mubr.f32.vlgmr.msra.gmra.mrb[6].mxu1 %v2731_v29 }
 0x570   : > { %14367 = vmatpush3.bf16.msra.mxu1 %v16036_v18  ;;  %12908 = vmatprep.mubr.msk.f32.mxu1 %vm15488_vm0, %v15489_v54 }
 0x571   : > { %14368 = vmatprep.subr.bf16.mxu1 %v15487_v5 }
 0x574   : > { %14370 = vmatpush3.bf16.msra.mxu1 %v16038_v28 }
 0x575   : > { %14371 = vmatprep.subr.bf16.mxu1 %v15487_v5 }
 0x577   : > { %12909 = vmatmul.mubr.f32.vlgmr.msra.gmra.mrb[6].mxu1 %v2727_v9 }
 0x578   : > { %14373 = vmatpush3.bf16.msra.mxu1 %v16040_v37  ;;  %12919 = vmatprep.mubr.msk.f32.mxu1 %vm15488_vm0, %v15489_v54 }
 0x579   : > { %14374 = vmatprep.subr.bf16.mxu1 %v15487_v5 }
 0x57c   : > { %14376 = vmatpush3.bf16.msra.mxu1 %v16042_v38 }
 0x57d   : > { %14377 = vmatprep.subr.bf16.mxu1 %v15487_v5 }
 0x57f   : > { %12920 = vmatmul.mubr.f32.vlgmr.msra.gmra.mrb[6].mxu1 %v2728_v13 }
 0x580   : > { %14379 = vmatpush3.bf16.msra.mxu1 %v16022_v36  ;;  %12930 = vmatprep.mubr.msk.f32.mxu1 %vm15488_vm0, %v15489_v54 }
 0x581   : > { %14380 = vmatprep.subr.bf16.mxu1 %v15487_v5 }
 0x584   : > { %14382 = vmatpush3.bf16.msra.mxu1 %v16032_v11 }
 0x585   : > { %14383 = vmatprep.subr.bf16.mxu1 %v15487_v5 }
 0x587   : > { %12931 = vmatmul.mubr.f32.vlgmr.msra.gmra.mrb[6].mxu1 %v2729_v16 }
 0x588   : > { %14385 = vmatpush3.bf16.msra.mxu1 %v16047_v43  ;;  %12941 = vmatprep.mubr.msk.f32.mxu1 %vm15488_vm0, %v15489_v54 }
 0x589   : > { %14386 = vmatprep.subr.bf16.mxu1 %v15487_v5 }
 0x58c   : > { %14388 = vmatpush3.bf16.msra.mxu1 %v16055_v52 }
 0x58d   : > { %14389 = vmatprep.subr.bf16.mxu1 %v15487_v5 }
 0x58f   : > { %12942 = vmatmul.mubr.f32.vlgmr.msra.gmra.mrb[6].mxu1 %v2727_v9 }
 0x590   : > { %14391 = vmatpush3.bf16.msra.mxu1 %v16022_v36  ;;  %12952 = vmatprep.mubr.msk.f32.mxu1 %vm15488_vm0, %v15489_v54 }
 0x591   : > { %14392 = vmatprep.subr.bf16.mxu1 %v15487_v5 }
 0x594   : > { %14394 = vmatpush3.bf16.msra.mxu1 %v16032_v11 }
 0x595   : > { %14431 = vmatprep.subr.bf16.mxu1 %v15487_v5 }
 0x597   : > { %12953 = vmatmul.mubr.f32.vlgmr.msra.gmra.mrb[6].mxu1 %v2727_v9 }
 0x598   : > { %14433 = vmatpush3.bf16.msra.mxu1 %v16022_v36  ;;  %13029 = vmatprep.mubr.msk.f32.mxu1 %vm15488_vm0, %v15489_v54 }
 0x599   : > { %14434 = vmatprep.subr.bf16.mxu1 %v15487_v5 }
 0x59c   : > { %14436 = vmatpush3.bf16.msra.mxu1 %v16032_v11 }
 0x59d   : > { %14437 = vmatprep.subr.bf16.mxu1 %v15487_v5 }
 0x66a   : > { %v3139_v32 = vpop.f32.mrb[6].mxu1 }
 0x66b   : > { %v15046_v33 = vadd.f32 %v3139_v32, %v16188_v30  ;;  %v12954_v34 = vpop.f32.mrb[7].mxu1 }
 0x66d   : > { %v3144_v40 = vrot.slane %v15046_v33, 7 }
 0x66f   : > { %3153 = vrot.lane.b32.xlu1 %v3144_v40, %s15491_s19  ;;  %v3146_v47 = vadd.f32 %v16195_v22, %v3144_v40 }
 0x671   : > { %v3147_v48 = vsub.f32 0.0, %v3146_v47 }
 0x673   : > { %v3148_v58 = vmul.f32 1.442695, %v3147_v48 }
 0x675   : > { %15326 = vpow2.f32 %v3148_v58 }
 0x67f   : > { %v15327_v0 = vpop.eup %15326 }
 0x680   : > { %v3150_v42 = vadd.f32 1.0, %v15327_v0 }
 0x682   : > { %15328 = vrcp.f32 %v3150_v42 }
 0x68c   : > { %v15329_v1 = vpop.eup %15328 }
 0x68d   : > { %v3163_v45 = vsub.f32 1.0, %v15329_v1  ;;  %v3171_v61 = vmul.f32 %v15329_v1, %v3169_v44 }
 0x6e1   : > { %v3154_v2 = vpop.permute.xlu1 %3153 }
 0x6e2   : > { %v3156_v14 = vmul.f32 %v15329_v1, %v3154_v2 }
 0x6e4   : > { %3158 = vrot.lane.b32.xlu0 %v3156_v14, %s15491_s19 }
 0x756   : > { %v3159_v15 = vpop.permute.xlu0 %3158 }
 0x757   : > { %v3161_v59 = vadd.f32 %v16195_v22, %v3159_v15 }
 0x759   : > { %15330 = vtanh.f32 %v3161_v59 }
 0x763   : > { %v15331_v23 = vpop.eup %15330 }
 0x764   : > { %3165 = vrot.lane.b32.xlu1 %v15331_v23, %s15492_s26 }
 0x7d6   : > { %v3166_v60 = vpop.permute.xlu1 %3165 }
 0x7d7   : > { %v3168_v49 = vmul.f32 %v3166_v60, %v3163_v45 }
 0x7d9   : > { %v16249_v50 = vadd.f32 %v3171_v61, %v3168_v49 }
 0x7db   : > { %v3179_v6 = vrot.slane %v16249_v50, 1  ;;  %v3695_v8 = vrot.slane %v16249_v50, 7 }
 0x7dd   : > { %3180 = vrot.lane.b32.xlu0 %v3179_v6, %s15492_s26 }
 0x84f   : > { %v3181_v7 = vpop.permute.xlu0 %3180 }
 0x850   : > { %v3182_v27 = vsel %vm1141_vm2, %v3181_v7, 0 }
 0x851   : > { %v3253_v31 = vand.u32 4294901760, %v3182_v27 }
 0x853   : > { %v3254_v35 = vsub.f32 %v3182_v27, %v3253_v31 }
 0x855   : > { %v3255_v4 = vand.u32 4294901760, %v3254_v35 }
 0x857   : > { %v3256_v10 = vsub.f32 %v3254_v35, %v3255_v4 }
 0x859   : > { %v3257_v19 = vand.u32 4294901760, %v3256_v10 }
 0x85b   : > { %12964 = vmatmul.mubr.f32.vlgmr.msra.gmra.mrb[2].mxu0 %v3257_v19 }
 0x85c   : > { %14403 = vmatpush3.bf16.msra.mxu0 %v16036_v18  ;;  %12974 = vmatprep.mubr.msk.f32.mxu0 %vm15488_vm0, %v15489_v54 }
 0x85d   : > { %14404 = vmatprep.subr.bf16.mxu0 %v15487_v5 }
 0x860   : > { %14406 = vmatpush3.bf16.msra.mxu0 %v16038_v28 }
 0x861   : > { %14407 = vmatprep.subr.bf16.mxu0 %v15487_v5 }
 0x863   : > { %12975 = vmatmul.mubr.f32.vlgmr.msra.gmra.mrb[2].mxu0 %v3253_v31 }
 0x864   : > { %14409 = vmatpush3.bf16.msra.mxu0 %v16040_v37  ;;  %12985 = vmatprep.mubr.msk.f32.mxu0 %vm15488_vm0, %v15489_v54 }
 0x865   : > { %14410 = vmatprep.subr.bf16.mxu0 %v15487_v5 }
 0x868   : > { %14412 = vmatpush3.bf16.msra.mxu0 %v16042_v38 }
 0x869   : > { %14413 = vmatprep.subr.bf16.mxu0 %v15487_v5 }
 0x86b   : > { %12986 = vmatmul.mubr.f32.vlgmr.msra.gmra.mrb[2].mxu0 %v3254_v35 }
 0x86c   : > { %14415 = vmatpush3.bf16.msra.mxu0 %v16022_v36  ;;  %12996 = vmatprep.mubr.msk.f32.mxu0 %vm15488_vm0, %v15489_v54 }
 0x86d   : > { %14416 = vmatprep.subr.bf16.mxu0 %v15487_v5 }
 0x870   : > { %14418 = vmatpush3.bf16.msra.mxu0 %v16032_v11 }
 0x871   : > { %14419 = vmatprep.subr.bf16.mxu0 %v15487_v5 }
 0x873   : > { %12997 = vmatmul.mubr.f32.vlgmr.msra.gmra.mrb[2].mxu0 %v3255_v4 }
 0x874   : > { %14421 = vmatpush3.bf16.msra.mxu0 %v16047_v43  ;;  %13007 = vmatprep.mubr.msk.f32.mxu0 %vm15488_vm0, %v15489_v54 }
 0x875   : > { %14422 = vmatprep.subr.bf16.mxu0 %v15487_v5 }
 0x878   : > { %14424 = vmatpush3.bf16.msra.mxu0 %v16055_v52 }
 0x879   : > { %14425 = vmatprep.subr.bf16.mxu0 %v15487_v5 }
 0x87b   : > { %13008 = vmatmul.mubr.f32.vlgmr.msra.gmra.mrb[2].mxu0 %v3253_v31 }
 0x87c   : > { %14427 = vmatpush3.bf16.msra.mxu0 %v16022_v36  ;;  %13018 = vmatprep.mubr.msk.f32.mxu0 %vm15488_vm0, %v15489_v54 }
 0x87d   : > { %14428 = vmatprep.subr.bf16.mxu0 %v15487_v5 }
 0x880   : > { %14430 = vmatpush3.bf16.msra.mxu0 %v16032_v11 }
 0x881   : > { %14467 = vmatprep.subr.bf16.mxu0 %v15487_v5 }
 0x883   : > { %13019 = vmatmul.mubr.f32.vlgmr.msra.gmra.mrb[2].mxu0 %v3253_v31 }
 0x884   : > { %14469 = vmatpush3.bf16.msra.mxu0 %v16022_v36  ;;  %13095 = vmatprep.mubr.msk.f32.mxu0 %vm15488_vm0, %v15489_v54 }
 0x885   : > { %14470 = vmatprep.subr.bf16.mxu0 %v15487_v5 }
 0x888   : > { %14472 = vmatpush3.bf16.msra.mxu0 %v16032_v11 }
 0x889   : > { %14473 = vmatprep.subr.bf16.mxu0 %v15487_v5 }
 0x956   : > { %v3665_v20 = vpop.f32.mrb[2].mxu0 }
 0x957   : > { %v15047_v25 = vadd.f32 %v3665_v20, %v16188_v30  ;;  %v13020_v26 = vpop.f32.mrb[3].mxu0 }
 0x959   : > { %v3670_v17 = vrot.slane %v15047_v25, 6 }
 0x95b   : > { %3679 = vrot.lane.b32.xlu1 %v3670_v17, %s15491_s19  ;;  %v3672_v24 = vadd.f32 %v16195_v22, %v3670_v17 }
 0x95d   : > { %v3673_v39 = vsub.f32 0.0, %v3672_v24 }
 0x95f   : > { %v3674_v41 = vmul.f32 1.442695, %v3673_v39 }
 0x961   : > { %15332 = vpow2.f32 %v3674_v41 }
 0x96b   : > { %v15333_v46 = vpop.eup %15332 }
 0x96c   : > { %v3676_v51 = vadd.f32 1.0, %v15333_v46 }
 0x96e   : > { %15334 = vrcp.f32 %v3676_v51 }
 0x978   : > { %v15335_v53 = vpop.eup %15334 }
 0x979   : > { %v3689_v3 = vsub.f32 1.0, %v15335_v53  ;;  %v3697_v13 = vmul.f32 %v15335_v53, %v3695_v8 }
 0x9cd   : > { %v3680_v55 = vpop.permute.xlu1 %3679 }
 0x9ce   : > { %v3682_v56 = vmul.f32 %v15335_v53, %v3680_v55 }
 0x9d0   : > { %3684 = vrot.lane.b32.xlu0 %v3682_v56, %s15491_s19 }
 0xa42   : > { %v3685_v57 = vpop.permute.xlu0 %3684 }
 0xa43   : > { %v3687_v62 = vadd.f32 %v16195_v22, %v3685_v57 }
 0xa45   : > { %15336 = vtanh.f32 %v3687_v62 }
 0xa4f   : > { %v15337_v63 = vpop.eup %15336 }
 0xa50   : > { %3691 = vrot.lane.b32.xlu1 %v15337_v63, %s15492_s26 }
 0xac2   : > { %v3692_v9 = vpop.permute.xlu1 %3691 }
 0xac3   : > { %v3694_v16 = vmul.f32 %v3692_v9, %v3689_v3 }
 0xac5   : > { %v16297_v21 = vadd.f32 %v3697_v13, %v3694_v16 }
 0xac7   : > { %v3705_v29 = vrot.slane %v16297_v21, 2  ;;  %v4221_v31 = vrot.slane %v16297_v21, 7 }
 0xac9   : > { %3706 = vrot.lane.b32.xlu0 %v3705_v29, %s15492_s26 }
 0xb3b   : > { %v3707_v32 = vpop.permute.xlu0 %3706 }
 0xb3c   : > { %v3708_v33 = vsel %vm1141_vm2, %v3707_v32, 0 }
 0xb3d   : > { %v3779_v34 = vand.u32 4294901760, %v3708_v33 }
 0xb3f   : > { %v3780_v40 = vsub.f32 %v3708_v33, %v3779_v34 }
 0xb41   : > { %v3781_v47 = vand.u32 4294901760, %v3780_v40 }
 0xb43   : > { %v3782_v48 = vsub.f32 %v3780_v40, %v3781_v47 }
 0xb45   : > { %v3783_v58 = vand.u32 4294901760, %v3782_v48 }
 0xb47   : > { %13030 = vmatmul.mubr.f32.vlgmr.msra.gmra.mrb[8].mxu1 %v3783_v58 }
 0xb48   : > { %14439 = vmatpush3.bf16.msra.mxu1 %v16036_v18  ;;  %13040 = vmatprep.mubr.msk.f32.mxu1 %vm15488_vm0, %v15489_v54 }
 0xb49   : > { %14440 = vmatprep.subr.bf16.mxu1 %v15487_v5 }
 0xb4c   : > { %14442 = vmatpush3.bf16.msra.mxu1 %v16038_v28 }
 0xb4d   : > { %14443 = vmatprep.subr.bf16.mxu1 %v15487_v5 }
 0xb4f   : > { %13041 = vmatmul.mubr.f32.vlgmr.msra.gmra.mrb[8].mxu1 %v3779_v34 }
 0xb50   : > { %14445 = vmatpush3.bf16.msra.mxu1 %v16040_v37  ;;  %13051 = vmatprep.mubr.msk.f32.mxu1 %vm15488_vm0, %v15489_v54 }
 0xb51   : > { %14446 = vmatprep.subr.bf16.mxu1 %v15487_v5 }
 0xb54   : > { %14448 = vmatpush3.bf16.msra.mxu1 %v16042_v38 }
 0xb55   : > { %14449 = vmatprep.subr.bf16.mxu1 %v15487_v5 }
 0xb57   : > { %13052 = vmatmul.mubr.f32.vlgmr.msra.gmra.mrb[8].mxu1 %v3780_v40 }
 0xb58   : > { %14451 = vmatpush3.bf16.msra.mxu1 %v16022_v36  ;;  %13062 = vmatprep.mubr.msk.f32.mxu1 %vm15488_vm0, %v15489_v54 }
 0xb59   : > { %14452 = vmatprep.subr.bf16.mxu1 %v15487_v5 }
 0xb5c   : > { %14454 = vmatpush3.bf16.msra.mxu1 %v16032_v11 }
 0xb5d   : > { %14455 = vmatprep.subr.bf16.mxu1 %v15487_v5 }
 0xb5f   : > { %13063 = vmatmul.mubr.f32.vlgmr.msra.gmra.mrb[8].mxu1 %v3781_v47 }
 0xb60   : > { %14457 = vmatpush3.bf16.msra.mxu1 %v16047_v43  ;;  %13073 = vmatprep.mubr.msk.f32.mxu1 %vm15488_vm0, %v15489_v54 }
 0xb61   : > { %14458 = vmatprep.subr.bf16.mxu1 %v15487_v5 }
 0xb64   : > { %14460 = vmatpush3.bf16.msra.mxu1 %v16055_v52 }
 0xb65   : > { %14461 = vmatprep.subr.bf16.mxu1 %v15487_v5 }
 0xb67   : > { %13074 = vmatmul.mubr.f32.vlgmr.msra.gmra.mrb[8].mxu1 %v3779_v34 }
 0xb68   : > { %14463 = vmatpush3.bf16.msra.mxu1 %v16022_v36  ;;  %13084 = vmatprep.mubr.msk.f32.mxu1 %vm15488_vm0, %v15489_v54 }
 0xb69   : > { %14464 = vmatprep.subr.bf16.mxu1 %v15487_v5 }
 0xb6c   : > { %14466 = vmatpush3.bf16.msra.mxu1 %v16032_v11 }
 0xb6d   : > { %14503 = vmatprep.subr.bf16.mxu1 %v15487_v5 }
 0xb6f   : > { %13085 = vmatmul.mubr.f32.vlgmr.msra.gmra.mrb[8].mxu1 %v3779_v34 }
 0xb70   : > { %14505 = vmatpush3.bf16.msra.mxu1 %v16022_v36  ;;  %13161 = vmatprep.mubr.msk.f32.mxu1 %vm15488_vm0, %v15489_v54 }
 0xb71   : > { %14506 = vmatprep.subr.bf16.mxu1 %v15487_v5 }
 0xb74   : > { %14508 = vmatpush3.bf16.msra.mxu1 %v16032_v11 }
 0xb75   : > { %14509 = vmatprep.subr.bf16.mxu1 %v15487_v5 }
 0xc42   : > { %v4191_v0 = vpop.f32.mrb[8].mxu1 }
 0xc43   : > { %v15048_v42 = vadd.f32 %v4191_v0, %v16188_v30  ;;  %v13086_v1 = vpop.f32.mrb[9].mxu1 }
 0xc45   : > { %v4196_v2 = vrot.slane %v15048_v42, 5 }
 0xc47   : > { %4205 = vrot.lane.b32.xlu1 %v4196_v2, %s15491_s19  ;;  %v4198_v14 = vadd.f32 %v16195_v22, %v4196_v2 }
 0xc49   : > { %v4199_v15 = vsub.f32 0.0, %v4198_v14 }
 0xc4b   : > { %v4200_v59 = vmul.f32 1.442695, %v4199_v15 }
 0xc4d   : > { %15338 = vpow2.f32 %v4200_v59 }
 0xc57   : > { %v15339_v23 = vpop.eup %15338 }
 0xc58   : > { %v4202_v44 = vadd.f32 1.0, %v15339_v23 }
 0xc5a   : > { %15340 = vrcp.f32 %v4202_v44 }
 0xc64   : > { %v15341_v45 = vpop.eup %15340 }
 0xc65   : > { %v4215_v27 = vsub.f32 1.0, %v15341_v45  ;;  %v4223_v4 = vmul.f32 %v15341_v45, %v4221_v31 }
 0xcb9   : > { %v4206_v60 = vpop.permute.xlu1 %4205 }
 0xcba   : > { %v4208_v61 = vmul.f32 %v15341_v45, %v4206_v60 }
 0xcbc   : > { %4210 = vrot.lane.b32.xlu0 %v4208_v61, %s15491_s19 }
 0xd2e   : > { %v4211_v49 = vpop.permute.xlu0 %4210 }
 0xd2f   : > { %v4213_v6 = vadd.f32 %v16195_v22, %v4211_v49 }
 0xd31   : > { %15342 = vtanh.f32 %v4213_v6 }
 0xd3b   : > { %v15343_v7 = vpop.eup %15342 }
 0xd3c   : > { %4217 = vrot.lane.b32.xlu1 %v15343_v7, %s15492_s26 }
 0xdae   : > { %v4218_v35 = vpop.permute.xlu1 %4217 }
 0xdaf   : > { %v4220_v10 = vmul.f32 %v4218_v35, %v4215_v27 }
 0xdb1   : > { %v16345_v19 = vadd.f32 %v4223_v4, %v4220_v10 }
 0xdb3   : > { %v4231_v20 = vrot.slane %v16345_v19, 3  ;;  %v4747_v40 = vrot.slane %v16345_v19, 7 }
 0xdb5   : > { %4232 = vrot.lane.b32.xlu0 %v4231_v20, %s15492_s26 }
 0xe27   : > { %v4233_v25 = vpop.permute.xlu0 %4232 }
 0xe28   : > { %v4234_v26 = vsel %vm1141_vm2, %v4233_v25, 0 }
 0xe29   : > { %v4305_v17 = vand.u32 4294901760, %v4234_v26 }
 0xe2b   : > { %v4306_v24 = vsub.f32 %v4234_v26, %v4305_v17 }
 0xe2d   : > { %v4307_v39 = vand.u32 4294901760, %v4306_v24 }
 0xe2f   : > { %v4308_v41 = vsub.f32 %v4306_v24, %v4307_v39 }
 0xe31   : > { %v4309_v46 = vand.u32 4294901760, %v4308_v41 }
 0xe33   : > { %13096 = vmatmul.mubr.f32.vlgmr.msra.gmra.mrb[4].mxu0 %v4309_v46 }
 0xe34   : > { %14475 = vmatpush3.bf16.msra.mxu0 %v16036_v18  ;;  %13106 = vmatprep.mubr.msk.f32.mxu0 %vm15488_vm0, %v15489_v54 }
 0xe35   : > { %14476 = vmatprep.subr.bf16.mxu0 %v15487_v5 }
 0xe38   : > { %14478 = vmatpush3.bf16.msra.mxu0 %v16038_v28 }
 0xe39   : > { %14479 = vmatprep.subr.bf16.mxu0 %v15487_v5 }
 0xe3b   : > { %13107 = vmatmul.mubr.f32.vlgmr.msra.gmra.mrb[4].mxu0 %v4305_v17 }
 0xe3c   : > { %14481 = vmatpush3.bf16.msra.mxu0 %v16040_v37  ;;  %13117 = vmatprep.mubr.msk.f32.mxu0 %vm15488_vm0, %v15489_v54 }
 0xe3d   : > { %14482 = vmatprep.subr.bf16.mxu0 %v15487_v5 }
 0xe40   : > { %14484 = vmatpush3.bf16.msra.mxu0 %v16042_v38 }
 0xe41   : > { %14485 = vmatprep.subr.bf16.mxu0 %v15487_v5 }
 0xe43   : > { %13118 = vmatmul.mubr.f32.vlgmr.msra.gmra.mrb[4].mxu0 %v4306_v24 }
 0xe44   : > { %14487 = vmatpush3.bf16.msra.mxu0 %v16022_v36  ;;  %13128 = vmatprep.mubr.msk.f32.mxu0 %vm15488_vm0, %v15489_v54 }
 0xe45   : > { %14488 = vmatprep.subr.bf16.mxu0 %v15487_v5 }
 0xe48   : > { %14490 = vmatpush3.bf16.msra.mxu0 %v16032_v11 }
 0xe49   : > { %14491 = vmatprep.subr.bf16.mxu0 %v15487_v5 }
 0xe4b   : > { %13129 = vmatmul.mubr.f32.vlgmr.msra.gmra.mrb[4].mxu0 %v4307_v39 }
 0xe4c   : > { %14493 = vmatpush3.bf16.msra.mxu0 %v16047_v43  ;;  %13139 = vmatprep.mubr.msk.f32.mxu0 %vm15488_vm0, %v15489_v54 }
 0xe4d   : > { %14494 = vmatprep.subr.bf16.mxu0 %v15487_v5 }
 0xe50   : > { %14496 = vmatpush3.bf16.msra.mxu0 %v16055_v52 }
 0xe51   : > { %14497 = vmatprep.subr.bf16.mxu0 %v15487_v5 }
 0xe53   : > { %13140 = vmatmul.mubr.f32.vlgmr.msra.gmra.mrb[4].mxu0 %v4305_v17 }
 0xe54   : > { %14499 = vmatpush3.bf16.msra.mxu0 %v16022_v36  ;;  %13150 = vmatprep.mubr.msk.f32.mxu0 %vm15488_vm0, %v15489_v54 }
 0xe55   : > { %14500 = vmatprep.subr.bf16.mxu0 %v15487_v5 }
 0xe58   : > { %14502 = vmatpush3.bf16.msra.mxu0 %v16032_v11 }
 0xe59   : > { %14539 = vmatprep.subr.bf16.mxu0 %v15487_v5 }
 0xe5b   : > { %13151 = vmatmul.mubr.f32.vlgmr.msra.gmra.mrb[4].mxu0 %v4305_v17 }
 0xe5c   : > { %14541 = vmatpush3.bf16.msra.mxu0 %v16022_v36  ;;  %13227 = vmatprep.mubr.msk.f32.mxu0 %vm15488_vm0, %v15489_v54 }
 0xe5d   : > { %14542 = vmatprep.subr.bf16.mxu0 %v15487_v5 }
 0xe60   : > { %14544 = vmatpush3.bf16.msra.mxu0 %v16032_v11 }
 0xe61   : > { %14545 = vmatprep.subr.bf16.mxu0 %v15487_v5 }
 0xf2e   : > { %v4717_v51 = vpop.f32.mrb[4].mxu0 }
 0xf2f   : > { %v15049_v53 = vadd.f32 %v4717_v51, %v16188_v30  ;;  %v13152_v55 = vpop.f32.mrb[5].mxu0 }
 0xf31   : > { %v4722_v56 = vrot.slane %v15049_v53, 4 }
 0xf33   : > { %4731 = vrot.lane.b32.xlu1 %v4722_v56, %s15491_s19  ;;  %v4724_v57 = vadd.f32 %v16195_v22, %v4722_v56 }
 0xf35   : > { %v4725_v62 = vsub.f32 0.0, %v4724_v57 }
 0xf37   : > { %v4726_v63 = vmul.f32 1.442695, %v4725_v62 }
 0xf39   : > { %15344 = vpow2.f32 %v4726_v63 }
 0xf43   : > { %v15345_v3 = vpop.eup %15344 }
 0xf44   : > { %v4728_v8 = vadd.f32 1.0, %v15345_v3 }
 0xf46   : > { %15346 = vrcp.f32 %v4728_v8 }
 0xf50   : > { %v15347_v9 = vpop.eup %15346 }
 0xf51   : > { %v4741_v34 = vsub.f32 1.0, %v15347_v9  ;;  %v4749_v48 = vmul.f32 %v15347_v9, %v4747_v40 }
 0xfa5   : > { %v4732_v13 = vpop.permute.xlu1 %4731 }
 0xfa6   : > { %v4734_v16 = vmul.f32 %v15347_v9, %v4732_v13  ;;  %v2131_v13 = vld [vmem:[%s17286_s7] sm:$0xff] }
 0xfa8   : > { %4736 = vrot.lane.b32.xlu0 %v4734_v16, %s15491_s19  ;;  %v2132_v16 = vld [vmem:[%s17286_s7 + $0x8] sm:$0xff] }
0x101a   : > { %v4737_v29 = vpop.permute.xlu0 %4736 }
0x101b   : > { %v4739_v32 = vadd.f32 %v16195_v22, %v4737_v29  ;;  %v6336_v29 = vand.u32 4294901760, %v2131_v13 }
0x101d   : > { %15348 = vtanh.f32 %v4739_v32  ;;  %v6339_v32 = vand.u32 4294901760, %v2132_v16 }
0x1027   : > { %v15349_v33 = vpop.eup %15348 }
0x1028   : > { %4743 = vrot.lane.b32.xlu1 %v15349_v33, %s15492_s26  ;;  %v2133_v33 = vld [vmem:[%s17286_s7 + $0x10] sm:$0xff] }
0x1029   : > { %v6342_v40 = vand.u32 4294901760, %v2133_v33 }
0x109a   : > { %v4744_v47 = vpop.permute.xlu1 %4743 }
0x109b   : > { %v4746_v58 = vmul.f32 %v4744_v47, %v4741_v34  ;;  %v2134_v34 = vld [vmem:[%s17286_s7 + $0x18] sm:$0xff] }
0x109c   : > { %v6345_v47 = vand.u32 4294901760, %v2134_v34 }
0x109d   : > { %v16393_v0 = vadd.f32 %v4749_v48, %v4746_v58  ;;  %v6416_v48 = vsub.f32 %v2131_v13, %v6336_v29  ;;  %v6423_v58 = vsub.f32 %v2132_v16, %v6339_v32 }
0x109f   : > { %v4757_v42 = vrot.slane %v16393_v0, 4  ;;  %v5273_v39 = vrot.slane %v16393_v0, 7 }
0x10a1   : > { %4758 = vrot.lane.b32.xlu0 %v4757_v42, %s15492_s26  ;;  %v6417_v42 = vand.u32 4294901760, %v6416_v48 }
0x1113   : > { %v4759_v1 = vpop.permute.xlu0 %4758 }
0x1114   : > { %v4760_v2 = vsel %vm1141_vm2, %v4759_v1, 0  ;;  %v6424_v1 = vand.u32 4294901760, %v6423_v58 }
0x1115   : > { %v4831_v14 = vand.u32 4294901760, %v4760_v2 }
0x1117   : > { %v4832_v15 = vsub.f32 %v4760_v2, %v4831_v14  ;;  %v6430_v2 = vsub.f32 %v2133_v33, %v6342_v40 }
0x1119   : > { %v4833_v59 = vand.u32 4294901760, %v4832_v15 }
0x111b   : > { %v4834_v23 = vsub.f32 %v4832_v15, %v4833_v59 }
0x111d   : > { %v4835_v44 = vand.u32 4294901760, %v4834_v23  ;;  %v6425_v23 = vsub.f32 %v6423_v58, %v6424_v1 }
0x111f   : > { %13162 = vmatmul.mubr.f32.vlgmr.msra.gmra.mrb[10].mxu1 %v4835_v44  ;;  %v6431_v44 = vand.u32 4294901760, %v6430_v2 }
0x1120   : > { %14511 = vmatpush3.bf16.msra.mxu1 %v16036_v18  ;;  %13172 = vmatprep.mubr.msk.f32.mxu1 %vm15488_vm0, %v15489_v54 }
0x1121   : > { %14512 = vmatprep.subr.bf16.mxu1 %v15487_v5 }
0x1124   : > { %14514 = vmatpush3.bf16.msra.mxu1 %v16038_v28 }
0x1125   : > { %14515 = vmatprep.subr.bf16.mxu1 %v15487_v5 }
0x1127   : > { %13173 = vmatmul.mubr.f32.vlgmr.msra.gmra.mrb[10].mxu1 %v4831_v14 }
0x1128   : > { %14517 = vmatpush3.bf16.msra.mxu1 %v16040_v37  ;;  %13183 = vmatprep.mubr.msk.f32.mxu1 %vm15488_vm0, %v15489_v54 }
0x1129   : > { %14518 = vmatprep.subr.bf16.mxu1 %v15487_v5 }
0x112c   : > { %14520 = vmatpush3.bf16.msra.mxu1 %v16042_v38 }
0x112d   : > { %14521 = vmatprep.subr.bf16.mxu1 %v15487_v5 }
0x112f   : > { %13184 = vmatmul.mubr.f32.vlgmr.msra.gmra.mrb[10].mxu1 %v4832_v15  ;;  %v16486_v15 = vpack.c.bf16 %v6339_v32, %v6336_v29  ;;  %v11726_v29 = vld [vmem:[%s17287_s8] ss:$0 sm:$0xff] }
0x1130   : > { %14523 = vmatpush3.bf16.msra.mxu1 %v16022_v36  ;;  %13194 = vmatprep.mubr.msk.f32.mxu1 %vm15488_vm0, %v15489_v54  ;;  %v16567_v32 = vadd.f32 %v11726_v29, %v16183_v12 }
0x1131   : > { %14524 = vmatprep.subr.bf16.mxu1 %v15487_v5 }
0x1134   : > { %14526 = vmatpush3.bf16.msra.mxu1 %v16032_v11 }
0x1135   : > { %14527 = vmatprep.subr.bf16.mxu1 %v15487_v5 }
0x1137   : > { %13195 = vmatmul.mubr.f32.vlgmr.msra.gmra.mrb[10].mxu1 %v4833_v59  ;;  %v6418_v59 = vsub.f32 %v6416_v48, %v6417_v42 }
0x1138   : > { %14529 = vmatpush3.bf16.msra.mxu1 %v16047_v43  ;;  %13205 = vmatprep.mubr.msk.f32.mxu1 %vm15488_vm0, %v15489_v54 }
0x1139   : > { %14530 = vmatprep.subr.bf16.mxu1 %v15487_v5 }
0x113c   : > { %14532 = vmatpush3.bf16.msra.mxu1 %v16055_v52 }
0x113d   : > { %14533 = vmatprep.subr.bf16.mxu1 %v15487_v5 }
0x113f   : > { %13206 = vmatmul.mubr.f32.vlgmr.msra.gmra.mrb[10].mxu1 %v4831_v14 }
0x1140   : > { %14535 = vmatpush3.bf16.msra.mxu1 %v16022_v36  ;;  %13216 = vmatprep.mubr.msk.f32.mxu1 %vm15488_vm0, %v15489_v54 }
0x1141   : > { %14536 = vmatprep.subr.bf16.mxu1 %v15487_v5 }
0x1144   : > { %14538 = vmatpush3.bf16.msra.mxu1 %v16032_v11 }
0x1145   : > { %14575 = vmatprep.subr.bf16.mxu1 %v15487_v5 }
0x1147   : > { %13217 = vmatmul.mubr.f32.vlgmr.msra.gmra.mrb[10].mxu1 %v4831_v14  ;;  %v6437_v14 = vsub.f32 %v2134_v34, %v6345_v47 }
0x1148   : > { %14577 = vmatpush3.bf16.msra.mxu1 %v16022_v36  ;;  %13293 = vmatprep.mubr.msk.f32.mxu1 %vm15488_vm0, %v15489_v54 }
0x1149   : > { %14578 = vmatprep.subr.bf16.mxu1 %v15487_v5 }
0x114c   : > { %14580 = vmatpush3.bf16.msra.mxu1 %v16032_v11 }
0x114d   : > { %14581 = vmatprep.subr.bf16.mxu1 %v15487_v5 }
0x121a   : > { %v5243_v45 = vpop.f32.mrb[10].mxu1 }
0x121b   : > { %v15050_v60 = vadd.f32 %v5243_v45, %v16188_v30  ;;  %v13218_v61 = vpop.f32.mrb[11].mxu1  ;;  %v6438_v45 = vand.u32 4294901760, %v6437_v14 }
0x121c   : > { %v6419_v61 = vand.u32 4294901760, %v6418_v59 }
0x121d   : > { %v5248_v49 = vrot.slane %v15050_v60, 3  ;;  %v16490_v60 = vpack.c.bf16 %v6345_v47, %v6342_v40 }
0x121f   : > { %5257 = vrot.lane.b32.xlu1 %v5248_v49, %s15491_s19  ;;  %v5250_v6 = vadd.f32 %v16195_v22, %v5248_v49  ;;  %v6426_v49 = vand.u32 4294901760, %v6425_v23 }
0x1221   : > { %v5251_v7 = vsub.f32 0.0, %v5250_v6  ;;  %v6432_v6 = vsub.f32 %v6430_v2, %v6431_v44 }
0x1223   : > { %v5252_v27 = vmul.f32 1.442695, %v5251_v7  ;;  %v6439_v7 = vsub.f32 %v6437_v14, %v6438_v45 }
0x1225   : > { %15350 = vpow2.f32 %v5252_v27  ;;  %v16497_v27 = vpack.c.bf16 %v6426_v49, %v6419_v61 }
0x122f   : > { %v15351_v31 = vpop.eup %15350 }
0x1230   : > { %v5254_v35 = vadd.f32 1.0, %v15351_v31  ;;  %v6433_v31 = vand.u32 4294901760, %v6432_v6 }
0x1232   : > { %15352 = vrcp.f32 %v5254_v35  ;;  %v6440_v35 = vand.u32 4294901760, %v6439_v7 }
0x123c   : > { %v15353_v4 = vpop.eup %15352 }
0x123d   : > { %v5267_v24 = vsub.f32 1.0, %v15353_v4  ;;  %v5275_v46 = vmul.f32 %v15353_v4, %v5273_v39 }
0x1291   : > { %v5258_v10 = vpop.permute.xlu1 %5257 }
0x1292   : > { %v5260_v20 = vmul.f32 %v15353_v4, %v5258_v10  ;;  %v16502_v4 = vpack.c.bf16 %v6440_v35, %v6433_v31  ;;  %v16508_v10 = vpack.c.bf16 %v6423_v58, %v6416_v48 }
0x1294   : > { %5262 = vrot.lane.b32.xlu0 %v5260_v20, %s15491_s19  ;;  %v16513_v20 = vpack.c.bf16 %v6437_v14, %v6430_v2 }
0x1306   : > { %v5263_v25 = vpop.permute.xlu0 %5262 }
0x1307   : > { %v5265_v26 = vadd.f32 %v16195_v22, %v5263_v25  ;;  %v16526_v25 = vpack.c.bf16 %v6424_v1, %v6417_v42 }
0x1309   : > { %15354 = vtanh.f32 %v5265_v26  ;;  %v16531_v26 = vpack.c.bf16 %v6438_v45, %v6431_v44 }
0x1313   : > { %v15355_v17 = vpop.eup %15354 }
0x1314   : > { %5269 = vrot.lane.b32.xlu1 %v15355_v17, %s15492_s26 }
0x1386   : > { %v5270_v41 = vpop.permute.xlu1 %5269 }
0x1387   : > { %v5272_v51 = vmul.f32 %v5270_v41, %v5267_v24 }
0x1389   : > { %v16441_v53 = vadd.f32 %v5275_v46, %v5272_v51  ;;  %v16557_v46 = vld [vmem:[%s17288_s9] sm:$0x1] }
0x138b   : > { %v5283_v55 = vrot.slane %v16441_v53, 5  ;;  %v5799_v61 = vrot.slane %v16441_v53, 7 }
0x138d   : > { %5284 = vrot.lane.b32.xlu0 %v5283_v55, %s15492_s26 }
0x13ff   : > { %v5285_v56 = vpop.permute.xlu0 %5284 }
0x1400   : > { %v5286_v57 = vsel %vm1141_vm2, %v5285_v56, 0 }
0x1401   : > { %v5357_v62 = vand.u32 4294901760, %v5286_v57 }
0x1403   : > { %v5358_v63 = vsub.f32 %v5286_v57, %v5357_v62 }
0x1405   : > { %v5359_v3 = vand.u32 4294901760, %v5358_v63 }
0x1407   : > { %v5360_v8 = vsub.f32 %v5358_v63, %v5359_v3 }
0x1409   : > { %v5361_v9 = vand.u32 4294901760, %v5360_v8 }
0x140b   : > { %13228 = vmatmul.mubr.f32.vlgmr.msra.gmra.mrb[6].mxu0 %v5361_v9 }
0x140c   : > { %14547 = vmatpush3.bf16.msra.mxu0 %v16036_v18  ;;  %13238 = vmatprep.mubr.msk.f32.mxu0 %vm15488_vm0, %v15489_v54 }
0x140d   : > { %14548 = vmatprep.subr.bf16.mxu0 %v15487_v5 }
0x1410   : > { %14550 = vmatpush3.bf16.msra.mxu0 %v16038_v28 }
0x1411   : > { %14551 = vmatprep.subr.bf16.mxu0 %v15487_v5 }
0x1413   : > { %13239 = vmatmul.mubr.f32.vlgmr.msra.gmra.mrb[6].mxu0 %v5357_v62 }
0x1414   : > { %14553 = vmatpush3.bf16.msra.mxu0 %v16040_v37  ;;  %13249 = vmatprep.mubr.msk.f32.mxu0 %vm15488_vm0, %v15489_v54 }
0x1415   : > { %14554 = vmatprep.subr.bf16.mxu0 %v15487_v5 }
0x1418   : > { %14556 = vmatpush3.bf16.msra.mxu0 %v16042_v38 }
0x1419   : > { %14557 = vmatprep.subr.bf16.mxu0 %v15487_v5 }
0x141b   : > { %13250 = vmatmul.mubr.f32.vlgmr.msra.gmra.mrb[6].mxu0 %v5358_v63 }
0x141c   : > { %14559 = vmatpush3.bf16.msra.mxu0 %v16022_v36  ;;  %13260 = vmatprep.mubr.msk.f32.mxu0 %vm15488_vm0, %v15489_v54 }
0x141d   : > { %14560 = vmatprep.subr.bf16.mxu0 %v15487_v5 }
0x1420   : > { %14562 = vmatpush3.bf16.msra.mxu0 %v16032_v11 }
0x1421   : > { %14563 = vmatprep.subr.bf16.mxu0 %v15487_v5 }
0x1423   : > { %13261 = vmatmul.mubr.f32.vlgmr.msra.gmra.mrb[6].mxu0 %v5359_v3 }
0x1424   : > { %14565 = vmatpush3.bf16.msra.mxu0 %v16047_v43  ;;  %13271 = vmatprep.mubr.msk.f32.mxu0 %vm15488_vm0, %v15489_v54 }
0x1425   : > { %14566 = vmatprep.subr.bf16.mxu0 %v15487_v5 }
0x1428   : > { %14568 = vmatpush3.bf16.msra.mxu0 %v16055_v52 }
0x1429   : > { %14569 = vmatprep.subr.bf16.mxu0 %v15487_v5 }
0x142b   : > { %13272 = vmatmul.mubr.f32.vlgmr.msra.gmra.mrb[6].mxu0 %v5357_v62 }
0x142c   : > { %14571 = vmatpush3.bf16.msra.mxu0 %v16022_v36  ;;  %13282 = vmatprep.mubr.msk.f32.mxu0 %vm15488_vm0, %v15489_v54 }
0x142d   : > { %14572 = vmatprep.subr.bf16.mxu0 %v15487_v5 }
0x1430   : > { %14574 = vmatpush3.bf16.msra.mxu0 %v16032_v11 }
0x1431   : > { %14611 = vmatprep.subr.bf16.mxu0 %v15487_v5 }
0x1433   : > { %13283 = vmatmul.mubr.f32.vlgmr.msra.gmra.mrb[6].mxu0 %v5357_v62 }
0x1434   : > { %14613 = vmatpush3.bf16.msra.mxu0 %v16486_v15  ;;  %13359 = vmatprep.mubr.msk.f32.mxu0 %vm15488_vm0, %v15489_v54 }
0x1435   : > { %14614 = vmatprep.subr.bf16.mxu0 %v15487_v5 }
0x1438   : > { %14616 = vmatpush3.bf16.msra.mxu0 %v16490_v60 }
0x1439   : > { %14617 = vmatprep.subr.bf16.mxu0 %v15487_v5 }
0x143b   : > { %13360 = vmatmul.mubr.f32.vlgmr.msra.gmra.mrb[8].mxu0 %v15489_v54 }
0x143c   : > { %14619 = vmatpush3.bf16.msra.mxu0 %v16497_v27  ;;  %13370 = vmatprep.mubr.msk.f32.mxu0 %vm15488_vm0, %v15489_v54 }
0x143d   : > { %14620 = vmatprep.subr.bf16.mxu0 %v15487_v5 }
0x1440   : > { %14622 = vmatpush3.bf16.msra.mxu0 %v16502_v4 }
0x1441   : > { %14623 = vmatprep.subr.bf16.mxu0 %v15487_v5 }
0x1443   : > { %13371 = vmatmul.mubr.f32.vlgmr.msra.gmra.mrb[8].mxu0 %v15489_v54 }
0x1444   : > { %14625 = vmatpush3.bf16.msra.mxu0 %v16508_v10  ;;  %13381 = vmatprep.mubr.msk.f32.mxu0 %vm15488_vm0, %v15489_v54 }
0x1445   : > { %14626 = vmatprep.subr.bf16.mxu0 %v15487_v5 }
0x1448   : > { %14628 = vmatpush3.bf16.msra.mxu0 %v16513_v20 }
0x1449   : > { %14629 = vmatprep.subr.bf16.mxu0 %v15487_v5 }
0x144b   : > { %13382 = vmatmul.mubr.f32.vlgmr.msra.gmra.mrb[8].mxu0 %v15489_v54 }
0x144c   : > { %14631 = vmatpush3.bf16.msra.mxu0 %v16486_v15  ;;  %13392 = vmatprep.mubr.msk.f32.mxu0 %vm15488_vm0, %v15489_v54 }
0x144d   : > { %14632 = vmatprep.subr.bf16.mxu0 %v15487_v5 }
0x1450   : > { %14634 = vmatpush3.bf16.msra.mxu0 %v16490_v60 }
0x1451   : > { %14635 = vmatprep.subr.bf16.mxu0 %v15487_v5 }
0x1453   : > { %13393 = vmatmul.mubr.f32.vlgmr.msra.gmra.mrb[8].mxu0 %v15489_v54 }
0x1454   : > { %14637 = vmatpush3.bf16.msra.mxu0 %v16526_v25  ;;  %13403 = vmatprep.mubr.msk.f32.mxu0 %vm15488_vm0, %v15489_v54 }
0x1455   : > { %14638 = vmatprep.subr.bf16.mxu0 %v15487_v5 }
0x1458   : > { %14640 = vmatpush3.bf16.msra.mxu0 %v16531_v26 }
0x1459   : > { %14641 = vmatprep.subr.bf16.mxu0 %v15487_v5 }
0x145b   : > { %13404 = vmatmul.mubr.f32.vlgmr.msra.gmra.mrb[8].mxu0 %v15489_v54 }
0x145c   : > { %14643 = vmatpush3.bf16.msra.mxu0 %v16486_v15  ;;  %13414 = vmatprep.mubr.msk.f32.mxu0 %vm15488_vm0, %v15489_v54 }
0x145d   : > { %14644 = vmatprep.subr.bf16.mxu0 %v15487_v5 }
0x1460   : > { %14646 = vmatpush3.bf16.msra.mxu0 %v16490_v60 }
0x1461   : > { %14683 = vmatprep.subr.bf16.mxu0 %v15487_v5 }
0x1463   : > { %13415 = vmatmul.mubr.f32.vlgmr.msra.gmra.mrb[8].mxu0 %v15489_v54 }
0x1464   : > { %14685 = vmatpush3.bf16.msra.mxu0 %v16486_v15  ;;  %13491 = vmatprep.mubr.msk.f32.mxu0 %vm15488_vm0, %v15489_v54 }
0x1465   : > { %14686 = vmatprep.subr.bf16.mxu0 %v15487_v5 }
0x1468   : > { %14688 = vmatpush3.bf16.msra.mxu0 %v16490_v60 }
0x1469   : > { %14689 = vmatprep.subr.bf16.mxu0 %v15487_v5 }
0x1506   : > { %v5769_v17 = vpop.f32.mrb[6].mxu0 }
0x1507   : > { %v15051_v24 = vadd.f32 %v5769_v17, %v16188_v30  ;;  %v13284_v39 = vpop.f32.mrb[7].mxu0 }
0x1509   : > { %v5774_v41 = vrot.slane %v15051_v24, 2 }
0x150b   : > { %5783 = vrot.lane.b32.xlu1 %v5774_v41, %s15491_s19  ;;  %v5776_v62 = vadd.f32 %v16195_v22, %v5774_v41 }
0x150d   : > { %v5777_v63 = vsub.f32 0.0, %v5776_v62 }
0x150f   : > { %v5778_v30 = vmul.f32 1.442695, %v5777_v63 }
0x1511   : > { %15356 = vpow2.f32 %v5778_v30 }
0x151b   : > { %v15357_v3 = vpop.eup %15356 }
0x151c   : > { %v5780_v8 = vadd.f32 1.0, %v15357_v3 }
0x151e   : > { %15358 = vrcp.f32 %v5780_v8 }
0x1528   : > { %v15359_v9 = vpop.eup %15358 }
0x1529   : > { %v5793_v45 = vsub.f32 1.0, %v15359_v9  ;;  %v5801_v6 = vmul.f32 %v15359_v9, %v5799_v61 }
0x1536   : > { %v6816_v51 = vpop.f32.mrb[8].mxu0 }
0x1537   : > { %v15053_v55 = vadd.f32 %v6816_v51, %v16557_v46  ;;  %v13416_v56 = vpop.f32.mrb[9].mxu0 }
0x1539   : > { %v6821_v57 = vrot.slane %v15053_v55, 1 }
0x153b   : > { %6830 = vrot.lane.b32.xlu0 %v6821_v57, %s15491_s19  ;;  %v6823_v33 = vadd.f32 %v16567_v32, %v6821_v57 }
0x153d   : > { %v6824_v34 = vsub.f32 0.0, %v6823_v33 }
0x153f   : > { %v6825_v40 = vmul.f32 1.442695, %v6824_v34 }
0x1541   : > { %15360 = vpow2.f32 %v6825_v40 }
0x154b   : > { %v15361_v47 = vpop.eup %15360 }
0x154c   : > { %v6827_v48 = vadd.f32 1.0, %v15361_v47 }
0x154e   : > { %15362 = vrcp.f32 %v6827_v48 }
0x1558   : > { %v15363_v58 = vpop.eup %15362 }
0x1559   : > { %v6840_v17 = vsub.f32 1.0, %v15363_v58  ;;  %v6846_v39 = vmul.f32 0.0, %v15363_v58 }
0x157d   : > { %v5784_v13 = vpop.permute.xlu1 %5783 }
0x157e   : > { %v5786_v16 = vmul.f32 %v15359_v9, %v5784_v13 }
0x1580   : > { %5788 = vrot.lane.b32.xlu1 %v5786_v16, %s15491_s19 }
0x15ad   : > { %v6831_v42 = vpop.permute.xlu0 %6830 }
0x15ae   : > { %v6833_v1 = vmul.f32 %v15363_v58, %v6831_v42 }
0x15b0   : > { %6835 = vrot.lane.b32.xlu0 %v6833_v1, %s15491_s19 }
0x15f2   : > { %v5789_v2 = vpop.permute.xlu1 %5788 }
0x15f3   : > { %v5791_v14 = vadd.f32 %v16195_v22, %v5789_v2 }
0x15f5   : > { %15364 = vtanh.f32 %v5791_v14 }
0x15ff   : > { %v15365_v59 = vpop.eup %15364 }
0x1600   : > { %5795 = vrot.lane.b32.xlu1 %v15365_v59, %s15492_s26 }
0x1622   : > { %v6836_v12 = vpop.permute.xlu0 %6835 }
0x1623   : > { %v6838_v23 = vadd.f32 %v16567_v32, %v6836_v12 }
0x1625   : > { %15366 = vtanh.f32 %v6838_v23 }
0x162f   : > { %v15367_v44 = vpop.eup %15366 }
0x1630   : > { %6842 = vrot.lane.b32.xlu0 %v15367_v44, %s15492_s26 }
0x1672   : > { %v5796_v49 = vpop.permute.xlu1 %5795 }
0x1673   : > { %v5798_v7 = vmul.f32 %v5796_v49, %v5793_v45 }
0x1675   : > { %v16576_v31 = vadd.f32 %v5801_v6, %v5798_v7 }
0x1677   : > { %v5809_v35 = vrot.slane %v16576_v31, 6 }
0x1679   : > { %5810 = vrot.lane.b32.xlu1 %v5809_v35, %s15492_s26 }
0x16a2   : > { %v6843_v24 = vpop.permute.xlu0 %6842 }
0x16a3   : > { %v6845_v41 = vmul.f32 %v6843_v24, %v6840_v17 }
0x16a5   : > { %v16580_v51 = vadd.f32 %v6846_v39, %v6845_v41 }
0x16a7   : > { %v6851_v55 = vrot.slane %v16580_v51, 7  ;;  %v7367_v44 = vrot.slane %v16580_v51, 1 }
0x16a9   : > { %6852 = vrot.lane.b32.xlu0 %v6851_v55, %s15492_s26 }
0x16eb   : > { %v5811_v56 = vpop.permute.xlu1 %5810 }
0x16ec   : > { %v5812_v57 = vsel %vm1141_vm2, %v5811_v56, 0 }
0x16ed   : > { %v5883_v62 = vand.u32 4294901760, %v5812_v57 }
0x16ef   : > { %v5884_v63 = vsub.f32 %v5812_v57, %v5883_v62 }
0x16f1   : > { %v5885_v30 = vand.u32 4294901760, %v5884_v63 }
0x16f3   : > { %v5886_v3 = vsub.f32 %v5884_v63, %v5885_v30 }
0x16f5   : > { %v5887_v8 = vand.u32 4294901760, %v5886_v3 }
0x16f7   : > { %13294 = vmatmul.mubr.f32.vlgmr.msra.gmra.mrb[12].mxu1 %v5887_v8 }
0x16f8   : > { %14583 = vmatpush3.bf16.msra.mxu1 %v16036_v18  ;;  %13304 = vmatprep.mubr.msk.f32.mxu1 %vm15488_vm0, %v15489_v54 }
0x16f9   : > { %14584 = vmatprep.subr.bf16.mxu1 %v15487_v5 }
0x16fc   : > { %14586 = vmatpush3.bf16.msra.mxu1 %v16038_v28 }
0x16fd   : > { %14587 = vmatprep.subr.bf16.mxu1 %v15487_v5 }
0x16ff   : > { %13305 = vmatmul.mubr.f32.vlgmr.msra.gmra.mrb[12].mxu1 %v5883_v62 }
0x1700   : > { %14589 = vmatpush3.bf16.msra.mxu1 %v16040_v37  ;;  %13315 = vmatprep.mubr.msk.f32.mxu1 %vm15488_vm0, %v15489_v54 }
0x1701   : > { %14590 = vmatprep.subr.bf16.mxu1 %v15487_v5 }
0x1704   : > { %14592 = vmatpush3.bf16.msra.mxu1 %v16042_v38 }
0x1705   : > { %14593 = vmatprep.subr.bf16.mxu1 %v15487_v5 }
0x1707   : > { %13316 = vmatmul.mubr.f32.vlgmr.msra.gmra.mrb[12].mxu1 %v5884_v63 }
0x1708   : > { %14595 = vmatpush3.bf16.msra.mxu1 %v16022_v36  ;;  %13326 = vmatprep.mubr.msk.f32.mxu1 %vm15488_vm0, %v15489_v54 }
0x1709   : > { %14596 = vmatprep.subr.bf16.mxu1 %v15487_v5 }
0x170c   : > { %14598 = vmatpush3.bf16.msra.mxu1 %v16032_v11 }
0x170d   : > { %14599 = vmatprep.subr.bf16.mxu1 %v15487_v5 }
0x170f   : > { %13327 = vmatmul.mubr.f32.vlgmr.msra.gmra.mrb[12].mxu1 %v5885_v30 }
0x1710   : > { %14601 = vmatpush3.bf16.msra.mxu1 %v16047_v43  ;;  %13337 = vmatprep.mubr.msk.f32.mxu1 %vm15488_vm0, %v15489_v54 }
0x1711   : > { %14602 = vmatprep.subr.bf16.mxu1 %v15487_v5 }
0x1714   : > { %14604 = vmatpush3.bf16.msra.mxu1 %v16055_v52 }
0x1715   : > { %14605 = vmatprep.subr.bf16.mxu1 %v15487_v5 }
0x1717   : > { %13338 = vmatmul.mubr.f32.vlgmr.msra.gmra.mrb[12].mxu1 %v5883_v62 }
0x1718   : > { %14607 = vmatpush3.bf16.msra.mxu1 %v16022_v36  ;;  %13348 = vmatprep.mubr.msk.f32.mxu1 %vm15488_vm0, %v15489_v54 }
0x1719   : > { %14608 = vmatprep.subr.bf16.mxu1 %v15487_v5 }
0x171b   : > { %v6853_v18 = vpop.permute.xlu0 %6852 }
0x171c   : > { %v6854_v28 = vsel %vm1141_vm2, %v6853_v18, 0  ;;  %14610 = vmatpush3.bf16.msra.mxu1 %v16032_v11 }
0x171d   : > { %v6925_v37 = vand.u32 4294901760, %v6854_v28  ;;  %14647 = vmatprep.subr.bf16.mxu1 %v15487_v5 }
0x171f   : > { %v6926_v38 = vsub.f32 %v6854_v28, %v6925_v37  ;;  %13349 = vmatmul.mubr.f32.vlgmr.msra.gmra.mrb[12].mxu1 %v5883_v62 }
0x1720   : > { %14649 = vmatpush3.bf16.msra.mxu1 %v16486_v15  ;;  %13425 = vmatprep.mubr.msk.f32.mxu1 %vm15488_vm0, %v15489_v54 }
0x1721   : > { %v6927_v36 = vand.u32 4294901760, %v6926_v38  ;;  %14650 = vmatprep.subr.bf16.mxu1 %v15487_v5 }
0x1723   : > { %v6928_v43 = vsub.f32 %v6926_v38, %v6927_v36 }
0x1724   : > { %14652 = vmatpush3.bf16.msra.mxu1 %v16490_v60 }
0x1725   : > { %v6929_v52 = vand.u32 4294901760, %v6928_v43  ;;  %14653 = vmatprep.subr.bf16.mxu1 %v15487_v5 }
0x1727   : > { %13426 = vmatmul.mubr.f32.vlgmr.msra.gmra.mrb[14].mxu1 %v6929_v52 }
0x1728   : > { %14655 = vmatpush3.bf16.msra.mxu1 %v16497_v27  ;;  %13436 = vmatprep.mubr.msk.f32.mxu1 %vm15488_vm0, %v15489_v54 }
0x1729   : > { %14656 = vmatprep.subr.bf16.mxu1 %v15487_v5 }
0x172c   : > { %14658 = vmatpush3.bf16.msra.mxu1 %v16502_v4 }
0x172d   : > { %14659 = vmatprep.subr.bf16.mxu1 %v15487_v5 }
0x172f   : > { %13437 = vmatmul.mubr.f32.vlgmr.msra.gmra.mrb[14].mxu1 %v6925_v37 }
0x1730   : > { %14661 = vmatpush3.bf16.msra.mxu1 %v16508_v10  ;;  %13447 = vmatprep.mubr.msk.f32.mxu1 %vm15488_vm0, %v15489_v54 }
0x1731   : > { %14662 = vmatprep.subr.bf16.mxu1 %v15487_v5 }
0x1734   : > { %14664 = vmatpush3.bf16.msra.mxu1 %v16513_v20 }
0x1735   : > { %14665 = vmatprep.subr.bf16.mxu1 %v15487_v5 }
0x1737   : > { %13448 = vmatmul.mubr.f32.vlgmr.msra.gmra.mrb[14].mxu1 %v6926_v38 }
0x1738   : > { %14667 = vmatpush3.bf16.msra.mxu1 %v16486_v15  ;;  %13458 = vmatprep.mubr.msk.f32.mxu1 %vm15488_vm0, %v15489_v54 }
0x1739   : > { %14668 = vmatprep.subr.bf16.mxu1 %v15487_v5 }
0x173c   : > { %14670 = vmatpush3.bf16.msra.mxu1 %v16490_v60 }
0x173d   : > { %14671 = vmatprep.subr.bf16.mxu1 %v15487_v5 }
0x173f   : > { %13459 = vmatmul.mubr.f32.vlgmr.msra.gmra.mrb[14].mxu1 %v6927_v36 }
0x1740   : > { %14673 = vmatpush3.bf16.msra.mxu1 %v16526_v25  ;;  %13469 = vmatprep.mubr.msk.f32.mxu1 %vm15488_vm0, %v15489_v54 }
0x1741   : > { %14674 = vmatprep.subr.bf16.mxu1 %v15487_v5 }
0x1744   : > { %14676 = vmatpush3.bf16.msra.mxu1 %v16531_v26 }
0x1745   : > { %14677 = vmatprep.subr.bf16.mxu1 %v15487_v5 }
0x1747   : > { %13470 = vmatmul.mubr.f32.vlgmr.msra.gmra.mrb[14].mxu1 %v6925_v37 }
0x1748   : > { %14679 = vmatpush3.bf16.msra.mxu1 %v16486_v15  ;;  %13480 = vmatprep.mubr.msk.f32.mxu1 %vm15488_vm0, %v15489_v54 }
0x1749   : > { %14680 = vmatprep.subr.bf16.mxu1 %v15487_v5 }
0x174c   : > { %14682 = vmatpush3.bf16.msra.mxu1 %v16490_v60 }
0x174d   : > { %14719 = vmatprep.subr.bf16.mxu1 %v15487_v5 }
0x174f   : > { %13481 = vmatmul.mubr.f32.vlgmr.msra.gmra.mrb[14].mxu1 %v6925_v37 }
0x1750   : > { %14721 = vmatpush3.bf16.msra.mxu1 %v16486_v15  ;;  %13557 = vmatprep.mubr.msk.f32.mxu1 %vm15488_vm0, %v15489_v54 }
0x1751   : > { %14722 = vmatprep.subr.bf16.mxu1 %v15487_v5 }
0x1754   : > { %14724 = vmatpush3.bf16.msra.mxu1 %v16490_v60 }
0x1755   : > { %14725 = vmatprep.subr.bf16.mxu1 %v15487_v5 }
0x17f2   : > { %v16658_v11 = vpop.f32.mrb[12].mxu1 }
0x17f3   : > { %v13350_v9 = vpop.f32.mrb[13].mxu1 }
0x1822   : > { %v7337_v13 = vpop.f32.mrb[14].mxu1 }
0x1823   : > { %v15054_v16 = vadd.f32 %v7337_v13, %v16557_v46  ;;  %v13482_v29 = vpop.f32.mrb[15].mxu1 }
0x1825   : > { %v7342_v33 = vrot.slane %v15054_v16, 2 }
0x1827   : > { %7351 = vrot.lane.b32.xlu1 %v7342_v33, %s15491_s19  ;;  %v7344_v34 = vadd.f32 %v16567_v32, %v7342_v33 }
0x1829   : > { %v7345_v40 = vsub.f32 0.0, %v7344_v34 }
0x182b   : > { %v7346_v47 = vmul.f32 1.442695, %v7345_v40 }
0x182d   : > { %15368 = vpow2.f32 %v7346_v47 }
0x1837   : > { %v15369_v48 = vpop.eup %15368 }
0x1838   : > { %v7348_v58 = vadd.f32 1.0, %v15369_v48 }
0x183a   : > { %15370 = vrcp.f32 %v7348_v58 }
0x1844   : > { %v15371_v42 = vpop.eup %15370 }
0x1845   : > { %v7361_v23 = vsub.f32 1.0, %v15371_v42  ;;  %v7369_v61 = vmul.f32 %v15371_v42, %v7367_v44 }
0x1899   : > { %v7352_v1 = vpop.permute.xlu1 %7351 }
0x189a   : > { %v7354_v2 = vmul.f32 %v15371_v42, %v7352_v1 }
0x189c   : > { %7356 = vrot.lane.b32.xlu0 %v7354_v2, %s15491_s19 }
0x190e   : > { %v7357_v14 = vpop.permute.xlu0 %7356 }
0x190f   : > { %v7359_v59 = vadd.f32 %v16567_v32, %v7357_v14 }
0x1911   : > { %15372 = vtanh.f32 %v7359_v59 }
0x191b   : > { %v15373_v12 = vpop.eup %15372 }
0x191c   : > { %7363 = vrot.lane.b32.xlu1 %v15373_v12, %s15492_s26 }
0x198e   : > { %v7364_v45 = vpop.permute.xlu1 %7363 }
0x198f   : > { %v7366_v49 = vmul.f32 %v7364_v45, %v7361_v23 }
0x1991   : > { %v16667_v6 = vadd.f32 %v7369_v61, %v7366_v49 }
0x1993   : > { %v7374_v7 = vrot.slane %v16667_v6, 6  ;;  %v7890_v29 = vrot.slane %v16667_v6, 1 }
0x1995   : > { %7375 = vrot.lane.b32.xlu0 %v7374_v7, %s15492_s26 }
0x1a07   : > { %v7376_v35 = vpop.permute.xlu0 %7375 }
0x1a08   : > { %v7377_v17 = vsel %vm1141_vm2, %v7376_v35, 0 }
0x1a09   : > { %v7448_v24 = vand.u32 4294901760, %v7377_v17 }
0x1a0b   : > { %v7449_v39 = vsub.f32 %v7377_v17, %v7448_v24 }
0x1a0d   : > { %v7450_v41 = vand.u32 4294901760, %v7449_v39 }
0x1a0f   : > { %v7451_v55 = vsub.f32 %v7449_v39, %v7450_v41 }
0x1a11   : > { %v7452_v56 = vand.u32 4294901760, %v7451_v55 }
0x1a13   : > { %13492 = vmatmul.mubr.f32.vlgmr.msra.gmra.mrb[10].mxu0 %v7452_v56 }
0x1a14   : > { %14691 = vmatpush3.bf16.msra.mxu0 %v16497_v27  ;;  %13502 = vmatprep.mubr.msk.f32.mxu0 %vm15488_vm0, %v15489_v54 }
0x1a15   : > { %14692 = vmatprep.subr.bf16.mxu0 %v15487_v5 }
0x1a18   : > { %14694 = vmatpush3.bf16.msra.mxu0 %v16502_v4 }
0x1a19   : > { %14695 = vmatprep.subr.bf16.mxu0 %v15487_v5 }
0x1a1b   : > { %13503 = vmatmul.mubr.f32.vlgmr.msra.gmra.mrb[10].mxu0 %v7448_v24 }
0x1a1c   : > { %14697 = vmatpush3.bf16.msra.mxu0 %v16508_v10  ;;  %13513 = vmatprep.mubr.msk.f32.mxu0 %vm15488_vm0, %v15489_v54 }
0x1a1d   : > { %14698 = vmatprep.subr.bf16.mxu0 %v15487_v5 }
0x1a20   : > { %14700 = vmatpush3.bf16.msra.mxu0 %v16513_v20 }
0x1a21   : > { %14701 = vmatprep.subr.bf16.mxu0 %v15487_v5 }
0x1a23   : > { %13514 = vmatmul.mubr.f32.vlgmr.msra.gmra.mrb[10].mxu0 %v7449_v39 }
0x1a24   : > { %14703 = vmatpush3.bf16.msra.mxu0 %v16486_v15  ;;  %13524 = vmatprep.mubr.msk.f32.mxu0 %vm15488_vm0, %v15489_v54 }
0x1a25   : > { %14704 = vmatprep.subr.bf16.mxu0 %v15487_v5 }
0x1a28   : > { %14706 = vmatpush3.bf16.msra.mxu0 %v16490_v60 }
0x1a29   : > { %14707 = vmatprep.subr.bf16.mxu0 %v15487_v5 }
0x1a2b   : > { %13525 = vmatmul.mubr.f32.vlgmr.msra.gmra.mrb[10].mxu0 %v7450_v41 }
0x1a2c   : > { %14709 = vmatpush3.bf16.msra.mxu0 %v16526_v25  ;;  %13535 = vmatprep.mubr.msk.f32.mxu0 %vm15488_vm0, %v15489_v54 }
0x1a2d   : > { %14710 = vmatprep.subr.bf16.mxu0 %v15487_v5 }
0x1a30   : > { %14712 = vmatpush3.bf16.msra.mxu0 %v16531_v26 }
0x1a31   : > { %14713 = vmatprep.subr.bf16.mxu0 %v15487_v5 }
0x1a33   : > { %13536 = vmatmul.mubr.f32.vlgmr.msra.gmra.mrb[10].mxu0 %v7448_v24 }
0x1a34   : > { %14715 = vmatpush3.bf16.msra.mxu0 %v16486_v15  ;;  %13546 = vmatprep.mubr.msk.f32.mxu0 %vm15488_vm0, %v15489_v54 }
0x1a35   : > { %14716 = vmatprep.subr.bf16.mxu0 %v15487_v5 }
0x1a38   : > { %14718 = vmatpush3.bf16.msra.mxu0 %v16490_v60 }
0x1a39   : > { %14755 = vmatprep.subr.bf16.mxu0 %v15487_v5 }
0x1a3b   : > { %13547 = vmatmul.mubr.f32.vlgmr.msra.gmra.mrb[10].mxu0 %v7448_v24 }
0x1a3c   : > { %14757 = vmatpush3.bf16.msra.mxu0 %v16486_v15  ;;  %13623 = vmatprep.mubr.msk.f32.mxu0 %vm15488_vm0, %v15489_v54 }
0x1a3d   : > { %14758 = vmatprep.subr.bf16.mxu0 %v15487_v5 }
0x1a40   : > { %14760 = vmatpush3.bf16.msra.mxu0 %v16490_v60 }
0x1a41   : > { %14761 = vmatprep.subr.bf16.mxu0 %v15487_v5 }
0x1b0e   : > { %v7860_v57 = vpop.f32.mrb[10].mxu0 }
0x1b0f   : > { %v15055_v62 = vadd.f32 %v7860_v57, %v16557_v46  ;;  %v13548_v63 = vpop.f32.mrb[11].mxu0 }
0x1b11   : > { %v7865_v30 = vrot.slane %v15055_v62, 3 }
0x1b13   : > { %7874 = vrot.lane.b32.xlu1 %v7865_v30, %s15491_s19  ;;  %v7867_v3 = vadd.f32 %v16567_v32, %v7865_v30 }
0x1b15   : > { %v7868_v8 = vsub.f32 0.0, %v7867_v3 }
0x1b17   : > { %v7869_v18 = vmul.f32 1.442695, %v7868_v8 }
0x1b19   : > { %15374 = vpow2.f32 %v7869_v18 }
0x1b23   : > { %v15375_v28 = vpop.eup %15374 }
0x1b24   : > { %v7871_v37 = vadd.f32 1.0, %v15375_v28 }
0x1b26   : > { %15376 = vrcp.f32 %v7871_v37 }
0x1b30   : > { %v15377_v38 = vpop.eup %15376 }
0x1b31   : > { %v7884_v16 = vsub.f32 1.0, %v15377_v38  ;;  %v7892_v34 = vmul.f32 %v15377_v38, %v7890_v29 }
0x1b85   : > { %v7875_v36 = vpop.permute.xlu1 %7874 }
0x1b86   : > { %v7877_v43 = vmul.f32 %v15377_v38, %v7875_v36 }
0x1b88   : > { %7879 = vrot.lane.b32.xlu0 %v7877_v43, %s15491_s19 }
0x1bfa   : > { %v7880_v52 = vpop.permute.xlu0 %7879 }
0x1bfb   : > { %v7882_v9 = vadd.f32 %v16567_v32, %v7880_v52 }
0x1bfd   : > { %15378 = vtanh.f32 %v7882_v9 }
0x1c07   : > { %v15379_v13 = vpop.eup %15378 }
0x1c08   : > { %7886 = vrot.lane.b32.xlu1 %v15379_v13, %s15492_s26 }
0x1c7a   : > { %v7887_v33 = vpop.permute.xlu1 %7886 }
0x1c7b   : > { %v7889_v40 = vmul.f32 %v7887_v33, %v7884_v16 }
0x1c7d   : > { %v16715_v47 = vadd.f32 %v7892_v34, %v7889_v40 }
0x1c7f   : > { %v7897_v48 = vrot.slane %v16715_v47, 5  ;;  %v8413_v30 = vrot.slane %v16715_v47, 1 }
0x1c81   : > { %7898 = vrot.lane.b32.xlu0 %v7897_v48, %s15492_s26 }
0x1cf3   : > { %v7899_v58 = vpop.permute.xlu0 %7898 }
0x1cf4   : > { %v7900_v42 = vsel %vm1141_vm2, %v7899_v58, 0 }
0x1cf5   : > { %v7971_v1 = vand.u32 4294901760, %v7900_v42 }
0x1cf7   : > { %v7972_v2 = vsub.f32 %v7900_v42, %v7971_v1 }
0x1cf9   : > { %v7973_v14 = vand.u32 4294901760, %v7972_v2 }
0x1cfb   : > { %v7974_v59 = vsub.f32 %v7972_v2, %v7973_v14 }
0x1cfd   : > { %v7975_v12 = vand.u32 4294901760, %v7974_v59 }
0x1cff   : > { %13558 = vmatmul.mubr.f32.vlgmr.msra.gmra.mrb[16].mxu1 %v7975_v12 }
0x1d00   : > { %14727 = vmatpush3.bf16.msra.mxu1 %v16497_v27  ;;  %13568 = vmatprep.mubr.msk.f32.mxu1 %vm15488_vm0, %v15489_v54 }
0x1d01   : > { %14728 = vmatprep.subr.bf16.mxu1 %v15487_v5 }
0x1d04   : > { %14730 = vmatpush3.bf16.msra.mxu1 %v16502_v4 }
0x1d05   : > { %14731 = vmatprep.subr.bf16.mxu1 %v15487_v5 }
0x1d07   : > { %13569 = vmatmul.mubr.f32.vlgmr.msra.gmra.mrb[16].mxu1 %v7971_v1 }
0x1d08   : > { %14733 = vmatpush3.bf16.msra.mxu1 %v16508_v10  ;;  %13579 = vmatprep.mubr.msk.f32.mxu1 %vm15488_vm0, %v15489_v54 }
0x1d09   : > { %14734 = vmatprep.subr.bf16.mxu1 %v15487_v5 }
0x1d0c   : > { %14736 = vmatpush3.bf16.msra.mxu1 %v16513_v20 }
0x1d0d   : > { %14737 = vmatprep.subr.bf16.mxu1 %v15487_v5 }
0x1d0f   : > { %13580 = vmatmul.mubr.f32.vlgmr.msra.gmra.mrb[16].mxu1 %v7972_v2 }
0x1d10   : > { %14739 = vmatpush3.bf16.msra.mxu1 %v16486_v15  ;;  %13590 = vmatprep.mubr.msk.f32.mxu1 %vm15488_vm0, %v15489_v54 }
0x1d11   : > { %14740 = vmatprep.subr.bf16.mxu1 %v15487_v5 }
0x1d14   : > { %14742 = vmatpush3.bf16.msra.mxu1 %v16490_v60 }
0x1d15   : > { %14743 = vmatprep.subr.bf16.mxu1 %v15487_v5 }
0x1d17   : > { %13591 = vmatmul.mubr.f32.vlgmr.msra.gmra.mrb[16].mxu1 %v7973_v14 }
0x1d18   : > { %14745 = vmatpush3.bf16.msra.mxu1 %v16526_v25  ;;  %13601 = vmatprep.mubr.msk.f32.mxu1 %vm15488_vm0, %v15489_v54 }
0x1d19   : > { %14746 = vmatprep.subr.bf16.mxu1 %v15487_v5 }
0x1d1c   : > { %14748 = vmatpush3.bf16.msra.mxu1 %v16531_v26 }
0x1d1d   : > { %14749 = vmatprep.subr.bf16.mxu1 %v15487_v5 }
0x1d1f   : > { %13602 = vmatmul.mubr.f32.vlgmr.msra.gmra.mrb[16].mxu1 %v7971_v1 }
0x1d20   : > { %14751 = vmatpush3.bf16.msra.mxu1 %v16486_v15  ;;  %13612 = vmatprep.mubr.msk.f32.mxu1 %vm15488_vm0, %v15489_v54 }
0x1d21   : > { %14752 = vmatprep.subr.bf16.mxu1 %v15487_v5 }
0x1d24   : > { %14754 = vmatpush3.bf16.msra.mxu1 %v16490_v60 }
0x1d25   : > { %14791 = vmatprep.subr.bf16.mxu1 %v15487_v5 }
0x1d27   : > { %13613 = vmatmul.mubr.f32.vlgmr.msra.gmra.mrb[16].mxu1 %v7971_v1 }
0x1d28   : > { %14793 = vmatpush3.bf16.msra.mxu1 %v16486_v15  ;;  %13689 = vmatprep.mubr.msk.f32.mxu1 %vm15488_vm0, %v15489_v54 }
0x1d29   : > { %14794 = vmatprep.subr.bf16.mxu1 %v15487_v5 }
0x1d2c   : > { %14796 = vmatpush3.bf16.msra.mxu1 %v16490_v60 }
0x1d2d   : > { %14797 = vmatprep.subr.bf16.mxu1 %v15487_v5 }
0x1dfa   : > { %v8383_v23 = vpop.f32.mrb[16].mxu1 }
0x1dfb   : > { %v15056_v44 = vadd.f32 %v8383_v23, %v16557_v46  ;;  %v13614_v45 = vpop.f32.mrb[17].mxu1 }
0x1dfd   : > { %v8388_v61 = vrot.slane %v15056_v44, 4 }
0x1dff   : > { %8397 = vrot.lane.b32.xlu1 %v8388_v61, %s15491_s19  ;;  %v8390_v49 = vadd.f32 %v16567_v32, %v8388_v61 }
0x1e01   : > { %v8391_v7 = vsub.f32 0.0, %v8390_v49 }
0x1e03   : > { %v8392_v35 = vmul.f32 1.442695, %v8391_v7 }
0x1e05   : > { %15380 = vpow2.f32 %v8392_v35 }
0x1e0f   : > { %v15381_v17 = vpop.eup %15380 }
0x1e10   : > { %v8394_v24 = vadd.f32 1.0, %v15381_v17 }
0x1e12   : > { %15382 = vrcp.f32 %v8394_v24 }
0x1e1c   : > { %v15383_v39 = vpop.eup %15382 }
0x1e1d   : > { %v8407_v63 = vsub.f32 1.0, %v15383_v39  ;;  %v8415_v8 = vmul.f32 %v15383_v39, %v8413_v30 }
0x1e71   : > { %v8398_v41 = vpop.permute.xlu1 %8397 }
0x1e72   : > { %v8400_v55 = vmul.f32 %v15383_v39, %v8398_v41 }
0x1e74   : > { %8402 = vrot.lane.b32.xlu0 %v8400_v55, %s15491_s19 }
0x1ee6   : > { %v8403_v56 = vpop.permute.xlu0 %8402 }
0x1ee7   : > { %v8405_v57 = vadd.f32 %v16567_v32, %v8403_v56 }
0x1ee9   : > { %15384 = vtanh.f32 %v8405_v57 }
0x1ef3   : > { %v15385_v62 = vpop.eup %15384 }
0x1ef4   : > { %8409 = vrot.lane.b32.xlu1 %v15385_v62, %s15492_s26 }
0x1f66   : > { %v8410_v3 = vpop.permute.xlu1 %8409 }
0x1f67   : > { %v8412_v18 = vmul.f32 %v8410_v3, %v8407_v63 }
0x1f69   : > { %v16763_v28 = vadd.f32 %v8415_v8, %v8412_v18 }
0x1f6b   : > { %v8420_v37 = vrot.slane %v16763_v28, 4  ;;  %v8936_v49 = vrot.slane %v16763_v28, 1 }
0x1f6d   : > { %8421 = vrot.lane.b32.xlu0 %v8420_v37, %s15492_s26 }
0x1fdf   : > { %v8422_v38 = vpop.permute.xlu0 %8421 }
0x1fe0   : > { %v8423_v36 = vsel %vm1141_vm2, %v8422_v38, 0 }
0x1fe1   : > { %v8494_v43 = vand.u32 4294901760, %v8423_v36 }
0x1fe3   : > { %v8495_v52 = vsub.f32 %v8423_v36, %v8494_v43 }
0x1fe5   : > { %v8496_v9 = vand.u32 4294901760, %v8495_v52 }
0x1fe7   : > { %v8497_v13 = vsub.f32 %v8495_v52, %v8496_v9 }
0x1fe9   : > { %v8498_v16 = vand.u32 4294901760, %v8497_v13 }
0x1feb   : > { %13624 = vmatmul.mubr.f32.vlgmr.msra.gmra.mrb[12].mxu0 %v8498_v16 }
0x1fec   : > { %14763 = vmatpush3.bf16.msra.mxu0 %v16497_v27  ;;  %13634 = vmatprep.mubr.msk.f32.mxu0 %vm15488_vm0, %v15489_v54 }
0x1fed   : > { %14764 = vmatprep.subr.bf16.mxu0 %v15487_v5 }
0x1ff0   : > { %14766 = vmatpush3.bf16.msra.mxu0 %v16502_v4 }
0x1ff1   : > { %14767 = vmatprep.subr.bf16.mxu0 %v15487_v5 }
0x1ff3   : > { %13635 = vmatmul.mubr.f32.vlgmr.msra.gmra.mrb[12].mxu0 %v8494_v43 }
0x1ff4   : > { %14769 = vmatpush3.bf16.msra.mxu0 %v16508_v10  ;;  %13645 = vmatprep.mubr.msk.f32.mxu0 %vm15488_vm0, %v15489_v54 }
0x1ff5   : > { %14770 = vmatprep.subr.bf16.mxu0 %v15487_v5 }
0x1ff8   : > { %14772 = vmatpush3.bf16.msra.mxu0 %v16513_v20 }
0x1ff9   : > { %14773 = vmatprep.subr.bf16.mxu0 %v15487_v5 }
0x1ffb   : > { %13646 = vmatmul.mubr.f32.vlgmr.msra.gmra.mrb[12].mxu0 %v8495_v52 }
0x1ffc   : > { %14775 = vmatpush3.bf16.msra.mxu0 %v16486_v15  ;;  %13656 = vmatprep.mubr.msk.f32.mxu0 %vm15488_vm0, %v15489_v54 }
0x1ffd   : > { %14776 = vmatprep.subr.bf16.mxu0 %v15487_v5 }
0x2000   : > { %14778 = vmatpush3.bf16.msra.mxu0 %v16490_v60 }
0x2001   : > { %14779 = vmatprep.subr.bf16.mxu0 %v15487_v5 }
0x2003   : > { %13657 = vmatmul.mubr.f32.vlgmr.msra.gmra.mrb[12].mxu0 %v8496_v9 }
0x2004   : > { %14781 = vmatpush3.bf16.msra.mxu0 %v16526_v25  ;;  %13667 = vmatprep.mubr.msk.f32.mxu0 %vm15488_vm0, %v15489_v54 }
0x2005   : > { %14782 = vmatprep.subr.bf16.mxu0 %v15487_v5 }
0x2008   : > { %14784 = vmatpush3.bf16.msra.mxu0 %v16531_v26 }
0x2009   : > { %14785 = vmatprep.subr.bf16.mxu0 %v15487_v5 }
0x200b   : > { %13668 = vmatmul.mubr.f32.vlgmr.msra.gmra.mrb[12].mxu0 %v8494_v43 }
0x200c   : > { %14787 = vmatpush3.bf16.msra.mxu0 %v16486_v15  ;;  %13678 = vmatprep.mubr.msk.f32.mxu0 %vm15488_vm0, %v15489_v54 }
0x200d   : > { %14788 = vmatprep.subr.bf16.mxu0 %v15487_v5 }
0x2010   : > { %14790 = vmatpush3.bf16.msra.mxu0 %v16490_v60 }
0x2011   : > { %14827 = vmatprep.subr.bf16.mxu0 %v15487_v5 }
0x2013   : > { %13679 = vmatmul.mubr.f32.vlgmr.msra.gmra.mrb[12].mxu0 %v8494_v43 }
0x2014   : > { %14829 = vmatpush3.bf16.msra.mxu0 %v16486_v15  ;;  %13755 = vmatprep.mubr.msk.f32.mxu0 %vm15488_vm0, %v15489_v54 }
0x2015   : > { %14830 = vmatprep.subr.bf16.mxu0 %v15487_v5 }
0x2018   : > { %14832 = vmatpush3.bf16.msra.mxu0 %v16490_v60 }
0x2019   : > { %14833 = vmatprep.subr.bf16.mxu0 %v15487_v5 }
0x20e6   : > { %v8906_v29 = vpop.f32.mrb[12].mxu0 }
0x20e7   : > { %v15057_v33 = vadd.f32 %v8906_v29, %v16557_v46  ;;  %v13680_v34 = vpop.f32.mrb[13].mxu0 }
0x20e9   : > { %v8911_v40 = vrot.slane %v15057_v33, 5 }
0x20eb   : > { %8920 = vrot.lane.b32.xlu1 %v8911_v40, %s15491_s19  ;;  %v8913_v48 = vadd.f32 %v16567_v32, %v8911_v40 }
0x20ed   : > { %v8914_v58 = vsub.f32 0.0, %v8913_v48 }
0x20ef   : > { %v8915_v42 = vmul.f32 1.442695, %v8914_v58 }
0x20f1   : > { %15386 = vpow2.f32 %v8915_v42 }
0x20fb   : > { %v15387_v1 = vpop.eup %15386 }
0x20fc   : > { %v8917_v2 = vadd.f32 1.0, %v15387_v1 }
0x20fe   : > { %15388 = vrcp.f32 %v8917_v2 }
0x2108   : > { %v15389_v14 = vpop.eup %15388 }
0x2109   : > { %v8930_v61 = vsub.f32 1.0, %v15389_v14  ;;  %v8938_v35 = vmul.f32 %v15389_v14, %v8936_v49 }
0x215d   : > { %v8921_v59 = vpop.permute.xlu1 %8920 }
0x215e   : > { %v8923_v12 = vmul.f32 %v15389_v14, %v8921_v59 }
0x2160   : > { %8925 = vrot.lane.b32.xlu0 %v8923_v12, %s15491_s19 }
0x21d2   : > { %v8926_v23 = vpop.permute.xlu0 %8925 }
0x21d3   : > { %v8928_v44 = vadd.f32 %v16567_v32, %v8926_v23 }
0x21d5   : > { %15390 = vtanh.f32 %v8928_v44 }
0x21df   : > { %v15391_v45 = vpop.eup %15390 }
0x21e0   : > { %8932 = vrot.lane.b32.xlu1 %v15391_v45, %s15492_s26 }
0x2252   : > { %v8933_v7 = vpop.permute.xlu1 %8932 }
0x2253   : > { %v8935_v17 = vmul.f32 %v8933_v7, %v8930_v61 }
0x2255   : > { %v16811_v24 = vadd.f32 %v8938_v35, %v8935_v17 }
0x2257   : > { %v8943_v39 = vrot.slane %v16811_v24, 3  ;;  %v9459_v58 = vrot.slane %v16811_v24, 1 }
0x2259   : > { %8944 = vrot.lane.b32.xlu0 %v8943_v39, %s15492_s26 }
0x22cb   : > { %v8945_v41 = vpop.permute.xlu0 %8944 }
0x22cc   : > { %v8946_v55 = vsel %vm1141_vm2, %v8945_v41, 0 }
0x22cd   : > { %v9017_v56 = vand.u32 4294901760, %v8946_v55 }
0x22cf   : > { %v9018_v57 = vsub.f32 %v8946_v55, %v9017_v56 }
0x22d1   : > { %v9019_v62 = vand.u32 4294901760, %v9018_v57 }
0x22d3   : > { %v9020_v63 = vsub.f32 %v9018_v57, %v9019_v62 }
0x22d5   : > { %v9021_v30 = vand.u32 4294901760, %v9020_v63 }
0x22d7   : > { %13690 = vmatmul.mubr.f32.vlgmr.msra.gmra.mrb[18].mxu1 %v9021_v30 }
0x22d8   : > { %14799 = vmatpush3.bf16.msra.mxu1 %v16497_v27  ;;  %13700 = vmatprep.mubr.msk.f32.mxu1 %vm15488_vm0, %v15489_v54 }
0x22d9   : > { %14800 = vmatprep.subr.bf16.mxu1 %v15487_v5 }
0x22dc   : > { %14802 = vmatpush3.bf16.msra.mxu1 %v16502_v4 }
0x22dd   : > { %14803 = vmatprep.subr.bf16.mxu1 %v15487_v5 }
0x22df   : > { %13701 = vmatmul.mubr.f32.vlgmr.msra.gmra.mrb[18].mxu1 %v9017_v56 }
0x22e0   : > { %14805 = vmatpush3.bf16.msra.mxu1 %v16508_v10  ;;  %13711 = vmatprep.mubr.msk.f32.mxu1 %vm15488_vm0, %v15489_v54 }
0x22e1   : > { %14806 = vmatprep.subr.bf16.mxu1 %v15487_v5 }
0x22e4   : > { %14808 = vmatpush3.bf16.msra.mxu1 %v16513_v20 }
0x22e5   : > { %14809 = vmatprep.subr.bf16.mxu1 %v15487_v5 }
0x22e7   : > { %13712 = vmatmul.mubr.f32.vlgmr.msra.gmra.mrb[18].mxu1 %v9018_v57 }
0x22e8   : > { %14811 = vmatpush3.bf16.msra.mxu1 %v16486_v15  ;;  %13722 = vmatprep.mubr.msk.f32.mxu1 %vm15488_vm0, %v15489_v54 }
0x22e9   : > { %14812 = vmatprep.subr.bf16.mxu1 %v15487_v5 }
0x22ec   : > { %14814 = vmatpush3.bf16.msra.mxu1 %v16490_v60 }
0x22ed   : > { %14815 = vmatprep.subr.bf16.mxu1 %v15487_v5 }
0x22ef   : > { %13723 = vmatmul.mubr.f32.vlgmr.msra.gmra.mrb[18].mxu1 %v9019_v62 }
0x22f0   : > { %14817 = vmatpush3.bf16.msra.mxu1 %v16526_v25  ;;  %13733 = vmatprep.mubr.msk.f32.mxu1 %vm15488_vm0, %v15489_v54 }
0x22f1   : > { %14818 = vmatprep.subr.bf16.mxu1 %v15487_v5 }
0x22f4   : > { %14820 = vmatpush3.bf16.msra.mxu1 %v16531_v26 }
0x22f5   : > { %14821 = vmatprep.subr.bf16.mxu1 %v15487_v5 }
0x22f7   : > { %13734 = vmatmul.mubr.f32.vlgmr.msra.gmra.mrb[18].mxu1 %v9017_v56 }
0x22f8   : > { %14823 = vmatpush3.bf16.msra.mxu1 %v16486_v15  ;;  %13744 = vmatprep.mubr.msk.f32.mxu1 %vm15488_vm0, %v15489_v54 }
0x22f9   : > { %14824 = vmatprep.subr.bf16.mxu1 %v15487_v5 }
0x22fc   : > { %14826 = vmatpush3.bf16.msra.mxu1 %v16490_v60 }
0x22fd   : > { %14863 = vmatprep.subr.bf16.mxu1 %v15487_v5 }
0x22ff   : > { %13745 = vmatmul.mubr.f32.vlgmr.msra.gmra.mrb[18].mxu1 %v9017_v56 }
0x2300   : > { %14865 = vmatpush3.bf16.msra.mxu1 %v16486_v15  ;;  %13821 = vmatprep.mubr.msk.f32.mxu1 %vm15488_vm0, %v15489_v54 }
0x2301   : > { %14866 = vmatprep.subr.bf16.mxu1 %v15487_v5 }
0x2304   : > { %14868 = vmatpush3.bf16.msra.mxu1 %v16490_v60 }
0x2305   : > { %14869 = vmatprep.subr.bf16.mxu1 %v15487_v5 }
0x23d2   : > { %v9429_v3 = vpop.f32.mrb[18].mxu1 }
0x23d3   : > { %v15058_v8 = vadd.f32 %v9429_v3, %v16557_v46  ;;  %v13746_v18 = vpop.f32.mrb[19].mxu1 }
0x23d5   : > { %v9434_v37 = vrot.slane %v15058_v8, 6 }
0x23d7   : > { %9443 = vrot.lane.b32.xlu1 %v9434_v37, %s15491_s19  ;;  %v9436_v38 = vadd.f32 %v16567_v32, %v9434_v37  ;;  %v15420_v37 = vld [vmem:[%s17284_s5] sm:$0x1] }
0x23d9   : > { %v9437_v36 = vsub.f32 0.0, %v9436_v38  ;;  %v15052_v38 = vadd.f32 %v15420_v37, %v16658_v11  ;;  %v10510_v37 = vld [vmem:[%s17289_s10 + $0x8] sm:$0xff] }
0x23db   : > { %v9438_v43 = vmul.f32 1.442695, %v9437_v36 }
0x23dd   : > { %15392 = vpow2.f32 %v9438_v43  ;;  %v6300_v43 = vrot.slane %v15052_v38, 1  ;;  %v10532_v38 = vand.u32 4294901760, %v10510_v37 }
0x23e7   : > { %v15393_v52 = vpop.eup %15392 }
0x23e8   : > { %v9440_v9 = vadd.f32 1.0, %v15393_v52  ;;  %v6302_v52 = vadd.f32 %v16195_v22, %v6300_v43 }
0x23ea   : > { %15394 = vrcp.f32 %v9440_v9  ;;  %v6303_v9 = vsub.f32 0.0, %v6302_v52 }
0x23f4   : > { %v15395_v13 = vpop.eup %15394 }
0x23f5   : > { %v9453_v48 = vsub.f32 1.0, %v15395_v13  ;;  %v9461_v1 = vmul.f32 %v15395_v13, %v9459_v58 }
0x2449   : > { %v9444_v16 = vpop.permute.xlu1 %9443 }
0x244a   : > { %v9446_v29 = vmul.f32 %v15395_v13, %v9444_v16  ;;  %v6304_v13 = vmul.f32 1.442695, %v6303_v9  ;;  %v16997_v9 = vsub.f32 %v10510_v37, %v10532_v38 }
0x244c   : > { %9448 = vrot.lane.b32.xlu0 %v9446_v29, %s15491_s19 }
0x24be   : > { %v9449_v33 = vpop.permute.xlu0 %9448 }
0x24bf   : > { %v9451_v34 = vadd.f32 %v16567_v32, %v9449_v33 }
0x24c1   : > { %15396 = vtanh.f32 %v9451_v34 }
0x24cb   : > { %v15397_v40 = vpop.eup %15396 }
0x24cc   : > { %9455 = vrot.lane.b32.xlu1 %v15397_v40, %s15492_s26 }
0x253e   : > { %v9456_v42 = vpop.permute.xlu1 %9455 }
0x253f   : > { %v9458_v2 = vmul.f32 %v9456_v42, %v9453_v48 }
0x2541   : > { %v16859_v14 = vadd.f32 %v9461_v1, %v9458_v2 }
0x2543   : > { %v9466_v59 = vrot.slane %v16859_v14, 2  ;;  %v9982_v34 = vrot.slane %v16859_v14, 1 }
0x2545   : > { %9467 = vrot.lane.b32.xlu0 %v9466_v59, %s15492_s26 }
0x25b7   : > { %v9468_v12 = vpop.permute.xlu0 %9467 }
0x25b8   : > { %v9469_v23 = vsel %vm1141_vm2, %v9468_v12, 0 }
0x25b9   : > { %v9540_v44 = vand.u32 4294901760, %v9469_v23 }
0x25bb   : > { %v9541_v45 = vsub.f32 %v9469_v23, %v9540_v44 }
0x25bd   : > { %v9542_v61 = vand.u32 4294901760, %v9541_v45 }
0x25bf   : > { %v9543_v49 = vsub.f32 %v9541_v45, %v9542_v61 }
0x25c1   : > { %v9544_v7 = vand.u32 4294901760, %v9543_v49 }
0x25c3   : > { %13756 = vmatmul.mubr.f32.vlgmr.msra.gmra.mrb[14].mxu0 %v9544_v7 }
0x25c4   : > { %14835 = vmatpush3.bf16.msra.mxu0 %v16497_v27  ;;  %13766 = vmatprep.mubr.msk.f32.mxu0 %vm15488_vm0, %v15489_v54 }
0x25c5   : > { %14836 = vmatprep.subr.bf16.mxu0 %v15487_v5 }
0x25c8   : > { %14838 = vmatpush3.bf16.msra.mxu0 %v16502_v4 }
0x25c9   : > { %14839 = vmatprep.subr.bf16.mxu0 %v15487_v5 }
0x25cb   : > { %13767 = vmatmul.mubr.f32.vlgmr.msra.gmra.mrb[14].mxu0 %v9540_v44 }
0x25cc   : > { %14841 = vmatpush3.bf16.msra.mxu0 %v16508_v10  ;;  %13777 = vmatprep.mubr.msk.f32.mxu0 %vm15488_vm0, %v15489_v54 }
0x25cd   : > { %14842 = vmatprep.subr.bf16.mxu0 %v15487_v5 }
0x25d0   : > { %14844 = vmatpush3.bf16.msra.mxu0 %v16513_v20 }
0x25d1   : > { %14845 = vmatprep.subr.bf16.mxu0 %v15487_v5 }
0x25d3   : > { %13778 = vmatmul.mubr.f32.vlgmr.msra.gmra.mrb[14].mxu0 %v9541_v45 }
0x25d4   : > { %14847 = vmatpush3.bf16.msra.mxu0 %v16486_v15  ;;  %13788 = vmatprep.mubr.msk.f32.mxu0 %vm15488_vm0, %v15489_v54 }
0x25d5   : > { %14848 = vmatprep.subr.bf16.mxu0 %v15487_v5 }
0x25d8   : > { %14850 = vmatpush3.bf16.msra.mxu0 %v16490_v60 }
0x25d9   : > { %14851 = vmatprep.subr.bf16.mxu0 %v15487_v5 }
0x25db   : > { %13789 = vmatmul.mubr.f32.vlgmr.msra.gmra.mrb[14].mxu0 %v9542_v61 }
0x25dc   : > { %14853 = vmatpush3.bf16.msra.mxu0 %v16526_v25  ;;  %13799 = vmatprep.mubr.msk.f32.mxu0 %vm15488_vm0, %v15489_v54 }
0x25dd   : > { %14854 = vmatprep.subr.bf16.mxu0 %v15487_v5 }
0x25e0   : > { %14856 = vmatpush3.bf16.msra.mxu0 %v16531_v26 }
0x25e1   : > { %14857 = vmatprep.subr.bf16.mxu0 %v15487_v5 }
0x25e3   : > { %13800 = vmatmul.mubr.f32.vlgmr.msra.gmra.mrb[14].mxu0 %v9540_v44 }
0x25e4   : > { %14859 = vmatpush3.bf16.msra.mxu0 %v16486_v15  ;;  %13810 = vmatprep.mubr.msk.f32.mxu0 %vm15488_vm0, %v15489_v54 }
0x25e5   : > { %14860 = vmatprep.subr.bf16.mxu0 %v15487_v5 }
0x25e8   : > { %14862 = vmatpush3.bf16.msra.mxu0 %v16490_v60 }
0x25e9   : > { %14899 = vmatprep.subr.bf16.mxu0 %v15487_v5 }
0x25eb   : > { %13811 = vmatmul.mubr.f32.vlgmr.msra.gmra.mrb[14].mxu0 %v9540_v44 }
0x25ec   : > { %13895 = vmatprep.mubr.msk.f32.mxu0 %vm15488_vm0, %v15489_v54 }
0x26be   : > { %v9952_v35 = vpop.f32.mrb[14].mxu0 }
0x26bf   : > { %v15059_v17 = vadd.f32 %v9952_v35, %v16557_v46  ;;  %v13812_v39 = vpop.f32.mrb[15].mxu0 }
0x26c1   : > { %v9957_v41 = vrot.slane %v15059_v17, 7 }
0x26c3   : > { %9966 = vrot.lane.b32.xlu1 %v9957_v41, %s15491_s19  ;;  %v9959_v55 = vadd.f32 %v16567_v32, %v9957_v41 }
0x26c5   : > { %v9960_v56 = vsub.f32 0.0, %v9959_v55 }
0x26c7   : > { %v9961_v57 = vmul.f32 1.442695, %v9960_v56 }
0x26c9   : > { %15398 = vpow2.f32 %v9961_v57 }
0x26d3   : > { %v15399_v62 = vpop.eup %15398 }
0x26d4   : > { %v9963_v63 = vadd.f32 1.0, %v15399_v62 }
0x26d6   : > { %15400 = vrcp.f32 %v9963_v63 }
0x26e0   : > { %v15401_v30 = vpop.eup %15400 }
0x26e1   : > { %v9976_v33 = vsub.f32 1.0, %v15401_v30  ;;  %v9984_v48 = vmul.f32 %v15401_v30, %v9982_v34 }
0x2735   : > { %v9967_v3 = vpop.permute.xlu1 %9966 }
0x2736   : > { %v9969_v8 = vmul.f32 %v15401_v30, %v9967_v3 }
0x2738   : > { %9971 = vrot.lane.b32.xlu0 %v9969_v8, %s15491_s19 }
0x27aa   : > { %v9972_v18 = vpop.permute.xlu0 %9971 }
0x27ab   : > { %v9974_v46 = vadd.f32 %v16567_v32, %v9972_v18 }
0x27ad   : > { %15402 = vtanh.f32 %v9974_v46  ;;  %v10509_v46 = vld [vmem:[%s17289_s10] sm:$0xff] }
0x27ae   : > { %15404 = vpow2.f32 %v6304_v13  ;;  %v10514_v13 = vld [vmem:[%s17289_s10 + $0x28] sm:$0xff] }
0x27b7   : > { %v15403_v36 = vpop.eup %15402 }
0x27b8   : > { %9978 = vrot.lane.b32.xlu1 %v15403_v36, %s15492_s26  ;;  %v15405_v16 = vpop.eup %15404  ;;  %v10513_v36 = vld [vmem:[%s17289_s10 + $0x20] sm:$0xff] }
0x27b9   : > { %v6306_v29 = vadd.f32 1.0, %v15405_v16  ;;  %v10515_v16 = vld [vmem:[%s17289_s10 + $0x30] sm:$0xff] }
0x27bb   : > { %15406 = vrcp.f32 %v6306_v29  ;;  %v10516_v29 = vld [vmem:[%s17289_s10 + $0x38] sm:$0xff] }
0x27bc   : > { %6309 = vrot.lane.b32.xlu1 %v6300_v43, %s15491_s19 }
0x27c5   : > { %v15407_v42 = vpop.eup %15406 }
0x282a   : > { %v9979_v40 = vpop.permute.xlu1 %9978 }
0x282b   : > { %v9981_v11 = vmul.f32 %v9979_v40, %v9976_v33  ;;  %v10541_v40 = vand.u32 4294901760, %v10513_v36 }
0x282d   : > { %v16909_v58 = vadd.f32 %v9984_v48, %v9981_v11  ;;  %v10544_v11 = vand.u32 4294901760, %v10514_v13 }
0x282e   : > { %v6310_v1 = vpop.permute.xlu1 %6309 }
0x282f   : > { %v6312_v2 = vmul.f32 %v15407_v42, %v6310_v1  ;;  %v9989_v59 = vrot.slane %v16909_v58, 1  ;;  %v10550_v1 = vand.u32 4294901760, %v10516_v29 }
0x2831   : > { %9990 = vrot.lane.b32.xlu0 %v9989_v59, %s15492_s26  ;;  %6314 = vrot.lane.b32.xlu1 %v6312_v2, %s15491_s19 }
0x28a3   : > { %v9991_v12 = vpop.permute.xlu0 %9990  ;;  %v6315_v23 = vpop.permute.xlu1 %6314 }
0x28a4   : > { %v9992_v44 = vsel %vm1141_vm2, %v9991_v12, 0  ;;  %v6317_v45 = vadd.f32 %v16195_v22, %v6315_v23  ;;  %v6319_v22 = vsub.f32 1.0, %v15407_v42  ;;  %v17018_v23 = vsub.f32 %v10513_v36, %v10541_v40 }
0x28a5   : > { %v10063_v61 = vand.u32 4294901760, %v9992_v44  ;;  %vm5807_vm2 = vcmask 260102  }
0x28a6   : > { %15408 = vtanh.f32 %v6317_v45 }
0x28a7   : > { %v10064_v49 = vsub.f32 %v9992_v44, %v10063_v61  ;;  %v17020_v44 = vsub.f32 %v10514_v13, %v10544_v11 }
0x28a9   : > { %v10065_v7 = vand.u32 4294901760, %v10064_v49 }
0x28ab   : > { %v10066_v35 = vsub.f32 %v10064_v49, %v10065_v7 }
0x28ad   : > { %v10067_v17 = vand.u32 4294901760, %v10066_v35 }
0x28af   : > { %13822 = vmatmul.mubr.f32.vlgmr.msra.gmra.mrb[20].mxu1 %v10067_v17  ;;  %v10621_v17 = vand.u32 4294901760, %v16997_v9 }
0x28b0   : > { %v15409_v39 = vpop.eup %15408  ;;  %14871 = vmatpush3.bf16.msra.mxu1 %v16497_v27  ;;  %13832 = vmatprep.mubr.msk.f32.mxu1 %vm15488_vm0, %v15489_v54 }
0x28b1   : > { %6321 = vrot.lane.b32.xlu1 %v15409_v39, %s15492_s26  ;;  %14872 = vmatprep.subr.bf16.mxu1 %v15487_v5 }
0x28b4   : > { %14874 = vmatpush3.bf16.msra.mxu1 %v16502_v4 }
0x28b5   : > { %3174 = vrot.lane.b32.xlu1 %v16249_v50, %s15492_s26  ;;  %14875 = vmatprep.subr.bf16.mxu1 %v15487_v5  ;;  %v6325_v50 = vrot.slane %v16576_v31, 7 }
0x28b7   : > { %13833 = vmatmul.mubr.f32.vlgmr.msra.gmra.mrb[20].mxu1 %v10063_v61 }
0x28b8   : > { %14877 = vmatpush3.bf16.msra.mxu1 %v16508_v10  ;;  %13843 = vmatprep.mubr.msk.f32.mxu1 %vm15488_vm0, %v15489_v54 }
0x28b9   : > { %4226 = vrot.lane.b32.xlu1 %v16345_v19, %s15492_s26  ;;  %14878 = vmatprep.subr.bf16.mxu1 %v15487_v5 }
0x28bc   : > { %14880 = vmatpush3.bf16.msra.mxu1 %v16513_v20 }
0x28bd   : > { %5278 = vrot.lane.b32.xlu1 %v16441_v53, %s15492_s26  ;;  %14881 = vmatprep.subr.bf16.mxu1 %v15487_v5  ;;  %v6327_v53 = vmul.f32 %v15407_v42, %v6325_v50  ;;  %v10547_v42 = vand.u32 4294901760, %v10515_v16 }
0x28bf   : > { %13844 = vmatmul.mubr.f32.vlgmr.msra.gmra.mrb[20].mxu1 %v10064_v49  ;;  %v17022_v45 = vsub.f32 %v10515_v16, %v10547_v42 }
0x28c0   : > { %14883 = vmatpush3.bf16.msra.mxu1 %v16486_v15  ;;  %13854 = vmatprep.mubr.msk.f32.mxu1 %vm15488_vm0, %v15489_v54 }
0x28c1   : > { %14884 = vmatprep.subr.bf16.mxu1 %v15487_v5 }
0x28c4   : > { %14886 = vmatpush3.bf16.msra.mxu1 %v16490_v60 }
0x28c5   : > { %14887 = vmatprep.subr.bf16.mxu1 %v15487_v5 }
0x28c7   : > { %13855 = vmatmul.mubr.f32.vlgmr.msra.gmra.mrb[20].mxu1 %v10065_v7  ;;  %v17027_v7 = vpack.c.bf16 %v10544_v11, %v10541_v40 }
0x28c8   : > { %14889 = vmatpush3.bf16.msra.mxu1 %v16526_v25  ;;  %13865 = vmatprep.mubr.msk.f32.mxu1 %vm15488_vm0, %v15489_v54 }
0x28c9   : > { %14890 = vmatprep.subr.bf16.mxu1 %v15487_v5 }
0x28cc   : > { %14892 = vmatpush3.bf16.msra.mxu1 %v16531_v26  ;;  %v15421_v26 = vld [vmem:[%s17288_s9] sm:$0x1] }
0x28cd   : > { %14893 = vmatprep.subr.bf16.mxu1 %v15487_v5 }
0x28cf   : > { %13866 = vmatmul.mubr.f32.vlgmr.msra.gmra.mrb[20].mxu1 %v10063_v61 }
0x28d0   : > { %14895 = vmatpush3.bf16.msra.mxu1 %v16486_v15  ;;  %13876 = vmatprep.mubr.msk.f32.mxu1 %vm15488_vm0, %v15489_v54 }
0x28d1   : > { %14896 = vmatprep.subr.bf16.mxu1 %v15487_v5 }
0x28d4   : > { %14898 = vmatpush3.bf16.msra.mxu1 %v16490_v60 }
0x28d5   : > { %14971 = vmatprep.subr.bf16.mxu1 %v15487_v5 }
0x28d7   : > { %13877 = vmatmul.mubr.f32.vlgmr.msra.gmra.mrb[20].mxu1 %v10063_v61  ;;  %v17024_v61 = vsub.f32 %v10516_v29, %v10550_v1 }
0x28d8   : > { %14009 = vmatprep.mubr.msk.f32.mxu1 %vm15488_vm0, %v15489_v54 }
0x2923   : > { %v6322_v19 = vpop.permute.xlu1 %6321 }
0x2924   : > { %v6324_v27 = vmul.f32 %v6322_v19, %v6319_v22  ;;  %v10622_v22 = vsub.f32 %v16997_v9, %v10621_v17 }
0x2926   : > { %v6328_v15 = vadd.f32 %v6327_v53, %v6324_v27  ;;  %v10623_v19 = vand.u32 4294901760, %v10622_v22 }
0x2927   : > { %v3175_v4 = vpop.permute.xlu1 %3174 }
0x2928   : > { %3178 = vst.msk [vmem:[#allocation2] sm:$0x2] %vm3177_vm4, %v3175_v4  ;;  %6330 = vrot.lane.b32.xlu1 %v6328_v15, %s15492_s26  ;;  %vm10524_vm4 = vcmask 523264  }
0x2929   : > { %9987 = vst.msk [vmem:[#allocation2] sm:$0x2] %vm9986_vm5, %v16909_v58  ;;  %vm11065_vm5 = vcmask 7168  }
0x292b   : > { %v4227_v60 = vpop.permute.xlu1 %4226 }
0x292c   : > { %4230 = vst.msk [vmem:[#allocation2] sm:$0x8] %vm4229_vm6, %v4227_v60 }
0x292d   : > { %8941 = vst.msk [vmem:[#allocation2] sm:$0x8] %vm8940_vm7, %v16811_v24 }
0x292f   : > { %v5279_v10 = vpop.permute.xlu1 %5278 }
0x2930   : > { %5282 = vst.msk [vmem:[#allocation2] sm:$0x20] %vm5281_vm8, %v5279_v10 }
0x2931   : > { %7895 = vst.msk [vmem:[#allocation2] sm:$0x20] %vm7894_vm9, %v16715_v47 }
0x299a   : > { %v6331_v20 = vpop.permute.xlu1 %6330 }
0x299b   : > { %6334 = vst.msk [vmem:[#allocation2] sm:$0x80] %vm6333_vm10, %v6331_v20  ;;  %v10642_v20 = vand.u32 4294901760, %v17018_v23 }
0x299c   : > { %6849 = vst.msk [vmem:[#allocation2] sm:$0x80] %vm6848_vm11, %v16580_v51 }
0x29aa   : > { %v10475_v25 = vpop.f32.mrb[20].mxu1 }
0x29ab   : > { %v15060_v41 = vadd.f32 %v15421_v26, %v10475_v25  ;;  %v13878_v55 = vpop.f32.mrb[21].mxu1  ;;  %v10649_v25 = vand.u32 4294901760, %v17020_v44 }
0x29ad   : > { %10487 = vrot.lane.b32.xlu0 %v15060_v41, %s15491_s19  ;;  %v10479_v24 = vadd.f32 %v15060_v41, %v16567_v32  ;;  %v10643_v41 = vsub.f32 %v17018_v23, %v10642_v20  ;;  %v10650_v55 = vsub.f32 %v17020_v44, %v10649_v25  ;;  %v14954_v36 = vpack.c.bf16 %v10649_v25, %v10642_v20 }
0x29af   : > { %v10480_v56 = vsub.f32 0.0, %v10479_v24  ;;  %v10644_v24 = vand.u32 4294901760, %v10643_v41  ;;  %v11101_v41 = vld [vmem:[%s17291_s12 + $0x18] sm:$0xff] }
0x29b1   : > { %v10481_v57 = vmul.f32 1.442695, %v10480_v56  ;;  %v10651_v56 = vand.u32 4294901760, %v10650_v55 }
0x29b3   : > { %15410 = vpow2.f32 %v10481_v57  ;;  %v10656_v57 = vand.u32 4294901760, %v17022_v45 }
0x29bd   : > { %v15411_v47 = vpop.eup %15410 }
0x29be   : > { %v10483_v62 = vadd.f32 1.0, %v15411_v47  ;;  %v10663_v47 = vand.u32 4294901760, %v17024_v61 }
0x29c0   : > { %15412 = vrcp.f32 %v10483_v62  ;;  %v14918_v62 = vpack.c.bf16 %v10651_v56, %v10644_v24  ;;  %v11120_v24 = vand.u32 4294901760, %v11101_v41 }
0x29ca   : > { %v16968_v63 = vpop.eup %15412 }
0x29cb   : > { %v10497_v13 = vsub.f32 1.0, %v16968_v63 }
0x2a1f   : > { %v10488_v51 = vpop.permute.xlu0 %10487 }
0x2a20   : > { %v10490_v30 = vmul.f32 %v16968_v63, %v10488_v51  ;;  %v10657_v51 = vsub.f32 %v17022_v45, %v10656_v57 }
0x2a22   : > { %10492 = vrot.lane.b32.xlu0 %v10490_v30, %s15491_s19  ;;  %v10664_v30 = vsub.f32 %v17024_v61, %v10663_v47 }
0x2a26   : > { %3700 = vrot.lane.b32.xlu0 %v16297_v21, %s15492_s26  ;;  %v10529_v21 = vand.u32 4294901760, %v10509_v46 }
0x2a28   : > { %v16993_v43 = vpack.c.bf16 %v10532_v38, %v10529_v21  ;;  %v16995_v52 = vsub.f32 %v10509_v46, %v10529_v21  ;;  %v14930_v21 = vpack.c.bf16 %v17020_v44, %v17018_v23  ;;  %v14933_v38 = vpack.c.bf16 %v17024_v61, %v17022_v45 }
0x2a2a   : > { %4752 = vrot.lane.b32.xlu0 %v16393_v0, %s15492_s26  ;;  %v10511_v0 = vld [vmem:[%s17289_s10 + $0x10] sm:$0xff]  ;;  %14901 = vmatpush3.bf16.msra.mxu0 %v16993_v43  ;;  %v10614_v35 = vand.u32 4294901760, %v16995_v52  ;;  %v14924_v46 = vpack.c.bf16 %v16997_v9, %v16995_v52 }
0x2a2b   : > { %14902 = vmatprep.subr.bf16.mxu0 %v15487_v5 }
0x2a2c   : > { %v10615_v39 = vsub.f32 %v16995_v52, %v10614_v35  ;;  %v10504_v52 = vmul.f32 %v16968_v63, %v9989_v59 }
0x2a2e   : > { %v10616_v50 = vand.u32 4294901760, %v10615_v39 }
0x2a30   : > { %v14912_v15 = vpack.c.bf16 %v10623_v19, %v10616_v50 }
0x2a94   : > { %v10493_v3 = vpop.permute.xlu0 %10492 }
0x2a95   : > { %v10495_v8 = vadd.f32 %v16567_v32, %v10493_v3  ;;  %v10512_v32 = vld [vmem:[%s17289_s10 + $0x18] sm:$0xff]  ;;  %v10658_v3 = vand.u32 4294901760, %v10657_v51 }
0x2a96   : > { %v10538_v34 = vand.u32 4294901760, %v10512_v32 }
0x2a97   : > { %15414 = vtanh.f32 %v10495_v8  ;;  %v10665_v8 = vand.u32 4294901760, %v10664_v30 }
0x2a98   : > { %v3701_v18 = vpop.permute.xlu0 %3700  ;;  %v17016_v12 = vsub.f32 %v10512_v32, %v10538_v34 }
0x2a99   : > { %3704 = vst.msk [vmem:[#allocation2] sm:$0x4] %vm3703_vm12, %v3701_v18  ;;  %v14921_v18 = vpack.c.bf16 %v10665_v8, %v10658_v3 }
0x2a9a   : > { %9464 = vst.msk [vmem:[#allocation2] sm:$0x4] %vm9463_vm13, %v16859_v14  ;;  %v10535_v14 = vand.u32 4294901760, %v10511_v0  ;;  %v10635_v27 = vand.u32 4294901760, %v17016_v12 }
0x2a9c   : > { %v4753_v33 = vpop.permute.xlu0 %4752  ;;  %v17009_v48 = vsub.f32 %v10511_v0, %v10535_v14  ;;  %v17014_v2 = vpack.c.bf16 %v10538_v34, %v10535_v14  ;;  %v14948_v0 = vpack.c.bf16 %v10621_v17, %v10614_v35  ;;  %v14957_v14 = vpack.c.bf16 %v10663_v47, %v10656_v57  ;;  %v11102_v57 = vld [vmem:[%s17291_s12 + $0x20] sm:$0xff]  ;;  %v11103_v47 = vld [vmem:[%s17291_s12 + $0x28] sm:$0xff] }
0x2a9d   : > { %4756 = vst.msk [vmem:[#allocation2] sm:$0x10] %vm4755_vm14, %v4753_v33  ;;  %v11126_v51 = vand.u32 4294901760, %v11103_v47 }
0x2a9e   : > { %8418 = vst.msk [vmem:[#allocation2] sm:$0x10] %vm8417_vm15, %v16763_v28  ;;  %14904 = vmatpush3.bf16.msra.mxu0 %v17014_v2  ;;  %v17032_v28 = vpack.c.bf16 %v10550_v1, %v10547_v42  ;;  %v10628_v53 = vand.u32 4294901760, %v17009_v48  ;;  %v14927_v37 = vpack.c.bf16 %v17016_v12, %v17009_v48 }
0x2a9f   : > { %14905 = vmatprep.subr.bf16.mxu0 %v15487_v5 }
0x2aa0   : > { %v10629_v4 = vsub.f32 %v17009_v48, %v10628_v53  ;;  %v14951_v32 = vpack.c.bf16 %v10635_v27, %v10628_v53 }
0x2aa1   : > { %v15415_v49 = vpop.eup %15414 }
0x2aa2   : > { %10499 = vrot.lane.b32.xlu0 %v15415_v49, %s15492_s26  ;;  %14907 = vmatpush3.bf16.msra.mxu0 %v17027_v7  ;;  %v10630_v60 = vand.u32 4294901760, %v10629_v4 }
0x2aa3   : > { %14908 = vmatprep.subr.bf16.mxu0 %v15487_v5 }
0x2aa6   : > { %5804 = vrot.lane.b32.xlu0 %v16576_v31, %s15492_s26  ;;  %14910 = vmatpush3.bf16.msra.mxu0 %v17032_v28  ;;  %v10636_v31 = vsub.f32 %v17016_v12, %v10635_v27  ;;  %s459_s26 = scalar_lea.vmem [#allocation4], %s458_s30 }
0x2aa7   : > { %14911 = vmatprep.subr.bf16.mxu0 %v15487_v5  ;;  %s11661_s21 = sshll.u32 %s459_s26, 4  ;;  %s17239_s21 = int_to_ptr.vmem [resolvable:$true] %s11661_s21 }
0x2aa8   : > { %v10637_v10 = vand.u32 4294901760, %v10636_v31  ;;  %v11098_v31 = vld [vmem:[%s17291_s12] sm:$0xff]  ;;  %s15422_s19 = scalar_lea.vmem %s17239_s21, 16  ;;  %p15429_p0 = scmp.lt.s32.totalorder %s17239_s21, %s15427_s28 }
0x2aa9   : > { %p15423_p11 = scmp.ne.s32.totalorder %s17239_s21, %s15422_s19  ;;  %p15430_p1 = scmp.lt.s32.totalorder %s15428_s0, %s15422_s19 }
0x2aaa   : > { %v14915_v26 = vpack.c.bf16 %v10637_v10, %v10630_v60  ;;  %v11099_v60 = vld [vmem:[%s17291_s12 + $0x8] sm:$0xff]  ;;  %v11111_v10 = vand.u32 4294901760, %v11098_v31 }
0x2aab   : > { %v11114_v20 = vand.u32 4294901760, %v11099_v60  ;;  %p15424_p12 = pnand %p15423_p11, %p15610_p5  ;;  %p15431_p2 = por %p15430_p1, %p15429_p0 }
0x2aac   : > { %v17135_v30 = vsub.f32 %v11098_v31, %v11111_v10 }
0x2aad   : > { %v17115_v25 = vpack.c.bf16 %v11114_v20, %v11111_v10  ;;  %v17137_v3 = vsub.f32 %v11099_v60, %v11114_v20  ;;  %p15425_p13 = pneg %p15424_p12 }
0x2aaf   : > { %14973 = vmatpush3.bf16.msra.mxu1 %v17115_v25  ;;  %p15432_p3 = pnand %p15431_p2, %p15425_p13 }
0x2ab0   : > { %14974 = vmatprep.subr.bf16.mxu1 %v15487_v5 }
0x2b14   : > { %v10500_v16 = vpop.permute.xlu0 %10499 }
0x2b15   : > { %v10502_v9 = vmul.f32 %v10500_v16, %v10497_v13  ;;  %v11203_v13 = vand.u32 4294901760, %v17137_v3 }
0x2b17   : > { %v10505_v29 = vadd.f32 %v10504_v52, %v10502_v9 }
0x2b18   : > { %v5805_v33 = vpop.permute.xlu0 %5804 }
0x2b19   : > { %10507 = vst.msk [vmem:[#allocation2] sm:$0x1] %vm10506_vm1, %v10505_v29 }
0x2b1a   : > { %5808 = vst.msk [vmem:[#allocation2] sm:$0x40] %vm5807_vm2, %v5805_v33  ;;  %v11204_v33 = vsub.f32 %v17137_v3, %v11203_v13 }
0x2b1b   : > { %7372 = vst.msk [vmem:[#allocation2] sm:$0x40] %vm7371_vm3, %v16667_v6  ;;  %v11727_v6 = vld [vmem:[#allocation3] ss:$0 sm:$0xff] }
0x2b22   : > { %v17068_v34 = vld [vmem:[#allocation2] sm:$0xff] }
0x2b23   : > { %v10526_v40 = vsel %vm10524_vm4, %v17068_v34, 0 }
0x2b24   : > { %v10601_v48 = vand.u32 4294901760, %v10526_v40 }
0x2b26   : > { %v10602_v58 = vsub.f32 %v10526_v40, %v10601_v48 }
0x2b28   : > { %v10603_v11 = vand.u32 4294901760, %v10602_v58 }
0x2b2a   : > { %v10604_v59 = vsub.f32 %v10602_v58, %v10603_v11 }
0x2b2c   : > { %v10605_v63 = vand.u32 4294901760, %v10604_v59 }
0x2b2e   : > { %13896 = vmatmul.mubr.f32.vlgmr.msra.gmra.mrb[16].mxu0 %v10605_v63 }
0x2b2f   : > { %14913 = vmatpush3.bf16.msra.mxu0 %v14912_v15  ;;  %13914 = vmatprep.mubr.msk.f32.mxu0 %vm15488_vm0, %v15489_v54 }
0x2b30   : > { %14914 = vmatprep.subr.bf16.mxu0 %v15487_v5 }
0x2b33   : > { %14916 = vmatpush3.bf16.msra.mxu0 %v14915_v26  ;;  %v11100_v26 = vld [vmem:[%s17291_s12 + $0x10] sm:$0xff] }
0x2b34   : > { %14917 = vmatprep.subr.bf16.mxu0 %v15487_v5  ;;  %v11117_v55 = vand.u32 4294901760, %v11100_v26 }
0x2b36   : > { %v17125_v56 = vpack.c.bf16 %v11120_v24, %v11117_v55 }
0x2b37   : > { %14919 = vmatpush3.bf16.msra.mxu0 %v14918_v62  ;;  %v11123_v62 = vand.u32 4294901760, %v11102_v57 }
0x2b38   : > { %14920 = vmatprep.subr.bf16.mxu0 %v15487_v5  ;;  %14976 = vmatpush3.bf16.msra.mxu1 %v17125_v56 }
0x2b39   : > { %14977 = vmatprep.subr.bf16.mxu1 %v15487_v5  ;;  %v17139_v8 = vpack.c.bf16 %v11126_v51, %v11123_v62 }
0x2b3b   : > { %14922 = vmatpush3.bf16.msra.mxu0 %v14921_v18  ;;  %v11104_v18 = vld [vmem:[%s17291_s12 + $0x30] sm:$0xff] }
0x2b3c   : > { %14923 = vmatprep.subr.bf16.mxu0 %v15487_v5  ;;  %14979 = vmatpush3.bf16.msra.mxu1 %v17139_v8 }
0x2b3d   : > { %14980 = vmatprep.subr.bf16.mxu1 %v15487_v5 }
0x2b3e   : > { %13915 = vmatmul.mubr.f32.vlgmr.msra.gmra.mrb[16].mxu0 %v10601_v48 }
0x2b3f   : > { %14925 = vmatpush3.bf16.msra.mxu0 %v14924_v46  ;;  %13933 = vmatprep.mubr.msk.f32.mxu0 %vm15488_vm0, %v15489_v54  ;;  %v11105_v46 = vld [vmem:[%s17291_s12 + $0x38] sm:$0xff] }
0x2b40   : > { %14926 = vmatprep.subr.bf16.mxu0 %v15487_v5 }
0x2b43   : > { %14928 = vmatpush3.bf16.msra.mxu0 %v14927_v37  ;;  %v17147_v37 = vsub.f32 %v11100_v26, %v11117_v55 }
0x2b44   : > { %14929 = vmatprep.subr.bf16.mxu0 %v15487_v5 }
0x2b47   : > { %14931 = vmatpush3.bf16.msra.mxu0 %v14930_v21  ;;  %v17149_v21 = vsub.f32 %v11101_v41, %v11120_v24 }
0x2b48   : > { %14932 = vmatprep.subr.bf16.mxu0 %v15487_v5 }
0x2b4b   : > { %14934 = vmatpush3.bf16.msra.mxu0 %v14933_v38  ;;  %v17152_v38 = vsub.f32 %v11102_v57, %v11123_v62 }
0x2b4c   : > { %14935 = vmatprep.subr.bf16.mxu0 %v15487_v5 }
0x2b4e   : > { %13934 = vmatmul.mubr.f32.vlgmr.msra.gmra.mrb[16].mxu0 %v10602_v58  ;;  %v11217_v58 = vand.u32 4294901760, %v17149_v21 }
0x2b4f   : > { %14937 = vmatpush3.bf16.msra.mxu0 %v16993_v43  ;;  %13952 = vmatprep.mubr.msk.f32.mxu0 %vm15488_vm0, %v15489_v54 }
0x2b50   : > { %14938 = vmatprep.subr.bf16.mxu0 %v15487_v5  ;;  %v11218_v63 = vsub.f32 %v17149_v21, %v11217_v58 }
0x2b53   : > { %14940 = vmatpush3.bf16.msra.mxu0 %v17014_v2 }
0x2b54   : > { %14941 = vmatprep.subr.bf16.mxu0 %v15487_v5 }
0x2b57   : > { %14943 = vmatpush3.bf16.msra.mxu0 %v17027_v7 }
0x2b58   : > { %14944 = vmatprep.subr.bf16.mxu0 %v15487_v5 }
0x2b5b   : > { %14946 = vmatpush3.bf16.msra.mxu0 %v17032_v28 }
0x2b5c   : > { %14947 = vmatprep.subr.bf16.mxu0 %v15487_v5 }
0x2b5e   : > { %13953 = vmatmul.mubr.f32.vlgmr.msra.gmra.mrb[16].mxu0 %v10603_v11  ;;  %v11205_v11 = vand.u32 4294901760, %v11204_v33 }
0x2b5f   : > { %14949 = vmatpush3.bf16.msra.mxu0 %v14948_v0  ;;  %13971 = vmatprep.mubr.msk.f32.mxu0 %vm15488_vm0, %v15489_v54  ;;  %v17154_v0 = vsub.f32 %v11103_v47, %v11126_v51 }
0x2b60   : > { %14950 = vmatprep.subr.bf16.mxu0 %v15487_v5 }
0x2b63   : > { %14952 = vmatpush3.bf16.msra.mxu0 %v14951_v32  ;;  %v11129_v32 = vand.u32 4294901760, %v11104_v18 }
0x2b64   : > { %14953 = vmatprep.subr.bf16.mxu0 %v15487_v5 }
0x2b65   : > { %v17161_v52 = vsub.f32 %v11104_v18, %v11129_v32 }
0x2b67   : > { %14955 = vmatpush3.bf16.msra.mxu0 %v14954_v36  ;;  %v11132_v36 = vand.u32 4294901760, %v11105_v46 }
0x2b68   : > { %14956 = vmatprep.subr.bf16.mxu0 %v15487_v5 }
0x2b69   : > { %v17159_v16 = vpack.c.bf16 %v11132_v36, %v11129_v32  ;;  %v17163_v9 = vsub.f32 %v11105_v46, %v11132_v36 }
0x2b6b   : > { %14958 = vmatpush3.bf16.msra.mxu0 %v14957_v14  ;;  %v11196_v14 = vand.u32 4294901760, %v17135_v30  ;;  %14982 = vmatpush3.bf16.msra.mxu1 %v17159_v16 }
0x2b6c   : > { %14959 = vmatprep.subr.bf16.mxu0 %v15487_v5  ;;  %14983 = vmatprep.subr.bf16.mxu1 %v15487_v5 }
0x2b6d   : > { %v11197_v29 = vsub.f32 %v17135_v30, %v11196_v14 }
0x2b6e   : > { %13972 = vmatmul.mubr.f32.vlgmr.msra.gmra.mrb[16].mxu0 %v10601_v48 }
0x2b6f   : > { %14961 = vmatpush3.bf16.msra.mxu0 %v16993_v43  ;;  %13990 = vmatprep.mubr.msk.f32.mxu0 %vm15488_vm0, %v15489_v54  ;;  %v11198_v40 = vand.u32 4294901760, %v11197_v29 }
0x2b70   : > { %14962 = vmatprep.subr.bf16.mxu0 %v15487_v5 }
0x2b73   : > { %14964 = vmatpush3.bf16.msra.mxu0 %v17014_v2 }
0x2b74   : > { %14965 = vmatprep.subr.bf16.mxu0 %v15487_v5 }
0x2b77   : > { %14967 = vmatpush3.bf16.msra.mxu0 %v17027_v7 }
0x2b78   : > { %14968 = vmatprep.subr.bf16.mxu0 %v15487_v5 }
0x2b7b   : > { %14970 = vmatpush3.bf16.msra.mxu0 %v17032_v28 }
0x2b7e   : > { %13991 = vmatmul.mubr.f32.vlgmr.msra.gmra.mrb[16].mxu0 %v10601_v48  ;;  %v11210_v48 = vand.u32 4294901760, %v17147_v37 }
0x2b80   : > { %v11211_v59 = vsub.f32 %v17147_v37, %v11210_v48  ;;  %v15023_v31 = vpack.c.bf16 %v11217_v58, %v11210_v48 }
0x2c51   : > { %v11061_v42 = vpop.f32.mrb[16].mxu0 }
0x2c52   : > { %v15061_v43 = vadd.f32 %v11727_v6, %v11061_v42  ;;  %v13992_v1 = vpop.f32.mrb[17].mxu0  ;;  %v14984_v6 = vpack.c.bf16 %v11205_v11, %v11198_v40  ;;  %v11212_v42 = vand.u32 4294901760, %v11211_v59 }
0x2c53   : > { %v11224_v1 = vand.u32 4294901760, %v17152_v38 }
0x2c54   : > { %v11066_v12 = vsel %vm11065_vm5, %v15061_v43, -inf }
0x2c55   : > { %v11067_v23 = vrot.slane %v11066_v12, 4 }
0x2c57   : > { %v11068_v44 = vmax.f32 %v11066_v12, %v11067_v23  ;;  %v11231_v12 = vand.u32 4294901760, %v17154_v0 }
0x2c59   : > { %v11069_v45 = vrot.slane %v11068_v44, 2  ;;  %v15026_v60 = vpack.c.bf16 %v11231_v12, %v11224_v1 }
0x2c5b   : > { %v11070_v61 = vmax.f32 %v11068_v44, %v11069_v45  ;;  %v11225_v44 = vsub.f32 %v17152_v38, %v11224_v1  ;;  %v11232_v45 = vsub.f32 %v17154_v0, %v11231_v12 }
0x2c5d   : > { %v11071_v2 = vrot.slane %v11070_v61, 1 }
0x2c5f   : > { %v11072_v49 = vmax.f32 %v11070_v61, %v11071_v2  ;;  %v11226_v61 = vand.u32 4294901760, %v11225_v44  ;;  %v11233_v2 = vand.u32 4294901760, %v11232_v45 }
0x2c61   : > { %v11073_v35 = vsub.f32 %v15061_v43, %v11072_v49  ;;  %v11219_v43 = vand.u32 4294901760, %v11218_v63  ;;  %v11238_v49 = vand.u32 4294901760, %v17161_v52 }
0x2c63   : > { %v11074_v17 = vmul.f32 1.442695, %v11073_v35  ;;  %v14987_v23 = vpack.c.bf16 %v11219_v43, %v11212_v42  ;;  %v11245_v35 = vand.u32 4294901760, %v17163_v9 }
0x2c65   : > { %15416 = vpow2.f32 %v11074_v17  ;;  %v14990_v17 = vpack.c.bf16 %v11233_v2, %v11226_v61  ;;  %v15029_v10 = vpack.c.bf16 %v11245_v35, %v11238_v49 }
0x2c6f   : > { %v15417_v7 = vpop.eup %15416 }
0x2c70   : > { %v11076_v39 = vsel %vm11065_vm5, %v15417_v7, 0.0 }
0x2c71   : > { %v11077_v22 = vrot.slane %v11076_v39, 4 }
0x2c73   : > { %v11078_v28 = vadd.f32 %v11077_v22, %v11076_v39  ;;  %v11246_v39 = vsub.f32 %v17163_v9, %v11245_v35 }
0x2c75   : > { %v11079_v50 = vrot.slane %v11078_v28, 2 }
0x2c77   : > { %v11080_v19 = vadd.f32 %v11079_v50, %v11078_v28  ;;  %v11247_v28 = vand.u32 4294901760, %v11246_v39 }
0x2c79   : > { %v11081_v53 = vrot.slane %v11080_v19, 1 }
0x2c7b   : > { %v11082_v27 = vadd.f32 %v11081_v53, %v11080_v19  ;;  %v14996_v19 = vpack.c.bf16 %v17137_v3, %v17135_v30  ;;  %v14999_v53 = vpack.c.bf16 %v17149_v21, %v17147_v37 }
0x2c7d   : > { %15418 = vrcp.f32 %v11082_v27  ;;  %v15002_v27 = vpack.c.bf16 %v17154_v0, %v17152_v38 }
0x2c87   : > { %v15419_v15 = vpop.eup %15418 }
0x2c88   : > { %v11084_v4 = vmul.f32 %v15419_v15, %v15417_v7  ;;  %v11239_v7 = vsub.f32 %v17161_v52, %v11238_v49  ;;  %v15005_v15 = vpack.c.bf16 %v17163_v9, %v17161_v52 }
0x2c8a   : > { %11087 = vperm.xlu0 %15319, %v11084_v4   ;;  %v11240_v22 = vand.u32 4294901760, %v11239_v7  ;;  %v15020_v4 = vpack.c.bf16 %v11203_v13, %v11196_v14 }
0x2c8c   : > { %v14993_v50 = vpack.c.bf16 %v11247_v28, %v11240_v22 }
0x2d09   : > { %v11088_v20 = vpop.permute.xlu0 %11087 }
0x2d0a   : > { %v11090_v26 = vmul.f32 %v11088_v20, %v17068_v34  ;;  %v11106_v34 = vld [vmem:[%s17292_s13] sm:$0x1] }
0x2d0c   : > { %v11091_v41 = vsel %vm10524_vm4, %v11090_v26, 0.0 }
0x2d0d   : > { %v11092_v55 = vrot.slane %v11091_v41, 4 }
0x2d0f   : > { %v11093_v24 = vadd.f32 %v11092_v55, %v11091_v41 }
0x2d11   : > { %v11094_v57 = vrot.slane %v11093_v24, 2 }
0x2d13   : > { %v11095_v47 = vadd.f32 %v11094_v57, %v11093_v24 }
0x2d15   : > { %v11096_v62 = vrot.slane %v11095_v47, 1 }
0x2d17   : > { %v11097_v51 = vadd.f32 %v11096_v62, %v11095_v47 }
0x2d19   : > { %v11108_v30 = vsel %vm10524_vm4, %v11097_v51, 0 }
0x2d1a   : > { %v11183_v3 = vand.u32 4294901760, %v11108_v30 }
0x2d1c   : > { %v11184_v18 = vsub.f32 %v11108_v30, %v11183_v3 }
0x2d1e   : > { %v11185_v46 = vand.u32 4294901760, %v11184_v18 }
0x2d20   : > { %v11186_v37 = vsub.f32 %v11184_v18, %v11185_v46 }
0x2d22   : > { %v11187_v21 = vand.u32 4294901760, %v11186_v37 }
0x2d24   : > { %14010 = vmatmul.mubr.f32.vlgmr.msra.gmra.mrb[22].mxu1 %v11187_v21 }
0x2d25   : > { %14985 = vmatpush3.bf16.msra.mxu1 %v14984_v6  ;;  %14028 = vmatprep.mubr.msk.f32.mxu1 %vm15488_vm0, %v15489_v54 }
0x2d26   : > { %14986 = vmatprep.subr.bf16.mxu1 %v15487_v5 }
0x2d29   : > { %14988 = vmatpush3.bf16.msra.mxu1 %v14987_v23 }
0x2d2a   : > { %14989 = vmatprep.subr.bf16.mxu1 %v15487_v5 }
0x2d2d   : > { %14991 = vmatpush3.bf16.msra.mxu1 %v14990_v17 }
0x2d2e   : > { %14992 = vmatprep.subr.bf16.mxu1 %v15487_v5 }
0x2d31   : > { %14994 = vmatpush3.bf16.msra.mxu1 %v14993_v50 }
0x2d32   : > { %14995 = vmatprep.subr.bf16.mxu1 %v15487_v5 }
0x2d34   : > { %14029 = vmatmul.mubr.f32.vlgmr.msra.gmra.mrb[22].mxu1 %v11183_v3 }
0x2d35   : > { %14997 = vmatpush3.bf16.msra.mxu1 %v14996_v19  ;;  %14047 = vmatprep.mubr.msk.f32.mxu1 %vm15488_vm0, %v15489_v54 }
0x2d36   : > { %14998 = vmatprep.subr.bf16.mxu1 %v15487_v5 }
0x2d39   : > { %15000 = vmatpush3.bf16.msra.mxu1 %v14999_v53 }
0x2d3a   : > { %15001 = vmatprep.subr.bf16.mxu1 %v15487_v5 }
0x2d3d   : > { %15003 = vmatpush3.bf16.msra.mxu1 %v15002_v27 }
0x2d3e   : > { %15004 = vmatprep.subr.bf16.mxu1 %v15487_v5 }
0x2d41   : > { %15006 = vmatpush3.bf16.msra.mxu1 %v15005_v15 }
0x2d42   : > { %15007 = vmatprep.subr.bf16.mxu1 %v15487_v5 }
0x2d44   : > { %14048 = vmatmul.mubr.f32.vlgmr.msra.gmra.mrb[22].mxu1 %v11184_v18 }
0x2d45   : > { %15009 = vmatpush3.bf16.msra.mxu1 %v17115_v25  ;;  %14066 = vmatprep.mubr.msk.f32.mxu1 %vm15488_vm0, %v15489_v54 }
0x2d46   : > { %15010 = vmatprep.subr.bf16.mxu1 %v15487_v5 }
0x2d49   : > { %15012 = vmatpush3.bf16.msra.mxu1 %v17125_v56 }
0x2d4a   : > { %15013 = vmatprep.subr.bf16.mxu1 %v15487_v5 }
0x2d4d   : > { %15015 = vmatpush3.bf16.msra.mxu1 %v17139_v8 }
0x2d4e   : > { %15016 = vmatprep.subr.bf16.mxu1 %v15487_v5 }
0x2d51   : > { %15018 = vmatpush3.bf16.msra.mxu1 %v17159_v16 }
0x2d52   : > { %15019 = vmatprep.subr.bf16.mxu1 %v15487_v5 }
0x2d54   : > { %14067 = vmatmul.mubr.f32.vlgmr.msra.gmra.mrb[22].mxu1 %v11185_v46 }
0x2d55   : > { %15021 = vmatpush3.bf16.msra.mxu1 %v15020_v4  ;;  %14085 = vmatprep.mubr.msk.f32.mxu1 %vm15488_vm0, %v15489_v54 }
0x2d56   : > { %15022 = vmatprep.subr.bf16.mxu1 %v15487_v5 }
0x2d59   : > { %15024 = vmatpush3.bf16.msra.mxu1 %v15023_v31 }
0x2d5a   : > { %15025 = vmatprep.subr.bf16.mxu1 %v15487_v5 }
0x2d5d   : > { %15027 = vmatpush3.bf16.msra.mxu1 %v15026_v60 }
0x2d5e   : > { %15028 = vmatprep.subr.bf16.mxu1 %v15487_v5 }
0x2d61   : > { %15030 = vmatpush3.bf16.msra.mxu1 %v15029_v10 }
0x2d62   : > { %15031 = vmatprep.subr.bf16.mxu1 %v15487_v5 }
0x2d64   : > { %14086 = vmatmul.mubr.f32.vlgmr.msra.gmra.mrb[22].mxu1 %v11183_v3 }
0x2d65   : > { %15033 = vmatpush3.bf16.msra.mxu1 %v17115_v25  ;;  %14104 = vmatprep.mubr.msk.f32.mxu1 %vm15488_vm0, %v15489_v54 }
0x2d66   : > { %15034 = vmatprep.subr.bf16.mxu1 %v15487_v5 }
0x2d69   : > { %15036 = vmatpush3.bf16.msra.mxu1 %v17125_v56 }
0x2d6a   : > { %15037 = vmatprep.subr.bf16.mxu1 %v15487_v5 }
0x2d6d   : > { %15039 = vmatpush3.bf16.msra.mxu1 %v17139_v8 }
0x2d6e   : > { %15040 = vmatprep.subr.bf16.mxu1 %v15487_v5 }
0x2d71   : > { %15042 = vmatpush3.bf16.msra.mxu1 %v17159_v16 }
0x2d74   : > { %14105 = vmatmul.mubr.f32.vlgmr.msra.gmra.mrb[22].mxu1 %v11183_v3 }
0x2e47   : > { %v11643_v54 = vpop.f32.mrb[22].mxu1 }
0x2e48   : > { %v15062_v25 = vadd.f32 %v11643_v54, %v11106_v34  ;;  %v14106_v56 = vpop.f32.mrb[23].mxu1 }
0x2e4a   : > { %11647 = vst [vmem:[%s459_s26] sm:$0x1] %v15062_v25 }
0x2e4b   : > { %15435 = shalt.err (!%p15432_p3)
}
0x2e4c   : > { %s15436_s30 = scalar_lea.hbm %s17237_s23, 16  ;;  %s15440_s22 = scalar_lea.hbm %s17293_s14, 32 }
0x2e4d   : > { %p15437_p4 = scmp.ne.s32.totalorder %s17237_s23, %s15436_s30  ;;  %p15441_p9 = scmp.lt.u32.totalorder %s17237_s23, %s17293_s14 }
0x2e4e   : > { %p15442_p10 = scmp.lt.u32.totalorder %s15440_s22, %s15436_s30  ;;  %p15444_p12 = scmp.lt.u32.totalorder %s15436_s30, %s17237_s23 }
0x2e4f   : > { %p15438_p7 = pnand %p15437_p4, %p15610_p5 }
0x2e50   : > { %p15443_p11 = por %p15442_p10, %p15441_p9 }
0x2e51   : > { %p15439_p8 = pneg %p15438_p7 }
0x2e52   : > { %p15445_p13 = por %p15444_p12, %p15443_p11 }
0x2e54   : > { %p15446_p0 = pnand %p15445_p13, %p15439_p8 }
0x2e56   : > { %15449 = shalt.err (!%p15446_p0)
}
0x2e57   : > { %15273 = dma.vmem_to_hbm [thread:$0]  (%p15610_p5), %s17239_s21, 16, %s17237_s23, %s11649_s17  }
0x2e58 PF: > { %p15279_p1 = scmp.ge.s32.totalorder %s15484_s18, 2  ;;  %s11673_s0 = sand.u32 1, %s15472_s15  }
0x2e59   : > { %s11674_s19 = scalar_lea.sflag [#allocation5], %s11673_s0 }
0x2e5a   : > { %p15276_p2 = pnand %p15279_p1, %p15614_p6 }
0x2e5c   : > { %15467 = dma.done.wait (!%p15276_p2), %s11674_s19, 16  }
0x2e5d   : > { %15469 = vsyncadd (!%p15276_p2), %s11674_s19, 4294967280  ;;  %s17305_s28 = sld [smem:[#allocation7_spill]]  ;;  %s17306_s17 = sld [smem:[#allocation8_spill]] }
0x2e5e   : > { %p26_p3 = scmp.ge.s32.totalorder %s15597_s20, 4   ;;  %s17307_s15 = smov %s15476_s16 }
0x2e5f   : > { %s17309_s18 = smov %s15597_s20 }
0x2e60   :  { %28 = sbr.rel (!%p26_p3) target bundleno = 6 (0x6), region = 111 }
0x2e63   : > { %s17308_s16 = smov %s17305_s28 }
0x2e67   :  { %11678 = vsyncpa [#allocation5], 1 }
0x2e68   :  { %11680 = vsyncpa [#allocation5 + $0x1], 1 }

</bundles_post_ra>
